<compile_context>
chip_gen: v7x
topology: tpu7x:2x2x1
jax: 0.10.0
libtpu: 0.0.40
codegen_flags: <defaults>
</compile_context>

<pallas_src>
import numpy as np
import jax
import jax.numpy as jnp
from jax.experimental import pallas as pl
from jax.experimental.pallas import tpu as pltpu

# ----------------------- configuration (small shapes) -----------------------
IMG = 16          # images_dim
C   = 4           # input_channel
PS  = 4           # patch_size
D   = 32          # token_dim
H   = 2           # n_heads
M   = 64          # mlp_layer_size
NB  = 3           # t_blocks
N   = 2           # batch
P   = (IMG // PS) ** 2        # 16 patches
T   = P + 1                   # 17 tokens (class token + patches)
DP  = C * PS * PS             # 64 = flattened patch dim
EPS = 1e-5
SCALE = 1.0 / np.sqrt(T - 1)  # reference scales by sqrt(number_tokens - 1)
SKIP_IDX = [3, 6, 9, 12]


# ------------------------------ in-kernel math ------------------------------
def _erf(x):
    # TODO(synk): exact erf lowering is not guaranteed in Mosaic; use
    # Abramowitz & Stegun 7.1.26 polynomial (max abs err ~1.5e-7) instead.
    a1, a2, a3, a4, a5 = 0.254829592, -0.284496736, 1.421413741, -1.453152027, 1.061405429
    p = 0.3275911
    sgn = jnp.where(x >= 0.0, 1.0, -1.0)
    ax = jnp.abs(x)
    t = 1.0 / (1.0 + p * ax)
    poly = ((((a5 * t + a4) * t + a3) * t + a2) * t + a1) * t
    y = 1.0 - poly * jnp.exp(-ax * ax)
    return sgn * y


def _gelu(x):
    # nn.GELU() default (exact, erf-based)
    return 0.5 * x * (1.0 + _erf(x * 0.7071067811865476))


def _layer_norm(x, w, b):
    mu = jnp.mean(x, axis=-1, keepdims=True)
    var = jnp.mean(jnp.square(x - mu), axis=-1, keepdims=True)
    return (x - mu) * jax.lax.rsqrt(var + EPS) * w + b


# --------------------------------- kernel -----------------------------------
def make_vit_kernel(nsub, out_slot):
    """nsub: images handled per grid step; out_slot: {block_idx: output slot}."""

    def vit_kernel(patches_ref,          # (nsub, P, DP)
                   pwb_ref,              # (DP+1, D)   rows 0..DP-1 = W, row DP = b
                   clspos_ref,           # (T, D)      row 0 = cls + pos[0], rows 1.. = pos[1:]
                   wqkv_ref,             # (NB, D+1, 3*H*D)  rows 0..D-1 = W, row D = b
                   wmap_ref,             # (NB, T, H*T)
                   bmap_ref,             # (NB, T, 1)
                   lnp_ref,              # (NB, 4, D)  rows: ln1w, ln1b, ln2w, ln2b
                   w1b_ref,              # (NB, D+1, M)
                   w2b_ref,              # (NB, M+1, D)
                   out_ref):             # (nsub, n_out, T, D)
        pwb = pwb_ref[...]
        pw, pb = pwb[:DP], pwb[DP:DP + 1]
        clspos = clspos_ref[...]
        row0, pos_rest = clspos[0:1], clspos[1:]            # (1, D), (P, D)

        # Patch embedding for all images in this block in one matmul.
        pat = patches_ref[...].reshape(nsub * P, DP)
        emb = jnp.dot(pat, pw, preferred_element_type=jnp.float32) + pb   # (nsub*P, D)

        # Build the token matrix, image-major: [cls+pos0; patches_i + pos_rest] ...
        rows = []
        for n in range(nsub):
            rows.append(row0)
            rows.append(emb[n * P:(n + 1) * P] + pos_rest)
        x = jnp.concatenate(rows, axis=0)                   # (nsub*T, D)

        for blk in range(NB):
            # ---------------- MSA ----------------
            wqkv = wqkv_ref[blk]                            # (D+1, 3*H*D)
            qkv = (jnp.dot(x, wqkv[:D], preferred_element_type=jnp.float32)
                   + wqkv[D:D + 1])                         # (nsub*T, 3*H*D)
            wmap = wmap_ref[blk]                            # (T, H*T)
            bmap = bmap_ref[blk]                            # (T, 1)

            msa_rows = []
            for n in range(nsub):
                r0 = n * T
                heads = []
                for h in range(H):
                    q = qkv[r0:r0 + T, (0 * H + h) * D:(0 * H + h + 1) * D]
                    k = qkv[r0:r0 + T, (1 * H + h) * D:(1 * H + h + 1) * D]
                    v = qkv[r0:r0 + T, (2 * H + h) * D:(2 * H + h + 1) * D]
                    s = jax.lax.dot_general(q, k, (((1,), (1,)), ((), ())),
                                            preferred_element_type=jnp.float32) * SCALE
                    s = s - jnp.max(s, axis=-1, keepdims=True)
                    e = jnp.exp(s)
                    attn = e * pl.reciprocal(jnp.sum(e, axis=-1, keepdims=True),
                                             approx=True)
                    heads.append(jnp.dot(attn, v,
                                         preferred_element_type=jnp.float32))   # (T, D)
                # linear_map over the flattened (heads*tokens) axis, head-major stack
                concat_heads = jnp.concatenate(heads, axis=0)                    # (H*T, D)
                msa_rows.append(jnp.dot(wmap, concat_heads,
                                        preferred_element_type=jnp.float32) + bmap)
            msa = jnp.concatenate(msa_rows, axis=0) if nsub > 1 else msa_rows[0]

            # residual + LN1  (dropout is identity at inference)
            lnp = lnp_ref[blk]                              # (4, D)
            x = _layer_norm(x + msa, lnp[0:1], lnp[1:2])

            # ---------------- MLP ----------------
            w1b = w1b_ref[blk]
            h1 = _gelu(jnp.dot(x, w1b[:D], preferred_element_type=jnp.float32)
                       + w1b[D:D + 1])
            w2b = w2b_ref[blk]
            m = (jnp.dot(h1, w2b[:M], preferred_element_type=jnp.float32)
                 + w2b[M:M + 1])

            # residual + LN2
            x = _layer_norm(x + m, lnp[2:3], lnp[3:4])

            # Only write the block outputs that are actually consumed.
            if blk in out_slot:
                slot = out_slot[blk]
                out_ref[:, slot:slot + 1, :, :] = x.reshape(nsub, 1, T, D)

    return vit_kernel


# --------------------------------- glue -------------------------------------
def get_positional_embeddings(seq_len, d):
    i = np.arange(seq_len, dtype=np.float64)[:, None]
    j = np.arange(d, dtype=np.float64)[None, :]
    even = np.sin(i / (10000.0 ** (j / d)))
    odd = np.cos(i / (10000.0 ** ((j - 1) / d)))
    return jnp.asarray(np.where(j % 2 == 0, even, odd), dtype=jnp.float32)


def patching(images, patch_size):
    # einops: 'b c (px h) (py w) -> b (h w) (px py c)'
    b, c, Hh, Ww = images.shape
    h, w = Hh // patch_size, Ww // patch_size
    x = images.reshape(b, c, patch_size, h, patch_size, w)
    x = x.transpose(0, 3, 5, 2, 4, 1)                # b, h, w, px, py, c
    return x.reshape(b, h * w, patch_size * patch_size * c)


def init_params(key):
    def lin(k, fan_in, shape):
        bound = 1.0 / np.sqrt(fan_in)
        return jax.random.uniform(k, shape, jnp.float32, -bound, bound)

    ks = iter(jax.random.split(key, 32))
    pw = lin(next(ks), DP, (DP, D))
    pb = lin(next(ks), DP, (1, D))
    cls = jax.random.uniform(next(ks), (1, D), jnp.float32)       # torch.rand
    qw = lin(next(ks), D, (NB, H, D, D)); qb = lin(next(ks), D, (NB, H, 1, D))
    kw = lin(next(ks), D, (NB, H, D, D)); kb = lin(next(ks), D, (NB, H, 1, D))
    vw = lin(next(ks), D, (NB, H, D, D)); vb = lin(next(ks), D, (NB, H, 1, D))
    # linear_map: Linear(H*T -> T); weight (T, H*T), head-major flatten of concat
    mapw = lin(next(ks), H * T, (NB, T, H * T))
    mapb = lin(next(ks), H * T, (NB, T, 1))
    ln1w = jnp.ones((NB, 1, D), jnp.float32); ln1b = jnp.zeros((NB, 1, D), jnp.float32)
    w1 = lin(next(ks), D, (NB, D, M)); b1 = lin(next(ks), D, (NB, 1, M))
    w2 = lin(next(ks), M, (NB, M, D)); b2 = lin(next(ks), M, (NB, 1, D))
    ln2w = jnp.ones((NB, 1, D), jnp.float32); ln2b = jnp.zeros((NB, 1, D), jnp.float32)

    # ---- pack into a small number of kernel inputs ----
    def pack_w(w):   # (NB, H, D, D) -> (NB, D, H*D), head h occupies cols h*D:(h+1)*D
        return w.transpose(0, 2, 1, 3).reshape(NB, D, H * D)

    def pack_b(b):   # (NB, H, 1, D) -> (NB, 1, H*D)
        return b.transpose(0, 2, 1, 3).reshape(NB, 1, H * D)

    wqkv_w = jnp.concatenate([pack_w(qw), pack_w(kw), pack_w(vw)], axis=-1)   # (NB, D, 3HD)
    wqkv_b = jnp.concatenate([pack_b(qb), pack_b(kb), pack_b(vb)], axis=-1)   # (NB, 1, 3HD)

    return {
        "pwb":  jnp.concatenate([pw, pb], axis=0),                 # (DP+1, D)
        "cls":  cls,                                               # (1, D)
        "wqkv": jnp.concatenate([wqkv_w, wqkv_b], axis=1),         # (NB, D+1, 3HD)
        "wmap": mapw,                                              # (NB, T, H*T)
        "bmap": mapb,                                              # (NB, T, 1)
        "lnp":  jnp.concatenate([ln1w, ln1b, ln2w, ln2b], axis=1), # (NB, 4, D)
        "w1b":  jnp.concatenate([w1, b1], axis=1),                 # (NB, D+1, M)
        "w2b":  jnp.concatenate([w2, b2], axis=1),                 # (NB, M+1, D)
    }


def _const_spec(arr):
    nd = arr.ndim
    return pl.BlockSpec(arr.shape, lambda i, _nd=nd: (0,) * _nd)


def _choose_nsub(n):
    # Fold the batch into each block, but keep >= 2 grid steps when possible
    # so both TensorCores on a v7x chip get work.
    if n <= 1:
        return 1
    nsub = min(n // 2, 32)
    while nsub > 1 and n % nsub != 0:
        nsub -= 1
    return max(nsub, 1)


def vit_forward(images, params, pos):
    n_images = images.shape[0]
    nsub = _choose_nsub(n_images)
    patches = patching(images, PS)                                    # (N, P, DP)

    # row 0 = class token + pos[0]; rows 1.. = pos for the patch tokens
    clspos = jnp.concatenate([params["cls"] + pos[0:1], pos[1:]], axis=0)   # (T, D)

    # Only the block outputs that are consumed (last block + skip indices).
    needed = sorted(set([s - 1 for s in SKIP_IDX if s <= NB] + [NB - 1]))
    out_slot = {b: i for i, b in enumerate(needed)}
    n_out = len(needed)

    const_args = [params["pwb"], clspos, params["wqkv"], params["wmap"],
                  params["bmap"], params["lnp"], params["w1b"], params["w2b"]]

    kernel = make_vit_kernel(nsub, out_slot)

    out_all = pl.pallas_call(
        kernel,
        out_shape=jax.ShapeDtypeStruct((n_images, n_out, T, D), jnp.float32),
        grid_spec=pltpu.PrefetchScalarGridSpec(
            num_scalar_prefetch=0,
            grid=(n_images // nsub,),
            in_specs=[pl.BlockSpec((nsub, P, DP), lambda i: (i, 0, 0))]
                     + [_const_spec(a) for a in const_args],
            out_specs=pl.BlockSpec((nsub, n_out, T, D), lambda i: (i, 0, 0, 0)),
        ),
        compiler_params=pltpu.CompilerParams(dimension_semantics=("parallel",)),
    )(patches, *const_args)

    skip_connections = [out_all[:, out_slot[s - 1], 1:, :] for s in SKIP_IDX if s <= NB]
    out = out_all[:, out_slot[NB - 1], 1:, :]     # classification=False -> drop class token
    return out, skip_connections


if __name__ == "__main__":
    key = jax.random.PRNGKey(0)
    pkey, xkey = jax.random.split(key)
    params = init_params(pkey)
    pos = get_positional_embeddings(T, D)
    images = jax.random.normal(xkey, (N, C, IMG, IMG), dtype=jnp.float32)

    fwd = jax.jit(lambda imgs: vit_forward(imgs, params, pos))
    out, skips = fwd(images)
    out = jax.block_until_ready(out)
    skips = [jax.block_until_ready(s) for s in skips]

    assert out.shape == (N, P, D), out.shape
    assert len(skips) == len([s for s in SKIP_IDX if s <= NB])
    for s in skips:
        assert s.shape == (N, P, D)
    assert bool(jnp.all(jnp.isfinite(out)))
    print("KERNEL_OK")
</pallas_src>

<mosaic_0001>
module attributes {stable_mosaic.version = 11 : i64} {
  func.func @vit_kernel(%arg0: i32, %arg1: memref<1x16x64xf32, #tpu.memory_space<vmem>>, %arg2: memref<65x32xf32, #tpu.memory_space<vmem>>, %arg3: memref<17x32xf32, #tpu.memory_space<vmem>>, %arg4: memref<3x33x192xf32, #tpu.memory_space<vmem>>, %arg5: memref<3x17x34xf32, #tpu.memory_space<vmem>>, %arg6: memref<3x17x1xf32, #tpu.memory_space<vmem>>, %arg7: memref<3x4x32xf32, #tpu.memory_space<vmem>>, %arg8: memref<3x33x64xf32, #tpu.memory_space<vmem>>, %arg9: memref<3x65x32xf32, #tpu.memory_space<vmem>>, %arg10: memref<1x1x17x32xf32, #tpu.memory_space<vmem>>) attributes {dimension_semantics = [#tpu.dimension_semantics<parallel>], iteration_bounds = array<i64: 2>, scalar_prefetch = 0 : i64, scratch_operands = 0 : i64, tpu.core_type = #tpu.core_type<tc>, window_params = [{transform_indices = @transform_0, window_bounds = array<i64: 1, 16, 64>}, {pipeline_mode = #tpu.pipeline_mode<synchronous>, transform_indices = @transform_1, window_bounds = array<i64: 65, 32>}, {pipeline_mode = #tpu.pipeline_mode<synchronous>, transform_indices = @transform_2, window_bounds = array<i64: 17, 32>}, {pipeline_mode = #tpu.pipeline_mode<synchronous>, transform_indices = @transform_3, window_bounds = array<i64: 3, 33, 192>}, {pipeline_mode = #tpu.pipeline_mode<synchronous>, transform_indices = @transform_4, window_bounds = array<i64: 3, 17, 34>}, {pipeline_mode = #tpu.pipeline_mode<synchronous>, transform_indices = @transform_5, window_bounds = array<i64: 3, 17, 1>}, {pipeline_mode = #tpu.pipeline_mode<synchronous>, transform_indices = @transform_6, window_bounds = array<i64: 3, 4, 32>}, {pipeline_mode = #tpu.pipeline_mode<synchronous>, transform_indices = @transform_7, window_bounds = array<i64: 3, 33, 64>}, {pipeline_mode = #tpu.pipeline_mode<synchronous>, transform_indices = @transform_8, window_bounds = array<i64: 3, 65, 32>}, {transform_indices = @transform_9, window_bounds = array<i64: 1, 1, 17, 32>}]} {
    %c0 = arith.constant 0 : index
    %c0_0 = arith.constant 0 : index
    %0 = vector.load %arg2[%c0, %c0_0] : memref<65x32xf32, #tpu.memory_space<vmem>>, vector<65x32xf32>
    %1 = vector.extract_strided_slice %0 {offsets = [0, 0], sizes = [64, 32], strides = [1, 1]} : vector<65x32xf32> to vector<64x32xf32>
    %2 = vector.extract_strided_slice %0 {offsets = [64, 0], sizes = [1, 32], strides = [1, 1]} : vector<65x32xf32> to vector<1x32xf32>
    %c0_1 = arith.constant 0 : index
    %c0_2 = arith.constant 0 : index
    %3 = vector.load %arg3[%c0_1, %c0_2] : memref<17x32xf32, #tpu.memory_space<vmem>>, vector<17x32xf32>
    %4 = vector.extract_strided_slice %3 {offsets = [0, 0], sizes = [1, 32], strides = [1, 1]} : vector<17x32xf32> to vector<1x32xf32>
    %5 = vector.extract_strided_slice %3 {offsets = [1, 0], sizes = [16, 32], strides = [1, 1]} : vector<17x32xf32> to vector<16x32xf32>
    %c0_3 = arith.constant 0 : index
    %c0_4 = arith.constant 0 : index
    %c0_5 = arith.constant 0 : index
    %6 = vector.load %arg1[%c0_3, %c0_4, %c0_5] : memref<1x16x64xf32, #tpu.memory_space<vmem>>, vector<1x16x64xf32>
    %7 = vector.shape_cast %6 : vector<1x16x64xf32> to vector<16x64xf32>
    %cst = arith.constant dense<0.000000e+00> : vector<16x32xf32>
    %8 = tpu.matmul %7, %1, %cst {dimension_numbers = #tpu.dot_dimension_numbers<[1], [0], [0], [1], [0, 0, 1, 1], [], []>} : vector<16x64xf32>, vector<64x32xf32>, vector<16x32xf32> -> vector<16x32xf32>
    %9 = vector.broadcast %2 : vector<1x32xf32> to vector<16x32xf32>
    %10 = arith.addf %8, %9 : vector<16x32xf32>
    %11 = arith.addf %10, %5 : vector<16x32xf32>
    %12 = tpu.concatenate %4, %11 in 0 : vector<1x32xf32>, vector<16x32xf32> -> vector<17x32xf32>
    %c0_6 = arith.constant 0 : index
    %c0_7 = arith.constant 0 : index
    %c0_8 = arith.constant 0 : index
    %13 = vector.load %arg4[%c0_6, %c0_7, %c0_8] : memref<3x33x192xf32, #tpu.memory_space<vmem>>, vector<1x33x192xf32>
    %14 = vector.shape_cast %13 : vector<1x33x192xf32> to vector<33x192xf32>
    %15 = vector.extract_strided_slice %14 {offsets = [0, 0], sizes = [32, 192], strides = [1, 1]} : vector<33x192xf32> to vector<32x192xf32>
    %cst_9 = arith.constant dense<0.000000e+00> : vector<17x192xf32>
    %16 = tpu.matmul %12, %15, %cst_9 {dimension_numbers = #tpu.dot_dimension_numbers<[1], [0], [0], [1], [0, 0, 1, 1], [], []>} : vector<17x32xf32>, vector<32x192xf32>, vector<17x192xf32> -> vector<17x192xf32>
    %17 = vector.extract_strided_slice %14 {offsets = [32, 0], sizes = [1, 192], strides = [1, 1]} : vector<33x192xf32> to vector<1x192xf32>
    %18 = vector.broadcast %17 : vector<1x192xf32> to vector<17x192xf32>
    %19 = arith.addf %16, %18 : vector<17x192xf32>
    %c0_10 = arith.constant 0 : index
    %c0_11 = arith.constant 0 : index
    %c0_12 = arith.constant 0 : index
    %20 = vector.load %arg5[%c0_10, %c0_11, %c0_12] : memref<3x17x34xf32, #tpu.memory_space<vmem>>, vector<1x17x34xf32>
    %21 = vector.shape_cast %20 : vector<1x17x34xf32> to vector<17x34xf32>
    %c0_13 = arith.constant 0 : index
    %c0_14 = arith.constant 0 : index
    %c0_15 = arith.constant 0 : index
    %22 = vector.load %arg6[%c0_13, %c0_14, %c0_15] : memref<3x17x1xf32, #tpu.memory_space<vmem>>, vector<1x17x1xf32>
    %23 = vector.shape_cast %22 : vector<1x17x1xf32> to vector<17x1xf32>
    %24 = vector.extract_strided_slice %19 {offsets = [0, 0], sizes = [17, 32], strides = [1, 1]} : vector<17x192xf32> to vector<17x32xf32>
    %25 = vector.extract_strided_slice %19 {offsets = [0, 64], sizes = [17, 32], strides = [1, 1]} : vector<17x192xf32> to vector<17x32xf32>
    %26 = vector.extract_strided_slice %19 {offsets = [0, 128], sizes = [17, 32], strides = [1, 1]} : vector<17x192xf32> to vector<17x32xf32>
    %cst_16 = arith.constant dense<0.000000e+00> : vector<17x17xf32>
    %27 = tpu.matmul %24, %25, %cst_16 {dimension_numbers = #tpu.dot_dimension_numbers<[1], [1], [0], [0], [0, 0, 1, 0], [], []>} : vector<17x32xf32>, vector<17x32xf32>, vector<17x17xf32> -> vector<17x17xf32>
    %cst_17 = arith.constant 2.500000e-01 : f32
    %28 = vector.broadcast %cst_17 : f32 to vector<17x17xf32>
    %29 = arith.mulf %27, %28 : vector<17x17xf32>
    %cst_18 = arith.constant dense<0xFF800000> : vector<17xf32>
    %30 = vector.multi_reduction <maximumf>, %29, %cst_18 [1] : vector<17x17xf32> to vector<17xf32>
    %31 = vector.shape_cast %30 : vector<17xf32> to vector<17x1xf32>
    %32 = vector.broadcast %31 : vector<17x1xf32> to vector<17x17xf32>
    %33 = arith.subf %29, %32 : vector<17x17xf32>
    %34 = math.exp %33 : vector<17x17xf32>
    %cst_19 = arith.constant dense<0.000000e+00> : vector<17xf32>
    %35 = vector.multi_reduction <add>, %34, %cst_19 [1] : vector<17x17xf32> to vector<17xf32>
    %36 = vector.shape_cast %35 : vector<17xf32> to vector<17x1xf32>
    %37 = tpu.reciprocal %36 {approx = true} : vector<17x1xf32> -> vector<17x1xf32>
    %38 = vector.broadcast %37 : vector<17x1xf32> to vector<17x17xf32>
    %39 = arith.mulf %34, %38 : vector<17x17xf32>
    %cst_20 = arith.constant dense<0.000000e+00> : vector<17x32xf32>
    %40 = tpu.matmul %39, %26, %cst_20 {dimension_numbers = #tpu.dot_dimension_numbers<[1], [0], [0], [1], [0, 0, 1, 1], [], []>} : vector<17x17xf32>, vector<17x32xf32>, vector<17x32xf32> -> vector<17x32xf32>
    %41 = vector.extract_strided_slice %19 {offsets = [0, 32], sizes = [17, 32], strides = [1, 1]} : vector<17x192xf32> to vector<17x32xf32>
    %42 = vector.extract_strided_slice %19 {offsets = [0, 96], sizes = [17, 32], strides = [1, 1]} : vector<17x192xf32> to vector<17x32xf32>
    %43 = vector.extract_strided_slice %19 {offsets = [0, 160], sizes = [17, 32], strides = [1, 1]} : vector<17x192xf32> to vector<17x32xf32>
    %cst_21 = arith.constant dense<0.000000e+00> : vector<17x17xf32>
    %44 = tpu.matmul %41, %42, %cst_21 {dimension_numbers = #tpu.dot_dimension_numbers<[1], [1], [0], [0], [0, 0, 1, 0], [], []>} : vector<17x32xf32>, vector<17x32xf32>, vector<17x17xf32> -> vector<17x17xf32>
    %cst_22 = arith.constant 2.500000e-01 : f32
    %45 = vector.broadcast %cst_22 : f32 to vector<17x17xf32>
    %46 = arith.mulf %44, %45 : vector<17x17xf32>
    %cst_23 = arith.constant dense<0xFF800000> : vector<17xf32>
    %47 = vector.multi_reduction <maximumf>, %46, %cst_23 [1] : vector<17x17xf32> to vector<17xf32>
    %48 = vector.shape_cast %47 : vector<17xf32> to vector<17x1xf32>
    %49 = vector.broadcast %48 : vector<17x1xf32> to vector<17x17xf32>
    %50 = arith.subf %46, %49 : vector<17x17xf32>
    %51 = math.exp %50 : vector<17x17xf32>
    %cst_24 = arith.constant dense<0.000000e+00> : vector<17xf32>
    %52 = vector.multi_reduction <add>, %51, %cst_24 [1] : vector<17x17xf32> to vector<17xf32>
    %53 = vector.shape_cast %52 : vector<17xf32> to vector<17x1xf32>
    %54 = tpu.reciprocal %53 {approx = true} : vector<17x1xf32> -> vector<17x1xf32>
    %55 = vector.broadcast %54 : vector<17x1xf32> to vector<17x17xf32>
    %56 = arith.mulf %51, %55 : vector<17x17xf32>
    %cst_25 = arith.constant dense<0.000000e+00> : vector<17x32xf32>
    %57 = tpu.matmul %56, %43, %cst_25 {dimension_numbers = #tpu.dot_dimension_numbers<[1], [0], [0], [1], [0, 0, 1, 1], [], []>} : vector<17x17xf32>, vector<17x32xf32>, vector<17x32xf32> -> vector<17x32xf32>
    %58 = tpu.concatenate %40, %57 in 0 : vector<17x32xf32>, vector<17x32xf32> -> vector<34x32xf32>
    %cst_26 = arith.constant dense<0.000000e+00> : vector<17x32xf32>
    %59 = tpu.matmul %21, %58, %cst_26 {dimension_numbers = #tpu.dot_dimension_numbers<[1], [0], [0], [1], [0, 0, 1, 1], [], []>} : vector<17x34xf32>, vector<34x32xf32>, vector<17x32xf32> -> vector<17x32xf32>
    %60 = vector.broadcast %23 : vector<17x1xf32> to vector<17x32xf32>
    %61 = arith.addf %59, %60 : vector<17x32xf32>
    %c0_27 = arith.constant 0 : index
    %c0_28 = arith.constant 0 : index
    %c0_29 = arith.constant 0 : index
    %62 = vector.load %arg7[%c0_27, %c0_28, %c0_29] : memref<3x4x32xf32, #tpu.memory_space<vmem>>, vector<1x4x32xf32>
    %63 = vector.shape_cast %62 : vector<1x4x32xf32> to vector<4x32xf32>
    %64 = arith.addf %12, %61 : vector<17x32xf32>
    %65 = vector.extract_strided_slice %63 {offsets = [0, 0], sizes = [1, 32], strides = [1, 1]} : vector<4x32xf32> to vector<1x32xf32>
    %66 = vector.extract_strided_slice %63 {offsets = [1, 0], sizes = [1, 32], strides = [1, 1]} : vector<4x32xf32> to vector<1x32xf32>
    %cst_30 = arith.constant dense<0.000000e+00> : vector<17xf32>
    %67 = vector.multi_reduction <add>, %64, %cst_30 [1] : vector<17x32xf32> to vector<17xf32>
    %68 = vector.shape_cast %67 : vector<17xf32> to vector<17x1xf32>
    %cst_31 = arith.constant 3.200000e+01 : f32
    %69 = vector.broadcast %cst_31 : f32 to vector<17x1xf32>
    %70 = arith.divf %68, %69 : vector<17x1xf32>
    %71 = vector.broadcast %70 : vector<17x1xf32> to vector<17x32xf32>
    %72 = arith.subf %64, %71 : vector<17x32xf32>
    %73 = arith.mulf %72, %72 : vector<17x32xf32>
    %cst_32 = arith.constant dense<0.000000e+00> : vector<17xf32>
    %74 = vector.multi_reduction <add>, %73, %cst_32 [1] : vector<17x32xf32> to vector<17xf32>
    %75 = vector.shape_cast %74 : vector<17xf32> to vector<17x1xf32>
    %cst_33 = arith.constant 3.200000e+01 : f32
    %76 = vector.broadcast %cst_33 : f32 to vector<17x1xf32>
    %77 = arith.divf %75, %76 : vector<17x1xf32>
    %78 = vector.broadcast %70 : vector<17x1xf32> to vector<17x32xf32>
    %79 = arith.subf %64, %78 : vector<17x32xf32>
    %cst_34 = arith.constant 9.99999974E-6 : f32
    %80 = vector.broadcast %cst_34 : f32 to vector<17x1xf32>
    %81 = arith.addf %77, %80 : vector<17x1xf32>
    %82 = math.rsqrt %81 : vector<17x1xf32>
    %83 = vector.broadcast %82 : vector<17x1xf32> to vector<17x32xf32>
    %84 = arith.mulf %79, %83 : vector<17x32xf32>
    %85 = vector.broadcast %65 : vector<1x32xf32> to vector<17x32xf32>
    %86 = arith.mulf %84, %85 : vector<17x32xf32>
    %87 = vector.broadcast %66 : vector<1x32xf32> to vector<17x32xf32>
    %88 = arith.addf %86, %87 : vector<17x32xf32>
    %c0_35 = arith.constant 0 : index
    %c0_36 = arith.constant 0 : index
    %c0_37 = arith.constant 0 : index
    %89 = vector.load %arg8[%c0_35, %c0_36, %c0_37] : memref<3x33x64xf32, #tpu.memory_space<vmem>>, vector<1x33x64xf32>
    %90 = vector.shape_cast %89 : vector<1x33x64xf32> to vector<33x64xf32>
    %91 = vector.extract_strided_slice %90 {offsets = [0, 0], sizes = [32, 64], strides = [1, 1]} : vector<33x64xf32> to vector<32x64xf32>
    %cst_38 = arith.constant dense<0.000000e+00> : vector<17x64xf32>
    %92 = tpu.matmul %88, %91, %cst_38 {dimension_numbers = #tpu.dot_dimension_numbers<[1], [0], [0], [1], [0, 0, 1, 1], [], []>} : vector<17x32xf32>, vector<32x64xf32>, vector<17x64xf32> -> vector<17x64xf32>
    %93 = vector.extract_strided_slice %90 {offsets = [32, 0], sizes = [1, 64], strides = [1, 1]} : vector<33x64xf32> to vector<1x64xf32>
    %94 = vector.broadcast %93 : vector<1x64xf32> to vector<17x64xf32>
    %95 = arith.addf %92, %94 : vector<17x64xf32>
    %cst_39 = arith.constant 5.000000e-01 : f32
    %96 = vector.broadcast %cst_39 : f32 to vector<17x64xf32>
    %97 = arith.mulf %96, %95 : vector<17x64xf32>
    %cst_40 = arith.constant 0.707106769 : f32
    %98 = vector.broadcast %cst_40 : f32 to vector<17x64xf32>
    %99 = arith.mulf %95, %98 : vector<17x64xf32>
    %cst_41 = arith.constant 0.000000e+00 : f32
    %100 = vector.broadcast %cst_41 : f32 to vector<17x64xf32>
    %101 = arith.cmpf oge, %99, %100 : vector<17x64xf32>
    %cst_42 = arith.constant 1.000000e+00 : f32
    %cst_43 = arith.constant -1.000000e+00 : f32
    %102 = vector.broadcast %cst_42 : f32 to vector<17x64xf32>
    %103 = vector.broadcast %cst_43 : f32 to vector<17x64xf32>
    %104 = arith.select %101, %102, %103 : vector<17x64xi1>, vector<17x64xf32>
    %105 = math.absf %99 : vector<17x64xf32>
    %cst_44 = arith.constant 0.327591091 : f32
    %106 = vector.broadcast %cst_44 : f32 to vector<17x64xf32>
    %107 = arith.mulf %106, %105 : vector<17x64xf32>
    %cst_45 = arith.constant 1.000000e+00 : f32
    %108 = vector.broadcast %cst_45 : f32 to vector<17x64xf32>
    %109 = arith.addf %108, %107 : vector<17x64xf32>
    %cst_46 = arith.constant 1.000000e+00 : f32
    %110 = vector.broadcast %cst_46 : f32 to vector<17x64xf32>
    %111 = arith.divf %110, %109 : vector<17x64xf32>
    %cst_47 = arith.constant 1.06140542 : f32
    %112 = vector.broadcast %cst_47 : f32 to vector<17x64xf32>
    %113 = arith.mulf %112, %111 : vector<17x64xf32>
    %cst_48 = arith.constant -1.45315206 : f32
    %114 = vector.broadcast %cst_48 : f32 to vector<17x64xf32>
    %115 = arith.addf %113, %114 : vector<17x64xf32>
    %116 = arith.mulf %115, %111 : vector<17x64xf32>
    %cst_49 = arith.constant 1.42141378 : f32
    %117 = vector.broadcast %cst_49 : f32 to vector<17x64xf32>
    %118 = arith.addf %116, %117 : vector<17x64xf32>
    %119 = arith.mulf %118, %111 : vector<17x64xf32>
    %cst_50 = arith.constant -0.284496725 : f32
    %120 = vector.broadcast %cst_50 : f32 to vector<17x64xf32>
    %121 = arith.addf %119, %120 : vector<17x64xf32>
    %122 = arith.mulf %121, %111 : vector<17x64xf32>
    %cst_51 = arith.constant 0.254829586 : f32
    %123 = vector.broadcast %cst_51 : f32 to vector<17x64xf32>
    %124 = arith.addf %122, %123 : vector<17x64xf32>
    %125 = arith.mulf %124, %111 : vector<17x64xf32>
    %cst_52 = arith.constant 0.000000e+00 : f32
    %126 = vector.broadcast %cst_52 : f32 to vector<17x64xf32>
    %127 = arith.subf %126, %105 : vector<17x64xf32>
    %128 = arith.mulf %127, %105 : vector<17x64xf32>
    %129 = math.exp %128 : vector<17x64xf32>
    %130 = arith.mulf %125, %129 : vector<17x64xf32>
    %cst_53 = arith.constant 1.000000e+00 : f32
    %131 = vector.broadcast %cst_53 : f32 to vector<17x64xf32>
    %132 = arith.subf %131, %130 : vector<17x64xf32>
    %133 = arith.mulf %104, %132 : vector<17x64xf32>
    %cst_54 = arith.constant 1.000000e+00 : f32
    %134 = vector.broadcast %cst_54 : f32 to vector<17x64xf32>
    %135 = arith.addf %134, %133 : vector<17x64xf32>
    %136 = arith.mulf %97, %135 : vector<17x64xf32>
    %c0_55 = arith.constant 0 : index
    %c0_56 = arith.constant 0 : index
    %c0_57 = arith.constant 0 : index
    %137 = vector.load %arg9[%c0_55, %c0_56, %c0_57] : memref<3x65x32xf32, #tpu.memory_space<vmem>>, vector<1x65x32xf32>
    %138 = vector.shape_cast %137 : vector<1x65x32xf32> to vector<65x32xf32>
    %139 = vector.extract_strided_slice %138 {offsets = [0, 0], sizes = [64, 32], strides = [1, 1]} : vector<65x32xf32> to vector<64x32xf32>
    %cst_58 = arith.constant dense<0.000000e+00> : vector<17x32xf32>
    %140 = tpu.matmul %136, %139, %cst_58 {dimension_numbers = #tpu.dot_dimension_numbers<[1], [0], [0], [1], [0, 0, 1, 1], [], []>} : vector<17x64xf32>, vector<64x32xf32>, vector<17x32xf32> -> vector<17x32xf32>
    %141 = vector.extract_strided_slice %138 {offsets = [64, 0], sizes = [1, 32], strides = [1, 1]} : vector<65x32xf32> to vector<1x32xf32>
    %142 = vector.broadcast %141 : vector<1x32xf32> to vector<17x32xf32>
    %143 = arith.addf %140, %142 : vector<17x32xf32>
    %144 = arith.addf %88, %143 : vector<17x32xf32>
    %145 = vector.extract_strided_slice %63 {offsets = [2, 0], sizes = [1, 32], strides = [1, 1]} : vector<4x32xf32> to vector<1x32xf32>
    %146 = vector.extract_strided_slice %63 {offsets = [3, 0], sizes = [1, 32], strides = [1, 1]} : vector<4x32xf32> to vector<1x32xf32>
    %cst_59 = arith.constant dense<0.000000e+00> : vector<17xf32>
    %147 = vector.multi_reduction <add>, %144, %cst_59 [1] : vector<17x32xf32> to vector<17xf32>
    %148 = vector.shape_cast %147 : vector<17xf32> to vector<17x1xf32>
    %cst_60 = arith.constant 3.200000e+01 : f32
    %149 = vector.broadcast %cst_60 : f32 to vector<17x1xf32>
    %150 = arith.divf %148, %149 : vector<17x1xf32>
    %151 = vector.broadcast %150 : vector<17x1xf32> to vector<17x32xf32>
    %152 = arith.subf %144, %151 : vector<17x32xf32>
    %153 = arith.mulf %152, %152 : vector<17x32xf32>
    %cst_61 = arith.constant dense<0.000000e+00> : vector<17xf32>
    %154 = vector.multi_reduction <add>, %153, %cst_61 [1] : vector<17x32xf32> to vector<17xf32>
    %155 = vector.shape_cast %154 : vector<17xf32> to vector<17x1xf32>
    %cst_62 = arith.constant 3.200000e+01 : f32
    %156 = vector.broadcast %cst_62 : f32 to vector<17x1xf32>
    %157 = arith.divf %155, %156 : vector<17x1xf32>
    %158 = vector.broadcast %150 : vector<17x1xf32> to vector<17x32xf32>
    %159 = arith.subf %144, %158 : vector<17x32xf32>
    %cst_63 = arith.constant 9.99999974E-6 : f32
    %160 = vector.broadcast %cst_63 : f32 to vector<17x1xf32>
    %161 = arith.addf %157, %160 : vector<17x1xf32>
    %162 = math.rsqrt %161 : vector<17x1xf32>
    %163 = vector.broadcast %162 : vector<17x1xf32> to vector<17x32xf32>
    %164 = arith.mulf %159, %163 : vector<17x32xf32>
    %165 = vector.broadcast %145 : vector<1x32xf32> to vector<17x32xf32>
    %166 = arith.mulf %164, %165 : vector<17x32xf32>
    %167 = vector.broadcast %146 : vector<1x32xf32> to vector<17x32xf32>
    %168 = arith.addf %166, %167 : vector<17x32xf32>
    %c1 = arith.constant 1 : index
    %c0_64 = arith.constant 0 : index
    %c0_65 = arith.constant 0 : index
    %169 = vector.load %arg4[%c1, %c0_64, %c0_65] : memref<3x33x192xf32, #tpu.memory_space<vmem>>, vector<1x33x192xf32>
    %170 = vector.shape_cast %169 : vector<1x33x192xf32> to vector<33x192xf32>
    %171 = vector.extract_strided_slice %170 {offsets = [0, 0], sizes = [32, 192], strides = [1, 1]} : vector<33x192xf32> to vector<32x192xf32>
    %cst_66 = arith.constant dense<0.000000e+00> : vector<17x192xf32>
    %172 = tpu.matmul %168, %171, %cst_66 {dimension_numbers = #tpu.dot_dimension_numbers<[1], [0], [0], [1], [0, 0, 1, 1], [], []>} : vector<17x32xf32>, vector<32x192xf32>, vector<17x192xf32> -> vector<17x192xf32>
    %173 = vector.extract_strided_slice %170 {offsets = [32, 0], sizes = [1, 192], strides = [1, 1]} : vector<33x192xf32> to vector<1x192xf32>
    %174 = vector.broadcast %173 : vector<1x192xf32> to vector<17x192xf32>
    %175 = arith.addf %172, %174 : vector<17x192xf32>
    %c1_67 = arith.constant 1 : index
    %c0_68 = arith.constant 0 : index
    %c0_69 = arith.constant 0 : index
    %176 = vector.load %arg5[%c1_67, %c0_68, %c0_69] : memref<3x17x34xf32, #tpu.memory_space<vmem>>, vector<1x17x34xf32>
    %177 = vector.shape_cast %176 : vector<1x17x34xf32> to vector<17x34xf32>
    %c1_70 = arith.constant 1 : index
    %c0_71 = arith.constant 0 : index
    %c0_72 = arith.constant 0 : index
    %178 = vector.load %arg6[%c1_70, %c0_71, %c0_72] : memref<3x17x1xf32, #tpu.memory_space<vmem>>, vector<1x17x1xf32>
    %179 = vector.shape_cast %178 : vector<1x17x1xf32> to vector<17x1xf32>
    %180 = vector.extract_strided_slice %175 {offsets = [0, 0], sizes = [17, 32], strides = [1, 1]} : vector<17x192xf32> to vector<17x32xf32>
    %181 = vector.extract_strided_slice %175 {offsets = [0, 64], sizes = [17, 32], strides = [1, 1]} : vector<17x192xf32> to vector<17x32xf32>
    %182 = vector.extract_strided_slice %175 {offsets = [0, 128], sizes = [17, 32], strides = [1, 1]} : vector<17x192xf32> to vector<17x32xf32>
    %cst_73 = arith.constant dense<0.000000e+00> : vector<17x17xf32>
    %183 = tpu.matmul %180, %181, %cst_73 {dimension_numbers = #tpu.dot_dimension_numbers<[1], [1], [0], [0], [0, 0, 1, 0], [], []>} : vector<17x32xf32>, vector<17x32xf32>, vector<17x17xf32> -> vector<17x17xf32>
    %cst_74 = arith.constant 2.500000e-01 : f32
    %184 = vector.broadcast %cst_74 : f32 to vector<17x17xf32>
    %185 = arith.mulf %183, %184 : vector<17x17xf32>
    %cst_75 = arith.constant dense<0xFF800000> : vector<17xf32>
    %186 = vector.multi_reduction <maximumf>, %185, %cst_75 [1] : vector<17x17xf32> to vector<17xf32>
    %187 = vector.shape_cast %186 : vector<17xf32> to vector<17x1xf32>
    %188 = vector.broadcast %187 : vector<17x1xf32> to vector<17x17xf32>
    %189 = arith.subf %185, %188 : vector<17x17xf32>
    %190 = math.exp %189 : vector<17x17xf32>
    %cst_76 = arith.constant dense<0.000000e+00> : vector<17xf32>
    %191 = vector.multi_reduction <add>, %190, %cst_76 [1] : vector<17x17xf32> to vector<17xf32>
    %192 = vector.shape_cast %191 : vector<17xf32> to vector<17x1xf32>
    %193 = tpu.reciprocal %192 {approx = true} : vector<17x1xf32> -> vector<17x1xf32>
    %194 = vector.broadcast %193 : vector<17x1xf32> to vector<17x17xf32>
    %195 = arith.mulf %190, %194 : vector<17x17xf32>
    %cst_77 = arith.constant dense<0.000000e+00> : vector<17x32xf32>
    %196 = tpu.matmul %195, %182, %cst_77 {dimension_numbers = #tpu.dot_dimension_numbers<[1], [0], [0], [1], [0, 0, 1, 1], [], []>} : vector<17x17xf32>, vector<17x32xf32>, vector<17x32xf32> -> vector<17x32xf32>
    %197 = vector.extract_strided_slice %175 {offsets = [0, 32], sizes = [17, 32], strides = [1, 1]} : vector<17x192xf32> to vector<17x32xf32>
    %198 = vector.extract_strided_slice %175 {offsets = [0, 96], sizes = [17, 32], strides = [1, 1]} : vector<17x192xf32> to vector<17x32xf32>
    %199 = vector.extract_strided_slice %175 {offsets = [0, 160], sizes = [17, 32], strides = [1, 1]} : vector<17x192xf32> to vector<17x32xf32>
    %cst_78 = arith.constant dense<0.000000e+00> : vector<17x17xf32>
    %200 = tpu.matmul %197, %198, %cst_78 {dimension_numbers = #tpu.dot_dimension_numbers<[1], [1], [0], [0], [0, 0, 1, 0], [], []>} : vector<17x32xf32>, vector<17x32xf32>, vector<17x17xf32> -> vector<17x17xf32>
    %cst_79 = arith.constant 2.500000e-01 : f32
    %201 = vector.broadcast %cst_79 : f32 to vector<17x17xf32>
    %202 = arith.mulf %200, %201 : vector<17x17xf32>
    %cst_80 = arith.constant dense<0xFF800000> : vector<17xf32>
    %203 = vector.multi_reduction <maximumf>, %202, %cst_80 [1] : vector<17x17xf32> to vector<17xf32>
    %204 = vector.shape_cast %203 : vector<17xf32> to vector<17x1xf32>
    %205 = vector.broadcast %204 : vector<17x1xf32> to vector<17x17xf32>
    %206 = arith.subf %202, %205 : vector<17x17xf32>
    %207 = math.exp %206 : vector<17x17xf32>
    %cst_81 = arith.constant dense<0.000000e+00> : vector<17xf32>
    %208 = vector.multi_reduction <add>, %207, %cst_81 [1] : vector<17x17xf32> to vector<17xf32>
    %209 = vector.shape_cast %208 : vector<17xf32> to vector<17x1xf32>
    %210 = tpu.reciprocal %209 {approx = true} : vector<17x1xf32> -> vector<17x1xf32>
    %211 = vector.broadcast %210 : vector<17x1xf32> to vector<17x17xf32>
    %212 = arith.mulf %207, %211 : vector<17x17xf32>
    %cst_82 = arith.constant dense<0.000000e+00> : vector<17x32xf32>
    %213 = tpu.matmul %212, %199, %cst_82 {dimension_numbers = #tpu.dot_dimension_numbers<[1], [0], [0], [1], [0, 0, 1, 1], [], []>} : vector<17x17xf32>, vector<17x32xf32>, vector<17x32xf32> -> vector<17x32xf32>
    %214 = tpu.concatenate %196, %213 in 0 : vector<17x32xf32>, vector<17x32xf32> -> vector<34x32xf32>
    %cst_83 = arith.constant dense<0.000000e+00> : vector<17x32xf32>
    %215 = tpu.matmul %177, %214, %cst_83 {dimension_numbers = #tpu.dot_dimension_numbers<[1], [0], [0], [1], [0, 0, 1, 1], [], []>} : vector<17x34xf32>, vector<34x32xf32>, vector<17x32xf32> -> vector<17x32xf32>
    %216 = vector.broadcast %179 : vector<17x1xf32> to vector<17x32xf32>
    %217 = arith.addf %215, %216 : vector<17x32xf32>
    %c1_84 = arith.constant 1 : index
    %c0_85 = arith.constant 0 : index
    %c0_86 = arith.constant 0 : index
    %218 = vector.load %arg7[%c1_84, %c0_85, %c0_86] : memref<3x4x32xf32, #tpu.memory_space<vmem>>, vector<1x4x32xf32>
    %219 = vector.shape_cast %218 : vector<1x4x32xf32> to vector<4x32xf32>
    %220 = arith.addf %168, %217 : vector<17x32xf32>
    %221 = vector.extract_strided_slice %219 {offsets = [0, 0], sizes = [1, 32], strides = [1, 1]} : vector<4x32xf32> to vector<1x32xf32>
    %222 = vector.extract_strided_slice %219 {offsets = [1, 0], sizes = [1, 32], strides = [1, 1]} : vector<4x32xf32> to vector<1x32xf32>
    %cst_87 = arith.constant dense<0.000000e+00> : vector<17xf32>
    %223 = vector.multi_reduction <add>, %220, %cst_87 [1] : vector<17x32xf32> to vector<17xf32>
    %224 = vector.shape_cast %223 : vector<17xf32> to vector<17x1xf32>
    %cst_88 = arith.constant 3.200000e+01 : f32
    %225 = vector.broadcast %cst_88 : f32 to vector<17x1xf32>
    %226 = arith.divf %224, %225 : vector<17x1xf32>
    %227 = vector.broadcast %226 : vector<17x1xf32> to vector<17x32xf32>
    %228 = arith.subf %220, %227 : vector<17x32xf32>
    %229 = arith.mulf %228, %228 : vector<17x32xf32>
    %cst_89 = arith.constant dense<0.000000e+00> : vector<17xf32>
    %230 = vector.multi_reduction <add>, %229, %cst_89 [1] : vector<17x32xf32> to vector<17xf32>
    %231 = vector.shape_cast %230 : vector<17xf32> to vector<17x1xf32>
    %cst_90 = arith.constant 3.200000e+01 : f32
    %232 = vector.broadcast %cst_90 : f32 to vector<17x1xf32>
    %233 = arith.divf %231, %232 : vector<17x1xf32>
    %234 = vector.broadcast %226 : vector<17x1xf32> to vector<17x32xf32>
    %235 = arith.subf %220, %234 : vector<17x32xf32>
    %cst_91 = arith.constant 9.99999974E-6 : f32
    %236 = vector.broadcast %cst_91 : f32 to vector<17x1xf32>
    %237 = arith.addf %233, %236 : vector<17x1xf32>
    %238 = math.rsqrt %237 : vector<17x1xf32>
    %239 = vector.broadcast %238 : vector<17x1xf32> to vector<17x32xf32>
    %240 = arith.mulf %235, %239 : vector<17x32xf32>
    %241 = vector.broadcast %221 : vector<1x32xf32> to vector<17x32xf32>
    %242 = arith.mulf %240, %241 : vector<17x32xf32>
    %243 = vector.broadcast %222 : vector<1x32xf32> to vector<17x32xf32>
    %244 = arith.addf %242, %243 : vector<17x32xf32>
    %c1_92 = arith.constant 1 : index
    %c0_93 = arith.constant 0 : index
    %c0_94 = arith.constant 0 : index
    %245 = vector.load %arg8[%c1_92, %c0_93, %c0_94] : memref<3x33x64xf32, #tpu.memory_space<vmem>>, vector<1x33x64xf32>
    %246 = vector.shape_cast %245 : vector<1x33x64xf32> to vector<33x64xf32>
    %247 = vector.extract_strided_slice %246 {offsets = [0, 0], sizes = [32, 64], strides = [1, 1]} : vector<33x64xf32> to vector<32x64xf32>
    %cst_95 = arith.constant dense<0.000000e+00> : vector<17x64xf32>
    %248 = tpu.matmul %244, %247, %cst_95 {dimension_numbers = #tpu.dot_dimension_numbers<[1], [0], [0], [1], [0, 0, 1, 1], [], []>} : vector<17x32xf32>, vector<32x64xf32>, vector<17x64xf32> -> vector<17x64xf32>
    %249 = vector.extract_strided_slice %246 {offsets = [32, 0], sizes = [1, 64], strides = [1, 1]} : vector<33x64xf32> to vector<1x64xf32>
    %250 = vector.broadcast %249 : vector<1x64xf32> to vector<17x64xf32>
    %251 = arith.addf %248, %250 : vector<17x64xf32>
    %cst_96 = arith.constant 5.000000e-01 : f32
    %252 = vector.broadcast %cst_96 : f32 to vector<17x64xf32>
    %253 = arith.mulf %252, %251 : vector<17x64xf32>
    %cst_97 = arith.constant 0.707106769 : f32
    %254 = vector.broadcast %cst_97 : f32 to vector<17x64xf32>
    %255 = arith.mulf %251, %254 : vector<17x64xf32>
    %cst_98 = arith.constant 0.000000e+00 : f32
    %256 = vector.broadcast %cst_98 : f32 to vector<17x64xf32>
    %257 = arith.cmpf oge, %255, %256 : vector<17x64xf32>
    %cst_99 = arith.constant 1.000000e+00 : f32
    %cst_100 = arith.constant -1.000000e+00 : f32
    %258 = vector.broadcast %cst_99 : f32 to vector<17x64xf32>
    %259 = vector.broadcast %cst_100 : f32 to vector<17x64xf32>
    %260 = arith.select %257, %258, %259 : vector<17x64xi1>, vector<17x64xf32>
    %261 = math.absf %255 : vector<17x64xf32>
    %cst_101 = arith.constant 0.327591091 : f32
    %262 = vector.broadcast %cst_101 : f32 to vector<17x64xf32>
    %263 = arith.mulf %262, %261 : vector<17x64xf32>
    %cst_102 = arith.constant 1.000000e+00 : f32
    %264 = vector.broadcast %cst_102 : f32 to vector<17x64xf32>
    %265 = arith.addf %264, %263 : vector<17x64xf32>
    %cst_103 = arith.constant 1.000000e+00 : f32
    %266 = vector.broadcast %cst_103 : f32 to vector<17x64xf32>
    %267 = arith.divf %266, %265 : vector<17x64xf32>
    %cst_104 = arith.constant 1.06140542 : f32
    %268 = vector.broadcast %cst_104 : f32 to vector<17x64xf32>
    %269 = arith.mulf %268, %267 : vector<17x64xf32>
    %cst_105 = arith.constant -1.45315206 : f32
    %270 = vector.broadcast %cst_105 : f32 to vector<17x64xf32>
    %271 = arith.addf %269, %270 : vector<17x64xf32>
    %272 = arith.mulf %271, %267 : vector<17x64xf32>
    %cst_106 = arith.constant 1.42141378 : f32
    %273 = vector.broadcast %cst_106 : f32 to vector<17x64xf32>
    %274 = arith.addf %272, %273 : vector<17x64xf32>
    %275 = arith.mulf %274, %267 : vector<17x64xf32>
    %cst_107 = arith.constant -0.284496725 : f32
    %276 = vector.broadcast %cst_107 : f32 to vector<17x64xf32>
    %277 = arith.addf %275, %276 : vector<17x64xf32>
    %278 = arith.mulf %277, %267 : vector<17x64xf32>
    %cst_108 = arith.constant 0.254829586 : f32
    %279 = vector.broadcast %cst_108 : f32 to vector<17x64xf32>
    %280 = arith.addf %278, %279 : vector<17x64xf32>
    %281 = arith.mulf %280, %267 : vector<17x64xf32>
    %cst_109 = arith.constant 0.000000e+00 : f32
    %282 = vector.broadcast %cst_109 : f32 to vector<17x64xf32>
    %283 = arith.subf %282, %261 : vector<17x64xf32>
    %284 = arith.mulf %283, %261 : vector<17x64xf32>
    %285 = math.exp %284 : vector<17x64xf32>
    %286 = arith.mulf %281, %285 : vector<17x64xf32>
    %cst_110 = arith.constant 1.000000e+00 : f32
    %287 = vector.broadcast %cst_110 : f32 to vector<17x64xf32>
    %288 = arith.subf %287, %286 : vector<17x64xf32>
    %289 = arith.mulf %260, %288 : vector<17x64xf32>
    %cst_111 = arith.constant 1.000000e+00 : f32
    %290 = vector.broadcast %cst_111 : f32 to vector<17x64xf32>
    %291 = arith.addf %290, %289 : vector<17x64xf32>
    %292 = arith.mulf %253, %291 : vector<17x64xf32>
    %c1_112 = arith.constant 1 : index
    %c0_113 = arith.constant 0 : index
    %c0_114 = arith.constant 0 : index
    %293 = vector.load %arg9[%c1_112, %c0_113, %c0_114] : memref<3x65x32xf32, #tpu.memory_space<vmem>>, vector<1x65x32xf32>
    %294 = vector.shape_cast %293 : vector<1x65x32xf32> to vector<65x32xf32>
    %295 = vector.extract_strided_slice %294 {offsets = [0, 0], sizes = [64, 32], strides = [1, 1]} : vector<65x32xf32> to vector<64x32xf32>
    %cst_115 = arith.constant dense<0.000000e+00> : vector<17x32xf32>
    %296 = tpu.matmul %292, %295, %cst_115 {dimension_numbers = #tpu.dot_dimension_numbers<[1], [0], [0], [1], [0, 0, 1, 1], [], []>} : vector<17x64xf32>, vector<64x32xf32>, vector<17x32xf32> -> vector<17x32xf32>
    %297 = vector.extract_strided_slice %294 {offsets = [64, 0], sizes = [1, 32], strides = [1, 1]} : vector<65x32xf32> to vector<1x32xf32>
    %298 = vector.broadcast %297 : vector<1x32xf32> to vector<17x32xf32>
    %299 = arith.addf %296, %298 : vector<17x32xf32>
    %300 = arith.addf %244, %299 : vector<17x32xf32>
    %301 = vector.extract_strided_slice %219 {offsets = [2, 0], sizes = [1, 32], strides = [1, 1]} : vector<4x32xf32> to vector<1x32xf32>
    %302 = vector.extract_strided_slice %219 {offsets = [3, 0], sizes = [1, 32], strides = [1, 1]} : vector<4x32xf32> to vector<1x32xf32>
    %cst_116 = arith.constant dense<0.000000e+00> : vector<17xf32>
    %303 = vector.multi_reduction <add>, %300, %cst_116 [1] : vector<17x32xf32> to vector<17xf32>
    %304 = vector.shape_cast %303 : vector<17xf32> to vector<17x1xf32>
    %cst_117 = arith.constant 3.200000e+01 : f32
    %305 = vector.broadcast %cst_117 : f32 to vector<17x1xf32>
    %306 = arith.divf %304, %305 : vector<17x1xf32>
    %307 = vector.broadcast %306 : vector<17x1xf32> to vector<17x32xf32>
    %308 = arith.subf %300, %307 : vector<17x32xf32>
    %309 = arith.mulf %308, %308 : vector<17x32xf32>
    %cst_118 = arith.constant dense<0.000000e+00> : vector<17xf32>
    %310 = vector.multi_reduction <add>, %309, %cst_118 [1] : vector<17x32xf32> to vector<17xf32>
    %311 = vector.shape_cast %310 : vector<17xf32> to vector<17x1xf32>
    %cst_119 = arith.constant 3.200000e+01 : f32
    %312 = vector.broadcast %cst_119 : f32 to vector<17x1xf32>
    %313 = arith.divf %311, %312 : vector<17x1xf32>
    %314 = vector.broadcast %306 : vector<17x1xf32> to vector<17x32xf32>
    %315 = arith.subf %300, %314 : vector<17x32xf32>
    %cst_120 = arith.constant 9.99999974E-6 : f32
    %316 = vector.broadcast %cst_120 : f32 to vector<17x1xf32>
    %317 = arith.addf %313, %316 : vector<17x1xf32>
    %318 = math.rsqrt %317 : vector<17x1xf32>
    %319 = vector.broadcast %318 : vector<17x1xf32> to vector<17x32xf32>
    %320 = arith.mulf %315, %319 : vector<17x32xf32>
    %321 = vector.broadcast %301 : vector<1x32xf32> to vector<17x32xf32>
    %322 = arith.mulf %320, %321 : vector<17x32xf32>
    %323 = vector.broadcast %302 : vector<1x32xf32> to vector<17x32xf32>
    %324 = arith.addf %322, %323 : vector<17x32xf32>
    %c2 = arith.constant 2 : index
    %c0_121 = arith.constant 0 : index
    %c0_122 = arith.constant 0 : index
    %325 = vector.load %arg4[%c2, %c0_121, %c0_122] : memref<3x33x192xf32, #tpu.memory_space<vmem>>, vector<1x33x192xf32>
    %326 = vector.shape_cast %325 : vector<1x33x192xf32> to vector<33x192xf32>
    %327 = vector.extract_strided_slice %326 {offsets = [0, 0], sizes = [32, 192], strides = [1, 1]} : vector<33x192xf32> to vector<32x192xf32>
    %cst_123 = arith.constant dense<0.000000e+00> : vector<17x192xf32>
    %328 = tpu.matmul %324, %327, %cst_123 {dimension_numbers = #tpu.dot_dimension_numbers<[1], [0], [0], [1], [0, 0, 1, 1], [], []>} : vector<17x32xf32>, vector<32x192xf32>, vector<17x192xf32> -> vector<17x192xf32>
    %329 = vector.extract_strided_slice %326 {offsets = [32, 0], sizes = [1, 192], strides = [1, 1]} : vector<33x192xf32> to vector<1x192xf32>
    %330 = vector.broadcast %329 : vector<1x192xf32> to vector<17x192xf32>
    %331 = arith.addf %328, %330 : vector<17x192xf32>
    %c2_124 = arith.constant 2 : index
    %c0_125 = arith.constant 0 : index
    %c0_126 = arith.constant 0 : index
    %332 = vector.load %arg5[%c2_124, %c0_125, %c0_126] : memref<3x17x34xf32, #tpu.memory_space<vmem>>, vector<1x17x34xf32>
    %333 = vector.shape_cast %332 : vector<1x17x34xf32> to vector<17x34xf32>
    %c2_127 = arith.constant 2 : index
    %c0_128 = arith.constant 0 : index
    %c0_129 = arith.constant 0 : index
    %334 = vector.load %arg6[%c2_127, %c0_128, %c0_129] : memref<3x17x1xf32, #tpu.memory_space<vmem>>, vector<1x17x1xf32>
    %335 = vector.shape_cast %334 : vector<1x17x1xf32> to vector<17x1xf32>
    %336 = vector.extract_strided_slice %331 {offsets = [0, 0], sizes = [17, 32], strides = [1, 1]} : vector<17x192xf32> to vector<17x32xf32>
    %337 = vector.extract_strided_slice %331 {offsets = [0, 64], sizes = [17, 32], strides = [1, 1]} : vector<17x192xf32> to vector<17x32xf32>
    %338 = vector.extract_strided_slice %331 {offsets = [0, 128], sizes = [17, 32], strides = [1, 1]} : vector<17x192xf32> to vector<17x32xf32>
    %cst_130 = arith.constant dense<0.000000e+00> : vector<17x17xf32>
    %339 = tpu.matmul %336, %337, %cst_130 {dimension_numbers = #tpu.dot_dimension_numbers<[1], [1], [0], [0], [0, 0, 1, 0], [], []>} : vector<17x32xf32>, vector<17x32xf32>, vector<17x17xf32> -> vector<17x17xf32>
    %cst_131 = arith.constant 2.500000e-01 : f32
    %340 = vector.broadcast %cst_131 : f32 to vector<17x17xf32>
    %341 = arith.mulf %339, %340 : vector<17x17xf32>
    %cst_132 = arith.constant dense<0xFF800000> : vector<17xf32>
    %342 = vector.multi_reduction <maximumf>, %341, %cst_132 [1] : vector<17x17xf32> to vector<17xf32>
    %343 = vector.shape_cast %342 : vector<17xf32> to vector<17x1xf32>
    %344 = vector.broadcast %343 : vector<17x1xf32> to vector<17x17xf32>
    %345 = arith.subf %341, %344 : vector<17x17xf32>
    %346 = math.exp %345 : vector<17x17xf32>
    %cst_133 = arith.constant dense<0.000000e+00> : vector<17xf32>
    %347 = vector.multi_reduction <add>, %346, %cst_133 [1] : vector<17x17xf32> to vector<17xf32>
    %348 = vector.shape_cast %347 : vector<17xf32> to vector<17x1xf32>
    %349 = tpu.reciprocal %348 {approx = true} : vector<17x1xf32> -> vector<17x1xf32>
    %350 = vector.broadcast %349 : vector<17x1xf32> to vector<17x17xf32>
    %351 = arith.mulf %346, %350 : vector<17x17xf32>
    %cst_134 = arith.constant dense<0.000000e+00> : vector<17x32xf32>
    %352 = tpu.matmul %351, %338, %cst_134 {dimension_numbers = #tpu.dot_dimension_numbers<[1], [0], [0], [1], [0, 0, 1, 1], [], []>} : vector<17x17xf32>, vector<17x32xf32>, vector<17x32xf32> -> vector<17x32xf32>
    %353 = vector.extract_strided_slice %331 {offsets = [0, 32], sizes = [17, 32], strides = [1, 1]} : vector<17x192xf32> to vector<17x32xf32>
    %354 = vector.extract_strided_slice %331 {offsets = [0, 96], sizes = [17, 32], strides = [1, 1]} : vector<17x192xf32> to vector<17x32xf32>
    %355 = vector.extract_strided_slice %331 {offsets = [0, 160], sizes = [17, 32], strides = [1, 1]} : vector<17x192xf32> to vector<17x32xf32>
    %cst_135 = arith.constant dense<0.000000e+00> : vector<17x17xf32>
    %356 = tpu.matmul %353, %354, %cst_135 {dimension_numbers = #tpu.dot_dimension_numbers<[1], [1], [0], [0], [0, 0, 1, 0], [], []>} : vector<17x32xf32>, vector<17x32xf32>, vector<17x17xf32> -> vector<17x17xf32>
    %cst_136 = arith.constant 2.500000e-01 : f32
    %357 = vector.broadcast %cst_136 : f32 to vector<17x17xf32>
    %358 = arith.mulf %356, %357 : vector<17x17xf32>
    %cst_137 = arith.constant dense<0xFF800000> : vector<17xf32>
    %359 = vector.multi_reduction <maximumf>, %358, %cst_137 [1] : vector<17x17xf32> to vector<17xf32>
    %360 = vector.shape_cast %359 : vector<17xf32> to vector<17x1xf32>
    %361 = vector.broadcast %360 : vector<17x1xf32> to vector<17x17xf32>
    %362 = arith.subf %358, %361 : vector<17x17xf32>
    %363 = math.exp %362 : vector<17x17xf32>
    %cst_138 = arith.constant dense<0.000000e+00> : vector<17xf32>
    %364 = vector.multi_reduction <add>, %363, %cst_138 [1] : vector<17x17xf32> to vector<17xf32>
    %365 = vector.shape_cast %364 : vector<17xf32> to vector<17x1xf32>
    %366 = tpu.reciprocal %365 {approx = true} : vector<17x1xf32> -> vector<17x1xf32>
    %367 = vector.broadcast %366 : vector<17x1xf32> to vector<17x17xf32>
    %368 = arith.mulf %363, %367 : vector<17x17xf32>
    %cst_139 = arith.constant dense<0.000000e+00> : vector<17x32xf32>
    %369 = tpu.matmul %368, %355, %cst_139 {dimension_numbers = #tpu.dot_dimension_numbers<[1], [0], [0], [1], [0, 0, 1, 1], [], []>} : vector<17x17xf32>, vector<17x32xf32>, vector<17x32xf32> -> vector<17x32xf32>
    %370 = tpu.concatenate %352, %369 in 0 : vector<17x32xf32>, vector<17x32xf32> -> vector<34x32xf32>
    %cst_140 = arith.constant dense<0.000000e+00> : vector<17x32xf32>
    %371 = tpu.matmul %333, %370, %cst_140 {dimension_numbers = #tpu.dot_dimension_numbers<[1], [0], [0], [1], [0, 0, 1, 1], [], []>} : vector<17x34xf32>, vector<34x32xf32>, vector<17x32xf32> -> vector<17x32xf32>
    %372 = vector.broadcast %335 : vector<17x1xf32> to vector<17x32xf32>
    %373 = arith.addf %371, %372 : vector<17x32xf32>
    %c2_141 = arith.constant 2 : index
    %c0_142 = arith.constant 0 : index
    %c0_143 = arith.constant 0 : index
    %374 = vector.load %arg7[%c2_141, %c0_142, %c0_143] : memref<3x4x32xf32, #tpu.memory_space<vmem>>, vector<1x4x32xf32>
    %375 = vector.shape_cast %374 : vector<1x4x32xf32> to vector<4x32xf32>
    %376 = arith.addf %324, %373 : vector<17x32xf32>
    %377 = vector.extract_strided_slice %375 {offsets = [0, 0], sizes = [1, 32], strides = [1, 1]} : vector<4x32xf32> to vector<1x32xf32>
    %378 = vector.extract_strided_slice %375 {offsets = [1, 0], sizes = [1, 32], strides = [1, 1]} : vector<4x32xf32> to vector<1x32xf32>
    %cst_144 = arith.constant dense<0.000000e+00> : vector<17xf32>
    %379 = vector.multi_reduction <add>, %376, %cst_144 [1] : vector<17x32xf32> to vector<17xf32>
    %380 = vector.shape_cast %379 : vector<17xf32> to vector<17x1xf32>
    %cst_145 = arith.constant 3.200000e+01 : f32
    %381 = vector.broadcast %cst_145 : f32 to vector<17x1xf32>
    %382 = arith.divf %380, %381 : vector<17x1xf32>
    %383 = vector.broadcast %382 : vector<17x1xf32> to vector<17x32xf32>
    %384 = arith.subf %376, %383 : vector<17x32xf32>
    %385 = arith.mulf %384, %384 : vector<17x32xf32>
    %cst_146 = arith.constant dense<0.000000e+00> : vector<17xf32>
    %386 = vector.multi_reduction <add>, %385, %cst_146 [1] : vector<17x32xf32> to vector<17xf32>
    %387 = vector.shape_cast %386 : vector<17xf32> to vector<17x1xf32>
    %cst_147 = arith.constant 3.200000e+01 : f32
    %388 = vector.broadcast %cst_147 : f32 to vector<17x1xf32>
    %389 = arith.divf %387, %388 : vector<17x1xf32>
    %390 = vector.broadcast %382 : vector<17x1xf32> to vector<17x32xf32>
    %391 = arith.subf %376, %390 : vector<17x32xf32>
    %cst_148 = arith.constant 9.99999974E-6 : f32
    %392 = vector.broadcast %cst_148 : f32 to vector<17x1xf32>
    %393 = arith.addf %389, %392 : vector<17x1xf32>
    %394 = math.rsqrt %393 : vector<17x1xf32>
    %395 = vector.broadcast %394 : vector<17x1xf32> to vector<17x32xf32>
    %396 = arith.mulf %391, %395 : vector<17x32xf32>
    %397 = vector.broadcast %377 : vector<1x32xf32> to vector<17x32xf32>
    %398 = arith.mulf %396, %397 : vector<17x32xf32>
    %399 = vector.broadcast %378 : vector<1x32xf32> to vector<17x32xf32>
    %400 = arith.addf %398, %399 : vector<17x32xf32>
    %c2_149 = arith.constant 2 : index
    %c0_150 = arith.constant 0 : index
    %c0_151 = arith.constant 0 : index
    %401 = vector.load %arg8[%c2_149, %c0_150, %c0_151] : memref<3x33x64xf32, #tpu.memory_space<vmem>>, vector<1x33x64xf32>
    %402 = vector.shape_cast %401 : vector<1x33x64xf32> to vector<33x64xf32>
    %403 = vector.extract_strided_slice %402 {offsets = [0, 0], sizes = [32, 64], strides = [1, 1]} : vector<33x64xf32> to vector<32x64xf32>
    %cst_152 = arith.constant dense<0.000000e+00> : vector<17x64xf32>
    %404 = tpu.matmul %400, %403, %cst_152 {dimension_numbers = #tpu.dot_dimension_numbers<[1], [0], [0], [1], [0, 0, 1, 1], [], []>} : vector<17x32xf32>, vector<32x64xf32>, vector<17x64xf32> -> vector<17x64xf32>
    %405 = vector.extract_strided_slice %402 {offsets = [32, 0], sizes = [1, 64], strides = [1, 1]} : vector<33x64xf32> to vector<1x64xf32>
    %406 = vector.broadcast %405 : vector<1x64xf32> to vector<17x64xf32>
    %407 = arith.addf %404, %406 : vector<17x64xf32>
    %cst_153 = arith.constant 5.000000e-01 : f32
    %408 = vector.broadcast %cst_153 : f32 to vector<17x64xf32>
    %409 = arith.mulf %408, %407 : vector<17x64xf32>
    %cst_154 = arith.constant 0.707106769 : f32
    %410 = vector.broadcast %cst_154 : f32 to vector<17x64xf32>
    %411 = arith.mulf %407, %410 : vector<17x64xf32>
    %cst_155 = arith.constant 0.000000e+00 : f32
    %412 = vector.broadcast %cst_155 : f32 to vector<17x64xf32>
    %413 = arith.cmpf oge, %411, %412 : vector<17x64xf32>
    %cst_156 = arith.constant 1.000000e+00 : f32
    %cst_157 = arith.constant -1.000000e+00 : f32
    %414 = vector.broadcast %cst_156 : f32 to vector<17x64xf32>
    %415 = vector.broadcast %cst_157 : f32 to vector<17x64xf32>
    %416 = arith.select %413, %414, %415 : vector<17x64xi1>, vector<17x64xf32>
    %417 = math.absf %411 : vector<17x64xf32>
    %cst_158 = arith.constant 0.327591091 : f32
    %418 = vector.broadcast %cst_158 : f32 to vector<17x64xf32>
    %419 = arith.mulf %418, %417 : vector<17x64xf32>
    %cst_159 = arith.constant 1.000000e+00 : f32
    %420 = vector.broadcast %cst_159 : f32 to vector<17x64xf32>
    %421 = arith.addf %420, %419 : vector<17x64xf32>
    %cst_160 = arith.constant 1.000000e+00 : f32
    %422 = vector.broadcast %cst_160 : f32 to vector<17x64xf32>
    %423 = arith.divf %422, %421 : vector<17x64xf32>
    %cst_161 = arith.constant 1.06140542 : f32
    %424 = vector.broadcast %cst_161 : f32 to vector<17x64xf32>
    %425 = arith.mulf %424, %423 : vector<17x64xf32>
    %cst_162 = arith.constant -1.45315206 : f32
    %426 = vector.broadcast %cst_162 : f32 to vector<17x64xf32>
    %427 = arith.addf %425, %426 : vector<17x64xf32>
    %428 = arith.mulf %427, %423 : vector<17x64xf32>
    %cst_163 = arith.constant 1.42141378 : f32
    %429 = vector.broadcast %cst_163 : f32 to vector<17x64xf32>
    %430 = arith.addf %428, %429 : vector<17x64xf32>
    %431 = arith.mulf %430, %423 : vector<17x64xf32>
    %cst_164 = arith.constant -0.284496725 : f32
    %432 = vector.broadcast %cst_164 : f32 to vector<17x64xf32>
    %433 = arith.addf %431, %432 : vector<17x64xf32>
    %434 = arith.mulf %433, %423 : vector<17x64xf32>
    %cst_165 = arith.constant 0.254829586 : f32
    %435 = vector.broadcast %cst_165 : f32 to vector<17x64xf32>
    %436 = arith.addf %434, %435 : vector<17x64xf32>
    %437 = arith.mulf %436, %423 : vector<17x64xf32>
    %cst_166 = arith.constant 0.000000e+00 : f32
    %438 = vector.broadcast %cst_166 : f32 to vector<17x64xf32>
    %439 = arith.subf %438, %417 : vector<17x64xf32>
    %440 = arith.mulf %439, %417 : vector<17x64xf32>
    %441 = math.exp %440 : vector<17x64xf32>
    %442 = arith.mulf %437, %441 : vector<17x64xf32>
    %cst_167 = arith.constant 1.000000e+00 : f32
    %443 = vector.broadcast %cst_167 : f32 to vector<17x64xf32>
    %444 = arith.subf %443, %442 : vector<17x64xf32>
    %445 = arith.mulf %416, %444 : vector<17x64xf32>
    %cst_168 = arith.constant 1.000000e+00 : f32
    %446 = vector.broadcast %cst_168 : f32 to vector<17x64xf32>
    %447 = arith.addf %446, %445 : vector<17x64xf32>
    %448 = arith.mulf %409, %447 : vector<17x64xf32>
    %c2_169 = arith.constant 2 : index
    %c0_170 = arith.constant 0 : index
    %c0_171 = arith.constant 0 : index
    %449 = vector.load %arg9[%c2_169, %c0_170, %c0_171] : memref<3x65x32xf32, #tpu.memory_space<vmem>>, vector<1x65x32xf32>
    %450 = vector.shape_cast %449 : vector<1x65x32xf32> to vector<65x32xf32>
    %451 = vector.extract_strided_slice %450 {offsets = [0, 0], sizes = [64, 32], strides = [1, 1]} : vector<65x32xf32> to vector<64x32xf32>
    %cst_172 = arith.constant dense<0.000000e+00> : vector<17x32xf32>
    %452 = tpu.matmul %448, %451, %cst_172 {dimension_numbers = #tpu.dot_dimension_numbers<[1], [0], [0], [1], [0, 0, 1, 1], [], []>} : vector<17x64xf32>, vector<64x32xf32>, vector<17x32xf32> -> vector<17x32xf32>
    %453 = vector.extract_strided_slice %450 {offsets = [64, 0], sizes = [1, 32], strides = [1, 1]} : vector<65x32xf32> to vector<1x32xf32>
    %454 = vector.broadcast %453 : vector<1x32xf32> to vector<17x32xf32>
    %455 = arith.addf %452, %454 : vector<17x32xf32>
    %456 = arith.addf %400, %455 : vector<17x32xf32>
    %457 = vector.extract_strided_slice %375 {offsets = [2, 0], sizes = [1, 32], strides = [1, 1]} : vector<4x32xf32> to vector<1x32xf32>
    %458 = vector.extract_strided_slice %375 {offsets = [3, 0], sizes = [1, 32], strides = [1, 1]} : vector<4x32xf32> to vector<1x32xf32>
    %cst_173 = arith.constant dense<0.000000e+00> : vector<17xf32>
    %459 = vector.multi_reduction <add>, %456, %cst_173 [1] : vector<17x32xf32> to vector<17xf32>
    %460 = vector.shape_cast %459 : vector<17xf32> to vector<17x1xf32>
    %cst_174 = arith.constant 3.200000e+01 : f32
    %461 = vector.broadcast %cst_174 : f32 to vector<17x1xf32>
    %462 = arith.divf %460, %461 : vector<17x1xf32>
    %463 = vector.broadcast %462 : vector<17x1xf32> to vector<17x32xf32>
    %464 = arith.subf %456, %463 : vector<17x32xf32>
    %465 = arith.mulf %464, %464 : vector<17x32xf32>
    %cst_175 = arith.constant dense<0.000000e+00> : vector<17xf32>
    %466 = vector.multi_reduction <add>, %465, %cst_175 [1] : vector<17x32xf32> to vector<17xf32>
    %467 = vector.shape_cast %466 : vector<17xf32> to vector<17x1xf32>
    %cst_176 = arith.constant 3.200000e+01 : f32
    %468 = vector.broadcast %cst_176 : f32 to vector<17x1xf32>
    %469 = arith.divf %467, %468 : vector<17x1xf32>
    %470 = vector.broadcast %462 : vector<17x1xf32> to vector<17x32xf32>
    %471 = arith.subf %456, %470 : vector<17x32xf32>
    %cst_177 = arith.constant 9.99999974E-6 : f32
    %472 = vector.broadcast %cst_177 : f32 to vector<17x1xf32>
    %473 = arith.addf %469, %472 : vector<17x1xf32>
    %474 = math.rsqrt %473 : vector<17x1xf32>
    %475 = vector.broadcast %474 : vector<17x1xf32> to vector<17x32xf32>
    %476 = arith.mulf %471, %475 : vector<17x32xf32>
    %477 = vector.broadcast %457 : vector<1x32xf32> to vector<17x32xf32>
    %478 = arith.mulf %476, %477 : vector<17x32xf32>
    %479 = vector.broadcast %458 : vector<1x32xf32> to vector<17x32xf32>
    %480 = arith.addf %478, %479 : vector<17x32xf32>
    %481 = vector.shape_cast %480 : vector<17x32xf32> to vector<1x1x17x32xf32>
    %c0_178 = arith.constant 0 : index
    %c0_179 = arith.constant 0 : index
    %c0_180 = arith.constant 0 : index
    %c0_181 = arith.constant 0 : index
    %482 = vector.load %arg10[%c0_178, %c0_179, %c0_180, %c0_181] : memref<1x1x17x32xf32, #tpu.memory_space<vmem>>, vector<1x1x17x32xf32>
    tpu.vector_store %arg10[%c0_178, %c0_179, %c0_180, %c0_181], %481 {strides = array<i32>} : memref<1x1x17x32xf32, #tpu.memory_space<vmem>>, vector<1x1x17x32xf32>,
    return
  }
  func.func @transform_0(%arg0: i32) -> (i32, i32, i32) {
    %c0_i32 = arith.constant 0 : i32
    %c0_i32_0 = arith.constant 0 : i32
    %c0_i32_1 = arith.constant 0 : i32
    return %arg0, %c0_i32, %c0_i32_0 : i32, i32, i32
  }
  func.func @transform_1(%arg0: i32) -> (i32, i32) {
    %c0_i32 = arith.constant 0 : i32
    %c0_i32_0 = arith.constant 0 : i32
    %c0_i32_1 = arith.constant 0 : i32
    return %c0_i32, %c0_i32_0 : i32, i32
  }
  func.func @transform_2(%arg0: i32) -> (i32, i32) {
    %c0_i32 = arith.constant 0 : i32
    %c0_i32_0 = arith.constant 0 : i32
    %c0_i32_1 = arith.constant 0 : i32
    return %c0_i32, %c0_i32_0 : i32, i32
  }
  func.func @transform_3(%arg0: i32) -> (i32, i32, i32) {
    %c0_i32 = arith.constant 0 : i32
    %c0_i32_0 = arith.constant 0 : i32
    %c0_i32_1 = arith.constant 0 : i32
    %c0_i32_2 = arith.constant 0 : i32
    return %c0_i32, %c0_i32_0, %c0_i32_1 : i32, i32, i32
  }
  func.func @transform_4(%arg0: i32) -> (i32, i32, i32) {
    %c0_i32 = arith.constant 0 : i32
    %c0_i32_0 = arith.constant 0 : i32
    %c0_i32_1 = arith.constant 0 : i32
    %c0_i32_2 = arith.constant 0 : i32
    return %c0_i32, %c0_i32_0, %c0_i32_1 : i32, i32, i32
  }
  func.func @transform_5(%arg0: i32) -> (i32, i32, i32) {
    %c0_i32 = arith.constant 0 : i32
    %c0_i32_0 = arith.constant 0 : i32
    %c0_i32_1 = arith.constant 0 : i32
    %c0_i32_2 = arith.constant 0 : i32
    return %c0_i32, %c0_i32_0, %c0_i32_1 : i32, i32, i32
  }
  func.func @transform_6(%arg0: i32) -> (i32, i32, i32) {
    %c0_i32 = arith.constant 0 : i32
    %c0_i32_0 = arith.constant 0 : i32
    %c0_i32_1 = arith.constant 0 : i32
    %c0_i32_2 = arith.constant 0 : i32
    return %c0_i32, %c0_i32_0, %c0_i32_1 : i32, i32, i32
  }
  func.func @transform_7(%arg0: i32) -> (i32, i32, i32) {
    %c0_i32 = arith.constant 0 : i32
    %c0_i32_0 = arith.constant 0 : i32
    %c0_i32_1 = arith.constant 0 : i32
    %c0_i32_2 = arith.constant 0 : i32
    return %c0_i32, %c0_i32_0, %c0_i32_1 : i32, i32, i32
  }
  func.func @transform_8(%arg0: i32) -> (i32, i32, i32) {
    %c0_i32 = arith.constant 0 : i32
    %c0_i32_0 = arith.constant 0 : i32
    %c0_i32_1 = arith.constant 0 : i32
    %c0_i32_2 = arith.constant 0 : i32
    return %c0_i32, %c0_i32_0, %c0_i32_1 : i32, i32, i32
  }
  func.func @transform_9(%arg0: i32) -> (i32, i32, i32, i32) {
    %c0_i32 = arith.constant 0 : i32
    %c0_i32_0 = arith.constant 0 : i32
    %c0_i32_1 = arith.constant 0 : i32
    %c0_i32_2 = arith.constant 0 : i32
    return %arg0, %c0_i32, %c0_i32_0, %c0_i32_1 : i32, i32, i32, i32
  }
}

</mosaic_0001>

<bundles_post_ra>
// kernel: _lambda_.1
= control target key start
LH: loop header
LB: loop body
LE: loop exit
PB: predicated region body
PF: predicated region fallthrough
CT: control target
= control target key end

     0   :  { %s4983_s30 = smov 0   ;;  %s5971_s0 = inlined_call_operand.vmem [shape: f32[2,16,64], index: 0, kind: input, shape index: {}]   ;;  %s5972_s1 = inlined_call_operand.vmem [shape: f32[65,32], index: 1, kind: input, shape index: {}]   ;;  %s5973_s2 = inlined_call_operand.vmem [shape: f32[17,32], index: 2, kind: input, shape index: {}]   ;;  %s5974_s3 = inlined_call_operand.vmem [shape: f32[3,33,192], index: 3, kind: input, shape index: {}]   ;;  %s5975_s4 = inlined_call_operand.vmem [shape: f32[3,17,34], index: 4, kind: input, shape index: {}]   ;;  %s5976_s5 = inlined_call_operand.vmem [shape: f32[3,17,1], index: 5, kind: input, shape index: {}]   ;;  %s5977_s6 = inlined_call_operand.vmem [shape: f32[3,4,32], index: 6, kind: input, shape index: {}]   ;;  %s5978_s7 = inlined_call_operand.vmem [shape: f32[3,33,64], index: 7, kind: input, shape index: {}]   ;;  %s5979_s8 = inlined_call_operand.vmem [shape: f32[3,65,32], index: 8, kind: input, shape index: {}]   ;;  %s5980_s9 = inlined_call_operand.vmem [shape: f32[2,1,17,32], index: 9, kind: output, shape index: {}]  }
   0x1 LB: > { %s3822_s10 = sadd.s32 4294967295, %s4923_s30   ;;  %p3826_p0 = scmp.ge.s32.totalorder %s4923_s30, 1  ;;  %s4923_s30 = sphi %s4983_s30, %s19_s30  }
   0x2   : > { %p287_p1 = scmp.lt.s32.totalorder %s4923_s30, 3 }
   0x4   : > { %p288_p2 = pnand %p3826_p0, %p287_p1 }
   0x5   : > { %v333_v0 = vld [vmem:[%s5972_s1] sm:$0xff] (!%p288_p2)  ;;  %v334_v1 = vld [vmem:[%s5972_s1 + $0x8] sm:$0xff] (!%p288_p2)  ;;  %v335_v2 = vld [vmem:[%s5972_s1 + $0x10] sm:$0xff] (!%p288_p2)  ;;  %p323_p3 = scmp.lt.s32.totalorder (!%p288_p2), %s3822_s10, 1  ;;  %vm351_vm0 = vcmask (!%p288_p2), 523264   ;;  %v4925_v26 = vmov (!%p288_p2), 0.0  }
   0x6   : > { %291 = sbr.rel (%p288_p2) target bundleno = 7566 (0x1d8e), region = 56  ;;  %v4551_v3 = vpack.c.bf16 (!%p288_p2), %v334_v1, %v333_v0  ;;  %v336_v4 = vld [vmem:[%s5972_s1 + $0x18] sm:$0xff] (!%p288_p2)  ;;  %v337_v6 = vld [vmem:[%s5972_s1 + $0x20] sm:$0xff] (!%p288_p2)  ;;  %v338_v7 = vld [vmem:[%s5972_s1 + $0x28] sm:$0xff] (!%p288_p2)  ;;  %546 = vmatprep.mubr.f32.mxu1 (!%p288_p2), %v4925_v26  ;;  %vm436_vm1 = vcmask (!%p288_p2), 1046528   ;;  %vm448_vm2 = vcmask (!%p288_p2), 1040384  }
   0x7   : > { %v4555_v5 = vpack.c.bf16 (!%p288_p2), %v336_v4, %v335_v2  ;;  %v4559_v8 = vpack.c.bf16 (!%p288_p2), %v338_v7, %v337_v6  ;;  %v339_v9 = vld [vmem:[%s5972_s1 + $0x30] sm:$0xff] (!%p288_p2)  ;;  %v340_v10 = vld [vmem:[%s5972_s1 + $0x38] sm:$0xff] (!%p288_p2)  ;;  %v457_v14 = vld [vmem:[%s5974_s3 + $0x8] sm:$0xff] (!%p288_p2)  ;;  %vm474_vm3 = vcmask (!%p288_p2), 261120   ;;  %v4926_v46 = vmov (!%p288_p2), 0.0|0.0   ;;  %s4927_s21 = smov (!%p288_p2), 32  }
   0x8   : > { %4552 = vmatprep.subr.bf16.mxu0 (!%p288_p2), %v4551_v3  ;;  %v4563_v12 = vpack.c.bf16 (!%p288_p2), %v340_v10, %v339_v9  ;;  %v459_v15 = vld [vmem:[%s5974_s3 + $0x18] sm:$0xff] (!%p288_p2)  ;;  %v456_v17 = vld [vmem:[%s5974_s3] sm:$0xff] (!%p288_p2)  ;;  %v458_v18 = vld [vmem:[%s5974_s3 + $0x10] sm:$0xff] (!%p288_p2)  ;;  %s4928_s22 = smov (!%p288_p2), 64   ;;  %vm4929_vm4 = vmmov (!%p288_p2), 0   ;;  %vm675_vm6 = vcmask (!%p288_p2), 138240  }
   0x9   : > { %4554 = vmatpush3.bf16.msra.mxu0 (!%p288_p2), %v4551_v3  ;;  %v4567_v16 = vpack.c.bf16 (!%p288_p2), %v459_v15, %v457_v14  ;;  %v4569_v19 = vpack.c.bf16 (!%p288_p2), %v458_v18, %v456_v17  ;;  %v461_v20 = vld [vmem:[%s5974_s3 + $0x28] sm:$0xff] (!%p288_p2)  ;;  %v463_v21 = vld [vmem:[%s5974_s3 + $0x38] sm:$0xff] (!%p288_p2)  ;;  %v460_v23 = vld [vmem:[%s5974_s3 + $0x20] sm:$0xff] (!%p288_p2)  ;;  %vm682_vm7 = vcmask (!%p288_p2), 131072   ;;  %vm1079_vm8 = vcmask (!%p288_p2), 1041408  }
   0xa   : > { %4556 = vmatprep.subr.bf16.mxu0 (!%p288_p2), %v4555_v5  ;;  %v4571_v22 = vpack.c.bf16 (!%p288_p2), %v463_v21, %v461_v20  ;;  %v462_v24 = vld [vmem:[%s5974_s3 + $0x30] sm:$0xff] (!%p288_p2)  ;;  %v343_v27 = vld [vmem:[%s5973_s2 + $0x8] sm:$0xff] (!%p288_p2)  ;;  %v342_v29 = vld [vmem:[%s5973_s2] sm:$0xff] (!%p288_p2)  ;;  %vm1069_vm9 = vcmask (!%p288_p2), 277504   ;;  %vm1172_vm10 = vcmask (!%p288_p2), 253952  }
   0xb   : > { %4568 = vmatprep.subr.bf16.mxu1 (!%p288_p2), %v4567_v16  ;;  %v4573_v25 = vpack.c.bf16 (!%p288_p2), %v462_v24, %v460_v23  ;;  %v344_v28 = vld [vmem:[%s5973_s2 + $0x10] sm:$0x1] (!%p288_p2)  ;;  %v438_v30 = vrot.slane (!%p288_p2), %v343_v27, 1  ;;  %v437_v32 = vrot.slane (!%p288_p2), %v342_v29, 1  ;;  %v3830_v33 = vld [vmem:[%s5972_s1 + $0x40] ss:$0 sm:$0xff] (!%p288_p2)  ;;  %vm5112_vm5 = vmpackc.low (!%p288_p2), %vm474_vm3, %vm474_vm3 }
   0xc   : > { %4570 = vmatpush1.bf16.msra.mxu1 (!%p288_p2), %v4569_v19  ;;  %v440_v31 = vrot.slane (!%p288_p2), %v344_v28, 1  ;;  %v3833_v49 = vld [vmem:[%s5974_s3 + $0x40] ss:$0 sm:$0xff] (!%p288_p2)  ;;  %v3834_v50 = vld [vmem:[%s5974_s3 + $0x48] ss:$0 sm:$0xff] (!%p288_p2) }
   0xd   : > { %s5984_s10 = smov (!%p323_p3, %s3822_s10), 1  ;;  %4558 = vmatpush3.bf16.msra.mxu0 %v4555_v5  ;;  %4572 = vmatprep.subr.bf16.mxu1 %v4571_v22  ;;  %v439_v38 = vsel %vm436_vm1, %v437_v32, %v438_v30 }
   0xe   : > { %s4008_s23 = sshll.u32 %s5984_s10, 4  ;;  %4560 = vmatprep.subr.bf16.mxu0 %v4559_v8  ;;  %v441_v36 = vsel %vm436_vm1, %v438_v30, %v440_v31  ;;  %s4709_s19 = smul.u32 24, %s5984_s10 }
   0xf   : > { %s327_s26 = scalar_lea.vmem %s5971_s0, %s4008_s23  ;;  %s4930_s23 = smov 96  }
  0x10   : > { %v345_v11 = vld [vmem:[%s327_s26] sm:$0xff]  ;;  %v346_v13 = vld [vmem:[%s327_s26 + $0x8] sm:$0xff]  ;;  %4574 = vmatpush1.bf16.msra.mxu1 %v4573_v25  ;;  %s332_s24 = scalar_lea.vmem %s5980_s9, %s4709_s19 }
  0x11   : > { %4185 = vmatprep.mubr.msk.f32.mxu0 %vm351_vm0, %v345_v11  ;;  %4562 = vmatpush3.bf16.msra.mxu0 %v4559_v8 }
  0x12   : > { %4564 = vmatprep.subr.bf16.mxu0 %v4563_v12  ;;  %4575 = vmatprep.subr.bf16.mxu1 %v4926_v46 }
  0x15   : > { %4566 = vmatpush3.bf16.msra.mxu0 %v4563_v12 }
  0x16   : > { %4579 = vmatprep.subr.bf16.mxu0 %v4926_v46 }
  0x18   : > { %4186 = vmatmul.mubr.msk.f32.vlgmr.msra.gmra.mrb[0].mxu0 %vm351_vm0, %v346_v13 }
  0x19   : > { %4209 = vmatprep.mubr.msk.f32.mxu0 %vm4929_vm4, %v4925_v26 }
  0xeb   : > { %v4187_v34 = vpop.f32.mrb[0].mxu0 }
  0xec   : > { %v430_v35 = vadd.f32 %v4187_v34, %v3830_v33  ;;  %v424_v37 = vpop.f32.mrb[1].mxu0 }
  0xed   : > { %v425_v39 = vadd.f32 %v3830_v33, %v424_v37 }
  0xee   : > { %v445_v40 = vadd.f32 %v441_v36, %v430_v35 }
  0xef   : > { %v444_v41 = vadd.f32 %v439_v38, %v425_v39 }
  0xf0   : > { %v5060_v43 = vrot.slane %v445_v40, 7 }
  0xf1   : > { %v449_v42 = vrot.slane %v444_v41, 7 }
  0xf3   : > { %v5063_v44 = vsel %vm448_vm2, %v342_v29, %v449_v42  ;;  %v5070_v45 = vsel %vm448_vm2, %v449_v42, %v5060_v43 }
  0xf4   : > { %3835 = vmatmul.mubr.msk.f32.vlgmr.msra.gmra.mrb[0].mxu1 %vm474_vm3, %v5063_v44 }
  0xf5   : > { %552 = vmatprep.mubr.f32.mxu1 %v4925_v26 }
  0xf8   : > { %3836 = vmatmul.mubr.msk.f32.gmra.mrb[2].mxu1 %vm474_vm3, %v5070_v45 }
  0xf9   : > { %558 = vmatprep.mubr.f32.mxu1 %v4925_v26 }
  0xfc   : > { %3837 = vmatmul.mubr.msk.f32.gmra.mrb[4].mxu1 %vm474_vm3, %v5060_v43 }
  0xfd   : > { %4194 = vmatprep.mubr.msk.f32.mxu1 %vm4929_vm4, %v4925_v26 }
 0x1c7   : > { %v548_v47 = vpop.f32.mrb[0].mxu1 }
 0x1c8   : > { %v550_v48 = vpop.f32.mrb[1].mxu1  ;;  %v549_v52 = vadd.f32 %v3833_v49, %v548_v47 }
 0x1c9   : > { %v5085_v55 = vadd.f32 %v3834_v50, %v550_v48 }
 0x1cb   : > { %v554_v51 = vpop.f32.mrb[2].mxu1 }
 0x1cc   : > { %v555_v53 = vadd.f32 %v3833_v49, %v554_v51  ;;  %v556_v54 = vpop.f32.mrb[3].mxu1 }
 0x1cd   : > { %v5087_v56 = vadd.f32 %v3834_v50, %v556_v54 }
 0x1ce   : > { %v4731_v57 = vpack.i.bf16 %v555_v53, %v549_v52 }
 0x1cf   : > { %v4736_v58 = vpack.i.bf16 %v5087_v56, %v5085_v55  ;;  %v4580_v59 = vpack.c.bf16 %v5087_v56, %v5085_v55  ;;  %v560_v60 = vpop.f32.mrb[4].mxu1 }
 0x1d0   : > { %v562_v61 = vpop.f32.mrb[5].mxu1  ;;  %4732 = vrot.lane.b32.xlu1 %v4731_v57, %s4927_s21  ;;  %4727 = vrot.lane.b32.xlu0 %v4731_v57, %s4928_s22  ;;  %v561_v62 = vadd.f32 %v3833_v49, %v560_v60 }
 0x1d1   : > { %4581 = vmatpush3.bf16.msra.mxu0 %v4580_v59  ;;  %v5100_v63 = vadd.f32 %v3834_v50, %v562_v61 }
 0x1d2   : > { %4207 = vmatprep.subr.mxu0 %v4925_v26 }
 0x1d4   : > { %812 = vrot.lane.b32.xlu1 %v561_v62, %s4927_s21  ;;  %578 = vrot.lane.b32.xlu0 %v561_v62, %s4928_s22 }
 0x1d5   : > { %4208 = vmatpush3.msk.msra.mxu0 %vm448_vm2, %v5100_v63 }
 0x1d6   : > { %4586 = vmatprep.subr.bf16.mxu0 %v4926_v46 }
 0x1d8   : > { %804 = vrot.lane.b32.xlu1 %v555_v53, %s4930_s23  ;;  %802 = vrot.lane.b32.xlu0 %v549_v52, %s4930_s23 }
 0x1dc   : > { %806 = vrot.lane.b32.xlu0 %v561_v62, %s4930_s23 }
 0x242   : > { %v4728_v0 = vpop.permute.xlu0 %4727  ;;  %v4733_v5 = vpop.permute.xlu1 %4732 }
 0x243   : > { %v4730_v1 = vunpack.i.h.bf16 %v4728_v0  ;;  %v4729_v2 = vunpack.i.l.bf16 %v4728_v0  ;;  %v4735_v6 = vunpack.i.h.bf16 %v4733_v5  ;;  %v4734_v7 = vunpack.i.l.bf16 %v4733_v5 }
 0x245   : > { %v4576_v4 = vpack.c.bf16 %v4730_v1, %v4729_v2  ;;  %v4583_v9 = vpack.c.bf16 %v4735_v6, %v4734_v7 }
 0x246   : > { %v579_v8 = vpop.permute.xlu0 %578  ;;  %v813_v10 = vpop.permute.xlu1 %812 }
 0x247   : > { %4578 = vmatpush3.bf16.xpose.msk.msra.mxu1 %vm5112_vm5, %v4576_v4 }
 0x248   : > { %4192 = vmatprep.subr.mxu1 %v4925_v26 }
 0x24a   : > { %v803_v11 = vpop.permute.xlu0 %802  ;;  %v805_v12 = vpop.permute.xlu1 %804 }
 0x24e   : > { %v807_v13 = vpop.permute.xlu0 %806 }
 0x24f   : > { %4193 = vmatpush3.xpose.msk.msra.mxu1 %vm474_vm3, %v579_v8 }
 0x250   : > { %4582 = vmatprep.subr.bf16.mxu1 %v4926_v46 }
 0x252   : > { %4195 = vmatmul.mubr.msk.f32.vlgmr.msra.gmra.mrb[6].mxu1 %vm474_vm3, %v549_v52 }
 0x253   : > { %4585 = vmatpush3.bf16.xpose.msk.msra.mxu1 %vm5112_vm5, %v4583_v9  ;;  %4197 = vmatprep.mubr.msk.f32.mxu1 %vm4929_vm4, %v4925_v26 }
 0x254   : > { %4222 = vmatprep.subr.mxu1 %v4925_v26 }
 0x256   : > { %4198 = vmatmul.mubr.msk.f32.gmra.mrb[8].mxu1 %vm474_vm3, %v555_v53 }
 0x257   : > { %4200 = vmatprep.mubr.msk.f32.mxu1 %vm4929_vm4, %v4925_v26 }
 0x25a   : > { %4201 = vmatmul.mubr.msk.f32.gmra.mrb[10].mxu1 %vm474_vm3, %v561_v62 }
 0x25b   : > { %4223 = vmatpush3.xpose.msk.msra.mxu1 %vm474_vm3, %v813_v10  ;;  %4224 = vmatprep.mubr.msk.f32.mxu1 %vm4929_vm4, %v4925_v26 }
 0x25c   : > { %4589 = vmatprep.subr.bf16.mxu1 %v4926_v46 }
 0x25e   : > { %4225 = vmatmul.mubr.msk.f32.vlgmr.msra.gmra.mrb[12].mxu1 %vm474_vm3, %v803_v11 }
 0x25f   : > { %4227 = vmatprep.mubr.msk.f32.mxu1 %vm4929_vm4, %v4925_v26 }
 0x262   : > { %4228 = vmatmul.mubr.msk.f32.gmra.mrb[14].mxu1 %vm474_vm3, %v805_v12 }
 0x263   : > { %4230 = vmatprep.mubr.msk.f32.mxu1 %vm4929_vm4, %v4925_v26 }
 0x266   : > { %4231 = vmatmul.mubr.msk.f32.gmra.mrb[16].mxu1 %vm474_vm3, %v807_v13 }
 0x267   : > { %4258 = vmatprep.mubr.msk.f32.mxu1 %vm4929_vm4, %v4925_v26 }
 0x325   : > { %v658_v14 = vpop.f32.mrb[6].mxu1 }
 0x326   : > { %v672_v15 = vmul.f32 0.25, %v658_v14  ;;  %v4196_v16 = vpop.f32.mrb[7].mxu1 }
 0x328   : > { %v676_v17 = vsel %vm675_vm6, %v672_v15, -inf }
 0x329   : > { %677 = vmax.xlane.f32.xlu1 %v676_v17  ;;  %v663_v18 = vpop.f32.mrb[8].mxu1 }
 0x32a   : > { %v673_v19 = vmul.f32 0.25, %v663_v18  ;;  %v4199_v20 = vpop.f32.mrb[9].mxu1 }
 0x32c   : > { %v679_v21 = vsel %vm675_vm6, %v673_v19, -inf }
 0x32d   : > { %680 = vmax.xlane.f32.xlu0 %v679_v21  ;;  %v668_v22 = vpop.f32.mrb[10].mxu1 }
 0x32e   : > { %v674_v23 = vmul.f32 0.25, %v668_v22  ;;  %v4202_v24 = vpop.f32.mrb[11].mxu1 }
 0x330   : > { %v683_v25 = vsel %vm682_vm7, %v674_v23, -inf }
 0x331   : > { %684 = vmax.xlane.f32.xlu0 %v683_v25  ;;  %v892_v27 = vpop.f32.mrb[12].mxu1 }
 0x332   : > { %v906_v28 = vmul.f32 0.25, %v892_v27  ;;  %v4226_v29 = vpop.f32.mrb[13].mxu1 }
 0x334   : > { %v909_v30 = vsel %vm675_vm6, %v906_v28, -inf }
 0x335   : > { %910 = vmax.xlane.f32.xlu1 %v909_v30  ;;  %v897_v31 = vpop.f32.mrb[14].mxu1 }
 0x336   : > { %v907_v32 = vmul.f32 0.25, %v897_v31  ;;  %v4229_v33 = vpop.f32.mrb[15].mxu1 }
 0x338   : > { %v912_v34 = vsel %vm675_vm6, %v907_v32, -inf }
 0x339   : > { %913 = vmax.xlane.f32.xlu0 %v912_v34  ;;  %v902_v35 = vpop.f32.mrb[16].mxu1  ;;  %v568_v34 = vld [vmem:[%s5976_s5] sm:$0xff] }
 0x33a   : > { %v908_v36 = vmul.f32 0.25, %v902_v35  ;;  %v4232_v37 = vpop.f32.mrb[17].mxu1  ;;  %v569_v35 = vld [vmem:[%s5976_s5 + $0x8] sm:$0xff] }
 0x33b   : > { %v570_v37 = vld [vmem:[%s5976_s5 + $0x10] sm:$0x1] }
 0x33c   : > { %v915_v38 = vsel %vm682_vm7, %v908_v36, -inf }
 0x33d   : > { %916 = vmax.xlane.f32.xlu1 %v915_v38 }
 0x3b6   : > { %v678_v39 = vpop.xlane.xlu1 %677 }
 0x3b7   : > { %v686_v40 = vsub.f32 %v672_v15, %v678_v39 }
 0x3b9   : > { %v689_v41 = vmul.f32 1.442695, %v686_v40 }
 0x3ba   : > { %v681_v42 = vpop.xlane.xlu0 %680 }
 0x3bb   : > { %4773 = vpow2.f32 %v689_v41  ;;  %v687_v47 = vsub.f32 %v673_v19, %v681_v42 }
 0x3bd   : > { %v691_v48 = vmul.f32 1.442695, %v687_v47 }
 0x3be   : > { %v685_v49 = vpop.xlane.xlu0 %684 }
 0x3bf   : > { %4775 = vpow2.f32 %v691_v48  ;;  %v688_v50 = vsub.f32 %v674_v23, %v685_v49 }
 0x3c1   : > { %v693_v51 = vmul.f32 1.442695, %v688_v50 }
 0x3c2   : > { %v911_v52 = vpop.xlane.xlu1 %910 }
 0x3c3   : > { %4777 = vpow2.f32 %v693_v51  ;;  %v918_v53 = vsub.f32 %v906_v28, %v911_v52 }
 0x3c5   : > { %v4774_v54 = vpop.eup %4773  ;;  %v921_v57 = vmul.f32 1.442695, %v918_v53 }
 0x3c6   : > { %v914_v59 = vpop.xlane.xlu0 %913  ;;  %v695_v60 = vsel %vm675_vm6, %v4774_v54, 0.0 }
 0x3c7   : > { %4779 = vpow2.f32 %v921_v57  ;;  %v919_v61 = vsub.f32 %v907_v32, %v914_v59  ;;  %696 = vadd.xlane.f32.xlu0 %v695_v60 }
 0x3c9   : > { %v4776_v62 = vpop.eup %4775  ;;  %v923_v0 = vmul.f32 1.442695, %v919_v61 }
 0x3ca   : > { %v917_v1 = vpop.xlane.xlu1 %916  ;;  %v698_v2 = vsel %vm675_vm6, %v4776_v62, 0.0 }
 0x3cb   : > { %4781 = vpow2.f32 %v923_v0  ;;  %v920_v4 = vsub.f32 %v908_v36, %v917_v1  ;;  %699 = vadd.xlane.f32.xlu1 %v698_v2  ;;  %v4931_v36 = vmov 0   ;;  %v565_v2 = vld [vmem:[%s5975_s4] sm:$0xff] }
 0x3cc   : > { %4741 = vset.pattern.permute.xlu1 %v4931_v36  ;;  %4742 = vset.pattern.permute.xlu0 %v4931_v36  ;;  %v1223_v36 = vld [vmem:[%s5978_s7 + $0x10] sm:$0xff] }
 0x3cd   : > { %v4778_v5 = vpop.eup %4777  ;;  %v925_v6 = vmul.f32 1.442695, %v920_v4  ;;  %v566_v4 = vld [vmem:[%s5975_s4 + $0x8] sm:$0xff] }
 0x3ce   : > { %v701_v7 = vsel %vm682_vm7, %v4778_v5, 0.0 }
 0x3cf   : > { %4783 = vpow2.f32 %v925_v6  ;;  %702 = vadd.xlane.f32.xlu0 %v701_v7 }
 0x3d1   : > { %v4780_v8 = vpop.eup %4779 }
 0x3d2   : > { %v927_v9 = vsel %vm675_vm6, %v4780_v8, 0.0 }
 0x3d3   : > { %928 = vadd.xlane.f32.xlu1 %v927_v9 }
 0x3d5   : > { %v4782_v10 = vpop.eup %4781 }
 0x3d6   : > { %v930_v11 = vsel %vm675_vm6, %v4782_v10, 0.0 }
 0x3d7   : > { %931 = vadd.xlane.f32.xlu0 %v930_v11 }
 0x3d9   : > { %v4784_v12 = vpop.eup %4783 }
 0x3da   : > { %v933_v13 = vsel %vm682_vm7, %v4784_v12, 0.0 }
 0x3db   : > { %934 = vadd.xlane.f32.xlu1 %v933_v13 }
 0x3ec   : > { %948 = vrot.lane.b32.xlu1 %v5100_v63, %s4930_s23 }
 0x3ed   : > { %4737 = vrot.lane.b32.xlu0 %v4736_v58, %s4930_s23 }
 0x3f0   : > { %1056 = vperm.xlu1 %4741, %v568_v34   ;;  %v1222_v34 = vld [vmem:[%s5978_s7 + $0x8] sm:$0xff] }
 0x3f1   : > { %1061 = vperm.xlu0 %4742, %v569_v35  }
 0x3f4   : > { %1066 = vperm.xlu1 %4741, %v570_v37   ;;  %v1224_v37 = vld [vmem:[%s5978_s7 + $0x18] sm:$0xff] }
 0x454   : > { %v697_v14 = vpop.xlane.xlu0 %696 }
 0x455   : > { %4785 = vrcp.f32 %v697_v14 }
 0x458   : > { %v700_v15 = vpop.xlane.xlu1 %699 }
 0x459   : > { %4787 = vrcp.f32 %v700_v15 }
 0x45c   : > { %v703_v16 = vpop.xlane.xlu0 %702 }
 0x45d   : > { %4789 = vrcp.f32 %v703_v16 }
 0x45f   : > { %v4786_v17 = vpop.eup %4785 }
 0x460   : > { %v707_v18 = vmul.f32 %v4786_v17, %v4774_v54  ;;  %v929_v19 = vpop.xlane.xlu1 %928 }
 0x461   : > { %4791 = vrcp.f32 %v929_v19 }
 0x462   : > { %4210 = vmatmul.mubr.msk.f32.vlgmr.msra.gmra.mrb[2].mxu0 %vm675_vm6, %v707_v18 }
 0x463   : > { %v4788_v20 = vpop.eup %4787  ;;  %4212 = vmatprep.mubr.msk.f32.mxu0 %vm4929_vm4, %v4925_v26 }
 0x464   : > { %v932_v63 = vpop.xlane.xlu0 %931  ;;  %v708_v21 = vmul.f32 %v4788_v20, %v4776_v62 }
 0x465   : > { %4793 = vrcp.f32 %v932_v63 }
 0x466   : > { %4213 = vmatmul.mubr.msk.f32.gmra.mrb[4].mxu0 %vm675_vm6, %v708_v21 }
 0x467   : > { %v4790_v55 = vpop.eup %4789  ;;  %4215 = vmatprep.mubr.msk.f32.mxu0 %vm4929_vm4, %v4925_v26 }
 0x468   : > { %v4738_v56 = vpop.permute.xlu0 %4737  ;;  %v935_v58 = vpop.xlane.xlu1 %934  ;;  %v709_v22 = vmul.f32 %v4790_v55, %v4778_v5  ;;  %v567_v5 = vld [vmem:[%s5975_s4 + $0x10] sm:$0x1] }
 0x469   : > { %v4740_v23 = vunpack.i.h.bf16 %v4738_v56  ;;  %v4739_v24 = vunpack.i.l.bf16 %v4738_v56  ;;  %4795 = vrcp.f32 %v935_v58 }
 0x46a   : > { %4216 = vmatmul.mubr.msk.f32.gmra.mrb[6].mxu0 %vm675_vm6, %v709_v22 }
 0x46b   : > { %v4587_v25 = vpack.c.bf16 %v4740_v23, %v4739_v24  ;;  %4239 = vmatprep.mubr.msk.f32.mxu0 %vm4929_vm4, %v4925_v26  ;;  %v4792_v27 = vpop.eup %4791 }
 0x46c   : > { %v939_v28 = vmul.f32 %v4792_v27, %v4780_v8  ;;  %v949_v29 = vpop.permute.xlu1 %948 }
 0x46d   : > { %4588 = vmatpush3.bf16.msra.mxu0 %v4587_v25 }
 0x46e   : > { %4237 = vmatprep.subr.mxu0 %v4925_v26 }
 0x46f   : > { %v4794_v30 = vpop.eup %4793 }
 0x470   : > { %v940_v31 = vmul.f32 %v4794_v30, %v4782_v10  ;;  %v1057_v6 = vpop.permute.xlu1 %1056  ;;  %v1062_v10 = vpop.permute.xlu0 %1061 }
 0x471   : > { %4238 = vmatpush3.msk.msra.mxu0 %vm448_vm2, %v949_v29 }
 0x472   : > { %4240 = vmatmul.mubr.msk.f32.vlgmr.msra.gmra.mrb[8].mxu0 %vm675_vm6, %v939_v28  ;;  %4595 = vmatprep.subr.bf16.mxu0 %v4926_v46 }
 0x473   : > { %4242 = vmatprep.mubr.msk.f32.mxu0 %vm4929_vm4, %v4925_v26  ;;  %v4796_v32 = vpop.eup %4795 }
 0x474   : > { %v941_v33 = vmul.f32 %v4796_v32, %v4784_v12  ;;  %v1067_v17 = vpop.permute.xlu1 %1066 }
 0x476   : > { %4243 = vmatmul.mubr.msk.f32.gmra.mrb[10].mxu0 %vm675_vm6, %v940_v31 }
 0x477   : > { %4245 = vmatprep.mubr.msk.f32.mxu0 %vm4929_vm4, %v4925_v26 }
 0x47a   : > { %4246 = vmatmul.mubr.msk.f32.gmra.mrb[12].mxu0 %vm675_vm6, %v941_v33  ;;  %v1221_v33 = vld [vmem:[%s5978_s7] sm:$0xff] }
 0x47b   : > { %4275 = vmatprep.mubr.msk.f32.mxu0 %vm4929_vm4, %v4925_v26  ;;  %v4596_v35 = vpack.c.bf16 %v1222_v34, %v1221_v33 }
 0x47d   : > { %4597 = vmatpush3.bf16.msra.mxu0 %v4596_v35 }
 0x47e   : > { %4598 = vmatprep.subr.bf16.mxu0 %v4926_v46 }
 0x535   : > { %v788_v38 = vpop.f32.mrb[2].mxu0 }
 0x536   : > { %v4211_v39 = vpop.f32.mrb[3].mxu0 }
 0x539   : > { %v793_v40 = vpop.f32.mrb[4].mxu0 }
 0x53a   : > { %v4590_v41 = vpack.c.bf16 %v793_v40, %v788_v38  ;;  %v4214_v42 = vpop.f32.mrb[5].mxu0  ;;  %v4599_v38 = vpack.c.bf16 %v1224_v37, %v1223_v36 }
 0x53c   : > { %4591 = vmatpush3.bf16.msra.mxu1 %v4590_v41  ;;  %4600 = vmatpush3.bf16.msra.mxu0 %v4599_v38  ;;  %v1207_v41 = vlaneseq }
 0x53d   : > { %v798_v47 = vpop.f32.mrb[6].mxu0  ;;  %4592 = vmatprep.subr.bf16.mxu1 %v4926_v46 }
 0x53e   : > { %v4217_v48 = vpop.f32.mrb[7].mxu0 }
 0x545   : > { %v1029_v49 = vpop.f32.mrb[8].mxu0 }
 0x546   : > { %v1046_v50 = vrot.slane %v1029_v49, 7  ;;  %v4241_v51 = vpop.f32.mrb[9].mxu0  ;;  %v5239_v49 = vshrl.u32 %v1207_v41, 7 }
 0x548   : > { %v1053_v52 = vsel %vm448_vm2, %v798_v47, %v1046_v50 }
 0x549   : > { %v1034_v53 = vpop.f32.mrb[10].mxu0 }
 0x54a   : > { %v1047_v54 = vrot.slane %v1034_v53, 7  ;;  %v4244_v57 = vpop.f32.mrb[11].mxu0  ;;  %v5242_v53 = vsub.s32 0, %v5239_v49 }
 0x54c   : > { %v1048_v59 = vsel %vm448_vm2, %v1046_v50, %v1047_v54 }
 0x54d   : > { %v4593_v60 = vpack.c.bf16 %v1048_v59, %v1053_v52  ;;  %v1039_v61 = vpop.f32.mrb[12].mxu0  ;;  %v5250_v59 = vsub.s32 1, %v5239_v49 }
 0x54e   : > { %v1049_v62 = vrot.slane %v1039_v61, 7  ;;  %v4247_v0 = vpop.f32.mrb[13].mxu0 }
 0x54f   : > { %4594 = vmatpush3.bf16.msra.mxu1 %v4593_v60 }
 0x550   : > { %v1050_v1 = vsel %vm448_vm2, %v1047_v54, %v1049_v62  ;;  %4256 = vmatprep.subr.mxu1 %v4925_v26  ;;  %v5247_v54 = vld [vmem:[%s5977_s6] sm:$0xf] }
 0x551   : > { %v1210_v60 = vrot.slane %v5247_v54, %v5242_v53  ;;  %v1217_v62 = vrot.slane %v5247_v54, %v5250_v59 }
 0x553   : > { %4257 = vmatpush3.msk.msra.mxu1 %vm1079_vm8, %v1050_v1 }
 0x554   : > { %4259 = vmatmul.mubr.msk.f32.vlgmr.msra.gmra.mrb[18].mxu1 %vm1069_vm9, %v565_v2  ;;  %4601 = vmatprep.subr.bf16.mxu1 %v4926_v46 }
 0x555   : > { %4261 = vmatprep.mubr.msk.f32.mxu1 %vm4929_vm4, %v4925_v26 }
 0x558   : > { %4262 = vmatmul.mubr.msk.f32.gmra.mrb[20].mxu1 %vm1069_vm9, %v566_v4 }
 0x559   : > { %4264 = vmatprep.mubr.msk.f32.mxu1 %vm4929_vm4, %v4925_v26 }
 0x55c   : > { %4265 = vmatmul.mubr.msk.f32.gmra.mrb[22].mxu1 %vm1069_vm9, %v567_v5 }
 0x55d   : > { %4300 = vmatprep.mubr.msk.f32.mxu1 %vm4929_vm4, %v4925_v26 }
 0x627   : > { %v1148_v7 = vpop.f32.mrb[18].mxu1 }
 0x628   : > { %v1149_v8 = vadd.f32 %v1148_v7, %v1057_v6  ;;  %v4260_v9 = vpop.f32.mrb[19].mxu1 }
 0x62a   : > { %v1163_v11 = vadd.f32 %v1149_v8, %v5063_v44 }
 0x62b   : > { %v1153_v12 = vpop.f32.mrb[20].mxu1 }
 0x62c   : > { %v1154_v13 = vadd.f32 %v1153_v12, %v1062_v10  ;;  %v4263_v14 = vpop.f32.mrb[21].mxu1  ;;  %v1166_v15 = vsel %vm474_vm3, %v1163_v11, 0.0  ;;  %v1400_v12 = vld [vmem:[%s5979_s8] sm:$0xff] }
 0x62d   : > { %1167 = vadd.xlane.f32.xlu1 %v1166_v15  ;;  %v1402_v15 = vld [vmem:[%s5979_s8 + $0x10] sm:$0xff] }
 0x62e   : > { %v1164_v16 = vadd.f32 %v1154_v13, %v5070_v45  ;;  %v1401_v13 = vld [vmem:[%s5979_s8 + $0x8] sm:$0xff] }
 0x62f   : > { %v1158_v18 = vpop.f32.mrb[22].mxu1  ;;  %v4602_v14 = vpack.c.bf16 %v1401_v13, %v1400_v12 }
 0x630   : > { %v1159_v19 = vadd.f32 %v1158_v18, %v1067_v17  ;;  %v1169_v20 = vsel %vm474_vm3, %v1164_v16, 0.0  ;;  %v4266_v63 = vpop.f32.mrb[23].mxu1  ;;  %v1404_v18 = vld [vmem:[%s5979_s8 + $0x20] sm:$0xff] }
 0x631   : > { %1170 = vadd.xlane.f32.xlu0 %v1169_v20  ;;  %4603 = vmatpush3.bf16.msra.mxu1 %v4602_v14  ;;  %v1406_v63 = vld [vmem:[%s5979_s8 + $0x30] sm:$0xff] }
 0x632   : > { %v1165_v21 = vadd.f32 %v1159_v19, %v5060_v43  ;;  %4604 = vmatprep.subr.bf16.mxu1 %v4926_v46  ;;  %v1405_v19 = vld [vmem:[%s5979_s8 + $0x28] sm:$0xff] }
 0x633   : > { %v4608_v20 = vpack.c.bf16 %v1405_v19, %v1404_v18 }
 0x634   : > { %v1173_v44 = vsel %vm1172_vm10, %v1165_v21, 0.0 }
 0x635   : > { %1174 = vadd.xlane.f32.xlu0 %v1173_v44 }
 0x6ba   : > { %v1168_v55 = vpop.xlane.xlu1 %1167 }
 0x6bb   : > { %v1177_v56 = vmul.f32 0.03125, %v1168_v55  ;;  %v3862_v55 = vld [vmem:[%s5978_s7 + $0x20] ss:$0 sm:$0xff] }
 0x6bd   : > { %v1180_v58 = vsub.f32 %v1163_v11, %v1177_v56 }
 0x6be   : > { %v1171_v22 = vpop.xlane.xlu0 %1170 }
 0x6bf   : > { %v1178_v23 = vmul.f32 0.03125, %v1171_v22  ;;  %v1183_v24 = vmul.f32 %v1180_v58, %v1180_v58 }
 0x6c1   : > { %v1181_v45 = vsub.f32 %v1164_v16, %v1178_v23  ;;  %v1186_v25 = vsel %vm474_vm3, %v1183_v24, 0.0  ;;  %v1403_v16 = vld [vmem:[%s5979_s8 + $0x18] sm:$0xff] }
 0x6c2   : > { %1187 = vadd.xlane.f32.xlu1 %v1186_v25  ;;  %v1175_v27 = vpop.xlane.xlu0 %1174  ;;  %v4605_v17 = vpack.c.bf16 %v1403_v16, %v1402_v15 }
 0x6c3   : > { %v1179_v28 = vmul.f32 0.03125, %v1175_v27  ;;  %v1184_v29 = vmul.f32 %v1181_v45, %v1181_v45 }
 0x6c4   : > { %4606 = vmatpush3.bf16.msra.mxu1 %v4605_v17 }
 0x6c5   : > { %v1182_v30 = vsub.f32 %v1165_v21, %v1179_v28  ;;  %v1189_v31 = vsel %vm474_vm3, %v1184_v29, 0.0  ;;  %4607 = vmatprep.subr.bf16.mxu1 %v4926_v46  ;;  %v1407_v21 = vld [vmem:[%s5979_s8 + $0x38] sm:$0xff] }
 0x6c6   : > { %1190 = vadd.xlane.f32.xlu0 %v1189_v31  ;;  %v4611_v44 = vpack.c.bf16 %v1407_v21, %v1406_v63 }
 0x6c7   : > { %v1185_v43 = vmul.f32 %v1182_v30, %v1182_v30 }
 0x6c8   : > { %4609 = vmatpush3.bf16.msra.mxu1 %v4608_v20 }
 0x6c9   : > { %v1192_v32 = vsel %vm1172_vm10, %v1185_v43, 0.0  ;;  %4610 = vmatprep.subr.bf16.mxu1 %v4926_v46 }
 0x6ca   : > { %1193 = vadd.xlane.f32.xlu1 %v1192_v32 }
 0x6cc   : > { %4612 = vmatpush3.bf16.msra.mxu1 %v4611_v44 }
 0x6cd   : > { %4625 = vmatprep.subr.bf16.mxu1 %v4926_v46 }
 0x74f   : > { %v1188_v39 = vpop.xlane.xlu1 %1187 }
 0x750   : > { %v1195_v40 = vmul.f32 0.03125, %v1188_v39 }
 0x752   : > { %v1198_v42 = vadd.f32 1e-05, %v1195_v40 }
 0x753   : > { %v1191_v47 = vpop.xlane.xlu0 %1190 }
 0x754   : > { %4797 = vrsqrt.f32 %v1198_v42  ;;  %v1196_v48 = vmul.f32 0.03125, %v1191_v47 }
 0x756   : > { %v1199_v50 = vadd.f32 1e-05, %v1196_v48 }
 0x757   : > { %v1194_v51 = vpop.xlane.xlu1 %1193 }
 0x758   : > { %4799 = vrsqrt.f32 %v1199_v50  ;;  %v1197_v52 = vmul.f32 0.03125, %v1194_v51 }
 0x75a   : > { %v1200_v57 = vadd.f32 1e-05, %v1197_v52 }
 0x75c   : > { %4801 = vrsqrt.f32 %v1200_v57 }
 0x75e   : > { %v4798_v61 = vpop.eup %4797 }
 0x75f   : > { %v1204_v0 = vmul.f32 %v4798_v61, %v1180_v58 }
 0x761   : > { %v1211_v1 = vmul.f32 %v1210_v60, %v1204_v0 }
 0x762   : > { %v4800_v2 = vpop.eup %4799 }
 0x763   : > { %v5256_v4 = vadd.f32 %v1217_v62, %v1211_v1  ;;  %v1205_v5 = vmul.f32 %v4800_v2, %v1181_v45 }
 0x765   : > { %4276 = vmatmul.mubr.msk.f32.vlgmr.msra.gmra.mrb[14].mxu0 %vm474_vm3, %v5256_v4  ;;  %v1212_v6 = vmul.f32 %v1210_v60, %v1205_v5 }
 0x766   : > { %v4802_v7 = vpop.eup %4801  ;;  %4278 = vmatprep.mubr.msk.f32.mxu0 %vm4929_vm4, %v4925_v26 }
 0x767   : > { %v5262_v8 = vadd.f32 %v1217_v62, %v1212_v6  ;;  %v1206_v9 = vmul.f32 %v4802_v7, %v1182_v30 }
 0x769   : > { %4279 = vmatmul.mubr.msk.f32.gmra.mrb[16].mxu0 %vm474_vm3, %v5262_v8  ;;  %v1213_v10 = vmul.f32 %v1210_v60, %v1206_v9 }
 0x76a   : > { %4281 = vmatprep.mubr.msk.f32.mxu0 %vm4929_vm4, %v4925_v26 }
 0x76b   : > { %v5268_v11 = vadd.f32 %v1217_v62, %v1213_v10 }
 0x76d   : > { %4282 = vmatmul.mubr.msk.f32.gmra.mrb[18].mxu0 %vm474_vm3, %v5268_v11 }
 0x76e   : > { %1650 = vmatprep.mubr.f32.mxu0 %v4925_v26 }
 0x838   : > { %v1305_v56 = vpop.f32.mrb[14].mxu0 }
 0x839   : > { %v5304_v58 = vadd.f32 %v3862_v55, %v1305_v56  ;;  %v4277_v22 = vpop.f32.mrb[15].mxu0 }
 0x83b   : > { %v5307_v23 = vmul.f32 0.70710677, %v5304_v58 }
 0x83c   : > { %v1310_v24 = vpop.f32.mrb[16].mxu0 }
 0x83d   : > { %v1331_v45 = vand.u32 2147483647, %v5307_v23  ;;  %v5310_v25 = vadd.f32 %v3862_v55, %v1310_v24  ;;  %v4280_v27 = vpop.f32.mrb[17].mxu0  ;;  %vm1325_vm11 = vcmp.ge.f32.partialorder %v5307_v23, 0.0 }
 0x83f   : > { %v1334_v28 = vmul.f32 0.3275911, %v1331_v45  ;;  %v5313_v29 = vmul.f32 0.70710677, %v5310_v25  ;;  %v1373_v39 = vsub.f32 0.0, %v1331_v45 }
 0x840   : > { %v1315_v30 = vpop.f32.mrb[18].mxu0 }
 0x841   : > { %v1337_v31 = vadd.f32 1.0, %v1334_v28  ;;  %v1332_v43 = vand.u32 2147483647, %v5313_v29  ;;  %v4283_v32 = vpop.f32.mrb[19].mxu0  ;;  %v5316_v33 = vadd.f32 %v3862_v55, %v1315_v30  ;;  %v1376_v42 = vmul.f32 %v1373_v39, %v1331_v45 }
 0x842   : > { %vm1326_vm12 = vcmp.ge.f32.partialorder %v5313_v29, 0.0 }
 0x843   : > { %4803 = vrcp.f32 %v1337_v31  ;;  %v1335_v34 = vmul.f32 0.3275911, %v1332_v43  ;;  %v5319_v35 = vmul.f32 0.70710677, %v5316_v33  ;;  %v1374_v47 = vsub.f32 0.0, %v1332_v43 }
 0x844   : > { %v1379_v52 = vmul.f32 1.442695, %v1376_v42  ;;  %v4932_v31 = vmov -1.0  }
 0x845   : > { %v1338_v36 = vadd.f32 1.0, %v1335_v34  ;;  %v1333_v37 = vand.u32 2147483647, %v5319_v35  ;;  %v1377_v57 = vmul.f32 %v1374_v47, %v1332_v43  ;;  %v1328_v43 = vsel %vm1325_vm11, 1.0, %v4932_v31 }
 0x846   : > { %v1329_v23 = vsel %vm1326_vm12, 1.0, %v4932_v31  ;;  %vm1327_vm13 = vcmp.ge.f32.partialorder %v5319_v35, 0.0  ;;  %v3866_v35 = vld [vmem:[%s5979_s8 + $0x40] ss:$0 sm:$0xff] }
 0x847   : > { %4805 = vrcp.f32 %v1338_v36  ;;  %v1336_v38 = vmul.f32 0.3275911, %v1333_v37  ;;  %v1375_v62 = vsub.f32 0.0, %v1333_v37  ;;  %v1381_v2 = vmul.f32 1.442695, %v1377_v57 }
 0x848   : > { %v1330_v57 = vsel %vm1327_vm13, 1.0, %v4932_v31 }
 0x849   : > { %v1339_v40 = vadd.f32 1.0, %v1336_v38  ;;  %v1378_v9 = vmul.f32 %v1375_v62, %v1333_v37  ;;  %v1319_v38 = vmul.f32 0.5, %v5304_v58 }
 0x84b   : > { %4807 = vrcp.f32 %v1339_v40  ;;  %v1383_v17 = vmul.f32 1.442695, %v1378_v9 }
 0x84c   : > { %4809 = vpow2.f32 %v1379_v52 }
 0x84d   : > { %v4804_v41 = vpop.eup %4803  ;;  %4811 = vpow2.f32 %v1381_v2 }
 0x84e   : > { %v1346_v48 = vmul.f32 1.0614054, %v4804_v41  ;;  %4813 = vpow2.f32 %v1383_v17 }
 0x850   : > { %v1349_v50 = vadd.f32 -1.4531521, %v1346_v48 }
 0x851   : > { %v4806_v51 = vpop.eup %4805 }
 0x852   : > { %v1352_v60 = vmul.f32 %v4804_v41, %v1349_v50  ;;  %v1347_v61 = vmul.f32 1.0614054, %v4806_v51 }
 0x854   : > { %v1355_v0 = vadd.f32 1.4214138, %v1352_v60  ;;  %v1350_v1 = vadd.f32 -1.4531521, %v1347_v61  ;;  %v1321_v61 = vmul.f32 0.5, %v5316_v33 }
 0x855   : > { %v4808_v5 = vpop.eup %4807 }
 0x856   : > { %v1358_v6 = vmul.f32 %v4804_v41, %v1355_v0  ;;  %v1353_v7 = vmul.f32 %v4806_v51, %v1350_v1  ;;  %v1348_v10 = vmul.f32 1.0614054, %v4808_v5  ;;  %v4810_v55 = vpop.eup %4809 }
 0x857   : > { %v4812_v30 = vpop.eup %4811 }
 0x858   : > { %v1361_v12 = vadd.f32 -0.28449672, %v1358_v6  ;;  %v1356_v13 = vadd.f32 1.4214138, %v1353_v7  ;;  %v1351_v14 = vadd.f32 -1.4531521, %v1348_v10  ;;  %v4814_v42 = vpop.eup %4813 }
 0x85a   : > { %v1364_v15 = vmul.f32 %v4804_v41, %v1361_v12  ;;  %v1359_v16 = vmul.f32 %v4806_v51, %v1356_v13  ;;  %v1354_v18 = vmul.f32 %v4808_v5, %v1351_v14 }
 0x85c   : > { %v1367_v19 = vadd.f32 0.2548296, %v1364_v15  ;;  %v1362_v20 = vadd.f32 -0.28449672, %v1359_v16  ;;  %v1357_v63 = vadd.f32 1.4214138, %v1354_v18 }
 0x85e   : > { %v1370_v21 = vmul.f32 %v4804_v41, %v1367_v19  ;;  %v1365_v44 = vmul.f32 %v4806_v51, %v1362_v20  ;;  %v1360_v56 = vmul.f32 %v4808_v5, %v1357_v63 }
 0x860   : > { %v1385_v22 = vmul.f32 %v4810_v55, %v1370_v21  ;;  %v1368_v24 = vadd.f32 0.2548296, %v1365_v44  ;;  %v1363_v45 = vadd.f32 -0.28449672, %v1360_v56 }
 0x862   : > { %v1388_v27 = vsub.f32 1.0, %v1385_v22  ;;  %v1371_v28 = vmul.f32 %v4806_v51, %v1368_v24  ;;  %v1366_v32 = vmul.f32 %v4808_v5, %v1363_v45  ;;  %v1320_v51 = vmul.f32 0.5, %v5310_v25 }
 0x864   : > { %v1391_v34 = vmul.f32 %v1388_v27, %v1328_v43  ;;  %v1386_v36 = vmul.f32 %v4812_v30, %v1371_v28  ;;  %v1369_v37 = vadd.f32 0.2548296, %v1366_v32  ;;  %v3871_v28 = vld [vmem:[%s5974_s3 + $0x58] sm:$0xff]  ;;  %v3873_v30 = vld [vmem:[%s5974_s3 + $0x68] sm:$0xff]  ;;  %v3870_v32 = vld [vmem:[%s5974_s3 + $0x50] sm:$0xff] }
 0x865   : > { %v4613_v43 = vpack.c.bf16 %v3873_v30, %v3871_v28 }
 0x866   : > { %v1394_v39 = vadd.f32 1.0, %v1391_v34  ;;  %v1389_v40 = vsub.f32 1.0, %v1386_v36  ;;  %v1372_v41 = vmul.f32 %v4808_v5, %v1369_v37  ;;  %v3872_v34 = vld [vmem:[%s5974_s3 + $0x60] sm:$0xff]  ;;  %v3875_v37 = vld [vmem:[%s5974_s3 + $0x78] sm:$0xff] }
 0x867   : > { %v4615_v36 = vpack.c.bf16 %v3872_v34, %v3870_v32  ;;  %4614 = vmatprep.subr.bf16.mxu0 %v4613_v43 }
 0x868   : > { %v1397_v47 = vmul.f32 %v1394_v39, %v1319_v38  ;;  %v1392_v48 = vmul.f32 %v1389_v40, %v1329_v23  ;;  %v1387_v50 = vmul.f32 %v4814_v42, %v1372_v41  ;;  %v3877_v38 = vld [vmem:[%s5974_s3 + $0x88] sm:$0xff]  ;;  %v3874_v40 = vld [vmem:[%s5974_s3 + $0x70] sm:$0xff]  ;;  %v3876_v23 = vld [vmem:[%s5974_s3 + $0x80] sm:$0xff] }
 0x869   : > { %4616 = vmatpush1.bf16.msra.mxu0 %v4615_v36  ;;  %v4617_v39 = vpack.c.bf16 %v3877_v38, %v3875_v37  ;;  %v4619_v41 = vpack.c.bf16 %v3876_v23, %v3874_v40 }
 0x86a   : > { %v1395_v52 = vadd.f32 1.0, %v1392_v48  ;;  %4301 = vmatmul.mubr.msk.f32.vlgmr.msra.gmra.mrb[24].mxu1 %vm351_vm0, %v1397_v47  ;;  %v1390_v29 = vsub.f32 1.0, %v1387_v50 }
 0x86b   : > { %4303 = vmatprep.mubr.msk.f32.mxu1 %vm4929_vm4, %v4925_v26  ;;  %4618 = vmatprep.subr.bf16.mxu0 %v4617_v39 }
 0x86c   : > { %v1398_v58 = vmul.f32 %v1395_v52, %v1320_v51  ;;  %v1393_v60 = vmul.f32 %v1390_v29, %v1330_v57 }
 0x86d   : > { %4620 = vmatpush1.bf16.msra.mxu0 %v4619_v41 }
 0x86e   : > { %4304 = vmatmul.mubr.msk.f32.gmra.mrb[26].mxu1 %vm351_vm0, %v1398_v58  ;;  %v1396_v62 = vadd.f32 1.0, %v1393_v60  ;;  %4621 = vmatprep.subr.bf16.mxu0 %v4926_v46  ;;  %v5378_v58 = vsub.s32 2, %v5239_v49  ;;  %v5381_v60 = vsub.s32 3, %v5239_v49 }
 0x86f   : > { %4306 = vmatprep.mubr.msk.f32.mxu1 %vm4929_vm4, %v4925_v26 }
 0x870   : > { %v1399_v25 = vmul.f32 %v1396_v62, %v1321_v61  ;;  %v1547_v62 = vrot.slane %v5247_v54, %v5378_v58 }
 0x872   : > { %4307 = vmatmul.mubr.msk.f32.gmra.mrb[28].mxu1 %vm351_vm0, %v1399_v25 }
 0x873   : > { %4330 = vmatprep.mubr.msk.f32.mxu1 %vm4929_vm4, %v4925_v26 }
 0x93d   : > { %v1488_v0 = vpop.f32.mrb[24].mxu1 }
 0x93e   : > { %v1489_v1 = vadd.f32 %v3866_v35, %v1488_v0  ;;  %v4302_v2 = vpop.f32.mrb[25].mxu1 }
 0x940   : > { %v1502_v5 = vadd.f32 %v1489_v1, %v5256_v4 }
 0x941   : > { %v1493_v33 = vpop.f32.mrb[26].mxu1 }
 0x942   : > { %v1494_v6 = vadd.f32 %v3866_v35, %v1493_v33  ;;  %v4305_v7 = vpop.f32.mrb[27].mxu1  ;;  %v1505_v9 = vsel %vm474_vm3, %v1502_v5, 0.0 }
 0x943   : > { %1506 = vadd.xlane.f32.xlu0 %v1505_v9 }
 0x944   : > { %v1503_v10 = vadd.f32 %v1494_v6, %v5262_v8 }
 0x945   : > { %v1498_v12 = vpop.f32.mrb[28].mxu1 }
 0x946   : > { %v1508_v13 = vsel %vm474_vm3, %v1503_v10, 0.0  ;;  %v1499_v14 = vadd.f32 %v3866_v35, %v1498_v12  ;;  %v4308_v15 = vpop.f32.mrb[29].mxu1  ;;  %v1554_v35 = vrot.slane %v5247_v54, %v5381_v60 }
 0x947   : > { %1509 = vadd.xlane.f32.xlu1 %v1508_v13  ;;  %v3881_v15 = vld [vmem:[%s5974_s3 + $0x98] ss:$0 sm:$0xff] }
 0x948   : > { %v1504_v16 = vadd.f32 %v1499_v14, %v5268_v11  ;;  %v3880_v14 = vld [vmem:[%s5974_s3 + $0x90] ss:$0 sm:$0xff] }
 0x94a   : > { %v1511_v17 = vsel %vm1172_vm10, %v1504_v16, 0.0 }
 0x94b   : > { %1512 = vadd.xlane.f32.xlu0 %v1511_v17 }
 0x9d0   : > { %v1507_v4 = vpop.xlane.xlu0 %1506 }
 0x9d1   : > { %v1514_v18 = vmul.f32 0.03125, %v1507_v4 }
 0x9d3   : > { %v1517_v19 = vsub.f32 %v1502_v5, %v1514_v18 }
 0x9d4   : > { %v1510_v20 = vpop.xlane.xlu1 %1509 }
 0x9d5   : > { %v1515_v63 = vmul.f32 0.03125, %v1510_v20  ;;  %v1520_v21 = vmul.f32 %v1517_v19, %v1517_v19 }
 0x9d7   : > { %v1518_v44 = vsub.f32 %v1503_v10, %v1515_v63  ;;  %v1523_v8 = vsel %vm474_vm3, %v1520_v21, 0.0 }
 0x9d8   : > { %1524 = vadd.xlane.f32.xlu1 %v1523_v8  ;;  %v1513_v55 = vpop.xlane.xlu0 %1512 }
 0x9d9   : > { %v1521_v56 = vmul.f32 %v1518_v44, %v1518_v44  ;;  %v1516_v22 = vmul.f32 0.03125, %v1513_v55 }
 0x9db   : > { %v1526_v24 = vsel %vm474_vm3, %v1521_v56, 0.0  ;;  %v1519_v45 = vsub.f32 %v1504_v16, %v1516_v22 }
 0x9dc   : > { %1527 = vadd.xlane.f32.xlu0 %v1526_v24 }
 0x9dd   : > { %v1522_v11 = vmul.f32 %v1519_v45, %v1519_v45 }
 0x9df   : > { %v1529_v27 = vsel %vm1172_vm10, %v1522_v11, 0.0 }
 0x9e0   : > { %1530 = vadd.xlane.f32.xlu1 %v1529_v27 }
 0xa65   : > { %v1525_v42 = vpop.xlane.xlu1 %1524 }
 0xa66   : > { %v1532_v47 = vmul.f32 0.03125, %v1525_v42 }
 0xa68   : > { %v1535_v48 = vadd.f32 1e-05, %v1532_v47 }
 0xa69   : > { %v1528_v50 = vpop.xlane.xlu0 %1527 }
 0xa6a   : > { %4815 = vrsqrt.f32 %v1535_v48  ;;  %v1533_v51 = vmul.f32 0.03125, %v1528_v50 }
 0xa6c   : > { %v1536_v52 = vadd.f32 1e-05, %v1533_v51 }
 0xa6d   : > { %v1531_v29 = vpop.xlane.xlu1 %1530 }
 0xa6e   : > { %4817 = vrsqrt.f32 %v1536_v52  ;;  %v1534_v57 = vmul.f32 0.03125, %v1531_v29 }
 0xa70   : > { %v1537_v61 = vadd.f32 1e-05, %v1534_v57 }
 0xa72   : > { %4819 = vrsqrt.f32 %v1537_v61 }
 0xa74   : > { %v4816_v25 = vpop.eup %4815 }
 0xa75   : > { %v1541_v0 = vmul.f32 %v4816_v25, %v1517_v19 }
 0xa77   : > { %v1548_v1 = vmul.f32 %v1547_v62, %v1541_v0 }
 0xa78   : > { %v4818_v2 = vpop.eup %4817 }
 0xa79   : > { %v5387_v5 = vadd.f32 %v1554_v35, %v1548_v1  ;;  %v1542_v33 = vmul.f32 %v4818_v2, %v1518_v44 }
 0xa7b   : > { %3882 = vmatmul.mubr.msk.f32.vlgmr.msra.gmra.mrb[20].mxu0 %vm474_vm3, %v5387_v5  ;;  %v1549_v49 = vmul.f32 %v1547_v62, %v1542_v33 }
 0xa7c   : > { %1656 = vmatprep.mubr.f32.mxu0 %v4925_v26  ;;  %v4820_v6 = vpop.eup %4819 }
 0xa7d   : > { %v5392_v7 = vadd.f32 %v1554_v35, %v1549_v49  ;;  %v1543_v9 = vmul.f32 %v4820_v6, %v1519_v45 }
 0xa7f   : > { %3883 = vmatmul.mubr.msk.f32.gmra.mrb[22].mxu0 %vm474_vm3, %v5392_v7  ;;  %v1550_v54 = vmul.f32 %v1547_v62, %v1543_v9 }
 0xa80   : > { %1662 = vmatprep.mubr.f32.mxu0 %v4925_v26 }
 0xa81   : > { %v5397_v10 = vadd.f32 %v1554_v35, %v1550_v54 }
 0xa83   : > { %3884 = vmatmul.mubr.msk.f32.gmra.mrb[24].mxu0 %vm474_vm3, %v5397_v10 }
 0xa84   : > { %4315 = vmatprep.mubr.msk.f32.mxu0 %vm4929_vm4, %v4925_v26 }
 0xb4e   : > { %v1652_v12 = vpop.f32.mrb[20].mxu0 }
 0xb4f   : > { %v1654_v13 = vpop.f32.mrb[21].mxu0  ;;  %v1653_v17 = vadd.f32 %v3880_v14, %v1652_v12 }
 0xb50   : > { %v5409_v19 = vadd.f32 %v3881_v15, %v1654_v13 }
 0xb52   : > { %v1658_v16 = vpop.f32.mrb[22].mxu0 }
 0xb53   : > { %v1659_v4 = vadd.f32 %v3880_v14, %v1658_v16  ;;  %v1660_v18 = vpop.f32.mrb[23].mxu0 }
 0xb54   : > { %v5411_v20 = vadd.f32 %v3881_v15, %v1660_v18 }
 0xb55   : > { %v4743_v63 = vpack.i.bf16 %v1659_v4, %v1653_v17 }
 0xb56   : > { %v4753_v21 = vpack.i.bf16 %v5411_v20, %v5409_v19  ;;  %v4626_v44 = vpack.c.bf16 %v5411_v20, %v5409_v19  ;;  %v1664_v8 = vpop.f32.mrb[24].mxu0 }
 0xb57   : > { %4744 = vrot.lane.b32.xlu0 %v4743_v63, %s4928_s22  ;;  %v1665_v55 = vadd.f32 %v3880_v14, %v1664_v8  ;;  %v1666_v56 = vpop.f32.mrb[25].mxu0 }
 0xb58   : > { %4627 = vmatpush3.bf16.msra.mxu1 %v4626_v44  ;;  %v5419_v22 = vadd.f32 %v3881_v15, %v1666_v56 }
 0xb59   : > { %4328 = vmatprep.subr.mxu1 %v4925_v26  ;;  %1684 = vrot.lane.b32.xlu1 %v1665_v55, %s4928_s22 }
 0xb5b   : > { %1916 = vrot.lane.b32.xlu0 %v1665_v55, %s4927_s21 }
 0xb5c   : > { %4329 = vmatpush3.msk.msra.mxu1 %vm448_vm2, %v5419_v22 }
 0xb5d   : > { %4705 = vmatprep.subr.bf16.mxu1 %v4926_v46  ;;  %4749 = vrot.lane.b32.xlu1 %v4743_v63, %s4927_s21 }
 0xb5f   : > { %1908 = vrot.lane.b32.xlu0 %v1659_v4, %s4930_s23 }
 0xb61   : > { %1906 = vrot.lane.b32.xlu1 %v1653_v17, %s4930_s23 }
 0xb65   : > { %1910 = vrot.lane.b32.xlu1 %v1665_v55, %s4930_s23 }
 0xbc9   : > { %v4745_v24 = vpop.permute.xlu0 %4744 }
 0xbca   : > { %v4747_v45 = vunpack.i.h.bf16 %v4745_v24  ;;  %v4746_v11 = vunpack.i.l.bf16 %v4745_v24 }
 0xbcb   : > { %v1685_v28 = vpop.permute.xlu1 %1684 }
 0xbcc   : > { %v4622_v27 = vpack.c.bf16 %v4747_v45, %v4746_v11 }
 0xbcd   : > { %v1917_v36 = vpop.permute.xlu0 %1916 }
 0xbce   : > { %4624 = vmatpush3.bf16.xpose.msk.msra.mxu0 %vm5112_vm5, %v4622_v27 }
 0xbcf   : > { %4313 = vmatprep.subr.mxu0 %v4925_v26  ;;  %v4750_v30 = vpop.permute.xlu1 %4749 }
 0xbd0   : > { %v4752_v43 = vunpack.i.h.bf16 %v4750_v30  ;;  %v4751_v32 = vunpack.i.l.bf16 %v4750_v30 }
 0xbd1   : > { %v1909_v38 = vpop.permute.xlu0 %1908 }
 0xbd2   : > { %v4629_v34 = vpack.c.bf16 %v4752_v43, %v4751_v32 }
 0xbd3   : > { %v1907_v37 = vpop.permute.xlu1 %1906 }
 0xbd6   : > { %4314 = vmatpush3.xpose.msk.msra.mxu0 %vm474_vm3, %v1685_v28 }
 0xbd7   : > { %4628 = vmatprep.subr.bf16.mxu0 %v4926_v46  ;;  %v1911_v39 = vpop.permute.xlu1 %1910 }
 0xbd9   : > { %4316 = vmatmul.mubr.msk.f32.vlgmr.msra.gmra.mrb[26].mxu0 %vm474_vm3, %v1653_v17 }
 0xbda   : > { %4631 = vmatpush3.bf16.xpose.msk.msra.mxu0 %vm5112_vm5, %v4629_v34  ;;  %4318 = vmatprep.mubr.msk.f32.mxu0 %vm4929_vm4, %v4925_v26 }
 0xbdb   : > { %4343 = vmatprep.subr.mxu0 %v4925_v26 }
 0xbdd   : > { %4319 = vmatmul.mubr.msk.f32.gmra.mrb[28].mxu0 %vm474_vm3, %v1659_v4 }
 0xbde   : > { %4321 = vmatprep.mubr.msk.f32.mxu0 %vm4929_vm4, %v4925_v26 }
 0xbe1   : > { %4322 = vmatmul.mubr.msk.f32.gmra.mrb[30].mxu0 %vm474_vm3, %v1665_v55 }
 0xbe2   : > { %4344 = vmatpush3.xpose.msk.msra.mxu0 %vm474_vm3, %v1917_v36  ;;  %4345 = vmatprep.mubr.msk.f32.mxu0 %vm4929_vm4, %v4925_v26 }
 0xbe3   : > { %4632 = vmatprep.subr.bf16.mxu0 %v4926_v46 }
 0xbe5   : > { %4346 = vmatmul.mubr.msk.f32.vlgmr.msra.gmra.mrb[32].mxu0 %vm474_vm3, %v1907_v37 }
 0xbe6   : > { %4348 = vmatprep.mubr.msk.f32.mxu0 %vm4929_vm4, %v4925_v26 }
 0xbe9   : > { %4349 = vmatmul.mubr.msk.f32.gmra.mrb[34].mxu0 %vm474_vm3, %v1909_v38 }
 0xbea   : > { %4351 = vmatprep.mubr.msk.f32.mxu0 %vm4929_vm4, %v4925_v26 }
 0xbed   : > { %4352 = vmatmul.mubr.msk.f32.gmra.mrb[36].mxu0 %vm474_vm3, %v1911_v39 }
 0xbee   : > { %4360 = vmatprep.mubr.msk.f32.mxu0 %vm4929_vm4, %v4925_v26 }
 0xcac   : > { %v1764_v40 = vpop.f32.mrb[26].mxu0 }
 0xcad   : > { %v1778_v23 = vmul.f32 0.25, %v1764_v40  ;;  %v4317_v41 = vpop.f32.mrb[27].mxu0 }
 0xcaf   : > { %v1781_v42 = vsel %vm675_vm6, %v1778_v23, -inf }
 0xcb0   : > { %1782 = vmax.xlane.f32.xlu0 %v1781_v42  ;;  %v1769_v47 = vpop.f32.mrb[28].mxu0 }
 0xcb1   : > { %v1779_v48 = vmul.f32 0.25, %v1769_v47  ;;  %v4320_v50 = vpop.f32.mrb[29].mxu0 }
 0xcb2   : > { %v3889_v50 = vld [vmem:[%s5976_s5 + $0x20] sm:$0xff] }
 0xcb3   : > { %v1784_v51 = vsel %vm675_vm6, %v1779_v48, -inf }
 0xcb4   : > { %1785 = vmax.xlane.f32.xlu1 %v1784_v51  ;;  %v1774_v52 = vpop.f32.mrb[30].mxu0  ;;  %v3890_v51 = vld [vmem:[%s5976_s5 + $0x28] sm:$0x1] }
 0xcb5   : > { %v1780_v29 = vmul.f32 0.25, %v1774_v52  ;;  %v4323_v57 = vpop.f32.mrb[31].mxu0 }
 0xcb7   : > { %v1787_v61 = vsel %vm682_vm7, %v1780_v29, -inf }
 0xcb8   : > { %1788 = vmax.xlane.f32.xlu0 %v1787_v61  ;;  %v1996_v62 = vpop.f32.mrb[32].mxu0 }
 0xcb9   : > { %v2010_v25 = vmul.f32 0.25, %v1996_v62  ;;  %v4347_v35 = vpop.f32.mrb[33].mxu0 }
 0xcbb   : > { %v2013_v0 = vsel %vm675_vm6, %v2010_v25, -inf }
 0xcbc   : > { %2014 = vmax.xlane.f32.xlu0 %v2013_v0  ;;  %v2001_v1 = vpop.f32.mrb[34].mxu0 }
 0xcbd   : > { %v2011_v2 = vmul.f32 0.25, %v2001_v1  ;;  %v4350_v33 = vpop.f32.mrb[35].mxu0 }
 0xcbf   : > { %v2016_v49 = vsel %vm675_vm6, %v2011_v2, -inf }
 0xcc0   : > { %2017 = vmax.xlane.f32.xlu1 %v2016_v49  ;;  %v2006_v6 = vpop.f32.mrb[36].mxu0 }
 0xcc1   : > { %v2012_v9 = vmul.f32 0.25, %v2006_v6  ;;  %v4353_v54 = vpop.f32.mrb[37].mxu0 }
 0xcc3   : > { %v2019_v12 = vsel %vm682_vm7, %v2012_v9, -inf }
 0xcc4   : > { %2020 = vmax.xlane.f32.xlu0 %v2019_v12 }
 0xd3d   : > { %v1783_v13 = vpop.xlane.xlu0 %1782 }
 0xd3e   : > { %v1790_v14 = vsub.f32 %v1778_v23, %v1783_v13 }
 0xd40   : > { %v1793_v15 = vmul.f32 1.442695, %v1790_v14 }
 0xd41   : > { %v1786_v16 = vpop.xlane.xlu1 %1785 }
 0xd42   : > { %4821 = vpow2.f32 %v1793_v15  ;;  %v1791_v17 = vsub.f32 %v1779_v48, %v1786_v16  ;;  %v3888_v48 = vld [vmem:[%s5976_s5 + $0x18] sm:$0xff] }
 0xd44   : > { %v1795_v4 = vmul.f32 1.442695, %v1791_v17 }
 0xd45   : > { %v1789_v18 = vpop.xlane.xlu0 %1788 }
 0xd46   : > { %4823 = vpow2.f32 %v1795_v4  ;;  %v1792_v63 = vsub.f32 %v1780_v29, %v1789_v18 }
 0xd48   : > { %v1797_v44 = vmul.f32 1.442695, %v1792_v63 }
 0xd49   : > { %v2015_v8 = vpop.xlane.xlu0 %2014 }
 0xd4a   : > { %4825 = vpow2.f32 %v1797_v44  ;;  %v2022_v55 = vsub.f32 %v2010_v25, %v2015_v8 }
 0xd4c   : > { %v4822_v56 = vpop.eup %4821  ;;  %v2025_v24 = vmul.f32 1.442695, %v2022_v55 }
 0xd4d   : > { %v2018_v45 = vpop.xlane.xlu1 %2017  ;;  %v1799_v11 = vsel %vm675_vm6, %v4822_v56, 0.0 }
 0xd4e   : > { %4827 = vpow2.f32 %v2025_v24  ;;  %v2023_v27 = vsub.f32 %v2011_v2, %v2018_v45  ;;  %1800 = vadd.xlane.f32.xlu1 %v1799_v11 }
 0xd50   : > { %v4824_v28 = vpop.eup %4823  ;;  %v2027_v30 = vmul.f32 1.442695, %v2023_v27 }
 0xd51   : > { %v2021_v43 = vpop.xlane.xlu0 %2020  ;;  %v1802_v32 = vsel %vm675_vm6, %v4824_v28, 0.0 }
 0xd52   : > { %4829 = vpow2.f32 %v2027_v30  ;;  %v2024_v34 = vsub.f32 %v2012_v9, %v2021_v43  ;;  %1803 = vadd.xlane.f32.xlu0 %v1802_v32 }
 0xd54   : > { %v4826_v36 = vpop.eup %4825  ;;  %v2029_v37 = vmul.f32 1.442695, %v2024_v34 }
 0xd55   : > { %v1805_v38 = vsel %vm682_vm7, %v4826_v36, 0.0 }
 0xd56   : > { %4831 = vpow2.f32 %v2029_v37  ;;  %1806 = vadd.xlane.f32.xlu1 %v1805_v38  ;;  %v3885_v38 = vld [vmem:[%s5975_s4 + $0x18] sm:$0xff] }
 0xd58   : > { %v4828_v39 = vpop.eup %4827 }
 0xd59   : > { %v2031_v40 = vsel %vm675_vm6, %v4828_v39, 0.0 }
 0xd5a   : > { %2032 = vadd.xlane.f32.xlu0 %v2031_v40  ;;  %v3887_v40 = vld [vmem:[%s5975_s4 + $0x28] sm:$0x1] }
 0xd5c   : > { %v4830_v23 = vpop.eup %4829 }
 0xd5d   : > { %v2034_v41 = vsel %vm675_vm6, %v4830_v23, 0.0 }
 0xd5e   : > { %2035 = vadd.xlane.f32.xlu1 %v2034_v41 }
 0xd60   : > { %v4832_v42 = vpop.eup %4831 }
 0xd61   : > { %v2037_v47 = vsel %vm682_vm7, %v4832_v42, 0.0 }
 0xd62   : > { %2038 = vadd.xlane.f32.xlu0 %v2037_v47 }
 0xd6f   : > { %4754 = vrot.lane.b32.xlu1 %v4753_v21, %s4930_s23 }
 0xd73   : > { %2160 = vperm.xlu1 %4741, %v3888_v48  }
 0xd77   : > { %2165 = vperm.xlu1 %4741, %v3889_v50  }
 0xd78   : > { %2052 = vrot.lane.b32.xlu0 %v5419_v22, %s4930_s23 }
 0xd7c   : > { %2170 = vperm.xlu0 %4742, %v3890_v51  }
 0xddb   : > { %v1801_v19 = vpop.xlane.xlu1 %1800 }
 0xddc   : > { %4833 = vrcp.f32 %v1801_v19 }
 0xddf   : > { %v1804_v20 = vpop.xlane.xlu0 %1803 }
 0xde0   : > { %4835 = vrcp.f32 %v1804_v20 }
 0xde3   : > { %v1807_v21 = vpop.xlane.xlu1 %1806 }
 0xde4   : > { %4837 = vrcp.f32 %v1807_v21 }
 0xde6   : > { %v4834_v52 = vpop.eup %4833 }
 0xde7   : > { %v1811_v29 = vmul.f32 %v4834_v52, %v4822_v56  ;;  %v2033_v57 = vpop.xlane.xlu0 %2032 }
 0xde8   : > { %4839 = vrcp.f32 %v2033_v57 }
 0xde9   : > { %4331 = vmatmul.mubr.msk.f32.vlgmr.msra.gmra.mrb[30].mxu1 %vm675_vm6, %v1811_v29 }
 0xdea   : > { %v4836_v61 = vpop.eup %4835  ;;  %4333 = vmatprep.mubr.msk.f32.mxu1 %vm4929_vm4, %v4925_v26 }
 0xdeb   : > { %v2036_v22 = vpop.xlane.xlu1 %2035  ;;  %v1812_v62 = vmul.f32 %v4836_v61, %v4824_v28 }
 0xdec   : > { %4841 = vrcp.f32 %v2036_v22 }
 0xded   : > { %4334 = vmatmul.mubr.msk.f32.gmra.mrb[32].mxu1 %vm675_vm6, %v1812_v62 }
 0xdee   : > { %v4838_v25 = vpop.eup %4837  ;;  %4336 = vmatprep.mubr.msk.f32.mxu1 %vm4929_vm4, %v4925_v26 }
 0xdef   : > { %v4755_v35 = vpop.permute.xlu1 %4754  ;;  %v2039_v0 = vpop.xlane.xlu0 %2038  ;;  %v1813_v1 = vmul.f32 %v4838_v25, %v4826_v36 }
 0xdf0   : > { %v4757_v2 = vunpack.i.h.bf16 %v4755_v35  ;;  %v4756_v33 = vunpack.i.l.bf16 %v4755_v35  ;;  %4843 = vrcp.f32 %v2039_v0 }
 0xdf1   : > { %4337 = vmatmul.mubr.msk.f32.gmra.mrb[34].mxu1 %vm675_vm6, %v1813_v1 }
 0xdf2   : > { %v4633_v49 = vpack.c.bf16 %v4757_v2, %v4756_v33  ;;  %4363 = vmatprep.mubr.msk.f32.mxu1 %vm4929_vm4, %v4925_v26  ;;  %v4840_v6 = vpop.eup %4839 }
 0xdf3   : > { %v2043_v54 = vmul.f32 %v4840_v6, %v4828_v39  ;;  %v2053_v13 = vpop.permute.xlu0 %2052  ;;  %v3886_v39 = vld [vmem:[%s5975_s4 + $0x20] sm:$0xff] }
 0xdf4   : > { %4634 = vmatpush3.bf16.msra.mxu0 %v4633_v49  ;;  %4707 = vmatpush3.bf16.msra.mxu1 %v4633_v49 }
 0xdf5   : > { %4358 = vmatprep.subr.mxu0 %v4925_v26  ;;  %4706 = vmatprep.subr.mxu1 %v4925_v26 }
 0xdf6   : > { %v4842_v9 = vpop.eup %4841 }
 0xdf7   : > { %v2044_v12 = vmul.f32 %v4842_v9, %v4830_v23  ;;  %v2161_v23 = vpop.permute.xlu1 %2160 }
 0xdf8   : > { %4359 = vmatpush3.msk.msra.mxu0 %vm448_vm2, %v2053_v13  ;;  %4708 = vmatpush3.msk.msra.mxu1 %vm448_vm2, %v2053_v13 }
 0xdf9   : > { %4361 = vmatmul.mubr.msk.f32.vlgmr.msra.gmra.mrb[38].mxu0 %vm675_vm6, %v2043_v54  ;;  %4364 = vmatmul.mubr.msk.f32.vlgmr.msra.gmra.mrb[36].mxu1 %vm675_vm6, %v2044_v12 }
 0xdfa   : > { %v4844_v14 = vpop.eup %4843  ;;  %4366 = vmatprep.mubr.msk.f32.mxu1 %vm4929_vm4, %v4925_v26  ;;  %4635 = vmatprep.subr.bf16.mxu0 %v4926_v46 }
 0xdfb   : > { %v2045_v15 = vmul.f32 %v4844_v14, %v4832_v42  ;;  %4379 = vmatprep.mubr.msk.f32.mxu0 %vm4929_vm4, %v4925_v26  ;;  %4641 = vmatprep.subr.bf16.mxu1 %v4926_v46  ;;  %v2166_v50 = vpop.permute.xlu1 %2165  ;;  %v2171_v29 = vpop.permute.xlu0 %2170 }
 0xdfd   : > { %4367 = vmatmul.mubr.msk.f32.gmra.mrb[38].mxu1 %vm675_vm6, %v2045_v15 }
 0xdfe   : > { %4396 = vmatprep.mubr.msk.f32.mxu1 %vm4929_vm4, %v4925_v26 }
 0xebc   : > { %v1892_v16 = vpop.f32.mrb[30].mxu1 }
 0xebd   : > { %v4332_v17 = vpop.f32.mrb[31].mxu1 }
 0xebe   : > { %v3917_v17 = vld [vmem:[%s5978_s7 + $0x30] sm:$0xff] }
 0xec0   : > { %v1897_v4 = vpop.f32.mrb[32].mxu1 }
 0xec1   : > { %v4636_v18 = vpack.c.bf16 %v1897_v4, %v1892_v16  ;;  %v4335_v63 = vpop.f32.mrb[33].mxu1  ;;  %v3916_v16 = vld [vmem:[%s5978_s7 + $0x28] sm:$0xff] }
 0xec2   : > { %v4642_v4 = vpack.c.bf16 %v3917_v17, %v3916_v16  ;;  %v3919_v63 = vld [vmem:[%s5978_s7 + $0x40] sm:$0xff] }
 0xec3   : > { %4637 = vmatpush3.bf16.msra.mxu0 %v4636_v18  ;;  %v3918_v18 = vld [vmem:[%s5978_s7 + $0x38] sm:$0xff] }
 0xec4   : > { %v1902_v44 = vpop.f32.mrb[34].mxu1  ;;  %4638 = vmatprep.subr.bf16.mxu0 %v4926_v46  ;;  %4643 = vmatpush3.bf16.msra.mxu1 %v4642_v4 }
 0xec5   : > { %v4338_v8 = vpop.f32.mrb[35].mxu1  ;;  %4644 = vmatprep.subr.bf16.mxu1 %v4926_v46 }
 0xecc   : > { %v2133_v55 = vpop.f32.mrb[38].mxu0  ;;  %v2138_v56 = vpop.f32.mrb[36].mxu1 }
 0xecd   : > { %v2150_v24 = vrot.slane %v2133_v55, 7  ;;  %v2151_v45 = vrot.slane %v2138_v56, 7  ;;  %v4362_v11 = vpop.f32.mrb[39].mxu0  ;;  %v4365_v27 = vpop.f32.mrb[37].mxu1 }
 0xecf   : > { %v2157_v28 = vsel %vm448_vm2, %v1902_v44, %v2150_v24  ;;  %v2152_v30 = vsel %vm448_vm2, %v2150_v24, %v2151_v45  ;;  %v4645_v44 = vpack.c.bf16 %v3919_v63, %v3918_v18 }
 0xed0   : > { %v4639_v43 = vpack.c.bf16 %v2152_v30, %v2157_v28  ;;  %v2143_v32 = vpop.f32.mrb[38].mxu1  ;;  %v5559_v30 = vld [vmem:[%s5977_s6 + $0x4] sm:$0xf] }
 0xed1   : > { %v2153_v34 = vrot.slane %v2143_v32, 7  ;;  %v4368_v36 = vpop.f32.mrb[39].mxu1  ;;  %4646 = vmatpush3.bf16.msra.mxu1 %v4645_v44  ;;  %v2311_v32 = vrot.slane %v5559_v30, %v5242_v53 }
 0xed2   : > { %4640 = vmatpush3.bf16.msra.mxu0 %v4639_v43  ;;  %v2318_v36 = vrot.slane %v5559_v30, %v5250_v59 }
 0xed3   : > { %v2154_v37 = vsel %vm448_vm2, %v2151_v45, %v2153_v34  ;;  %4377 = vmatprep.subr.mxu0 %v4925_v26 }
 0xed6   : > { %4378 = vmatpush3.msk.msra.mxu0 %vm1079_vm8, %v2154_v37 }
 0xed7   : > { %4380 = vmatmul.mubr.msk.f32.vlgmr.msra.gmra.mrb[40].mxu0 %vm1069_vm9, %v3885_v38  ;;  %4647 = vmatprep.subr.bf16.mxu0 %v4926_v46 }
 0xed8   : > { %4382 = vmatprep.mubr.msk.f32.mxu0 %vm4929_vm4, %v4925_v26 }
 0xedb   : > { %4383 = vmatmul.mubr.msk.f32.gmra.mrb[42].mxu0 %vm1069_vm9, %v3886_v39 }
 0xedc   : > { %4385 = vmatprep.mubr.msk.f32.mxu0 %vm4929_vm4, %v4925_v26 }
 0xedf   : > { %4386 = vmatmul.mubr.msk.f32.gmra.mrb[44].mxu0 %vm1069_vm9, %v3887_v40 }
 0xee0   : > { %4421 = vmatprep.mubr.msk.f32.mxu0 %vm4929_vm4, %v4925_v26 }
 0xfaa   : > { %v2250_v41 = vpop.f32.mrb[40].mxu0 }
 0xfab   : > { %v2251_v42 = vadd.f32 %v2250_v41, %v2161_v23  ;;  %v4381_v47 = vpop.f32.mrb[41].mxu0 }
 0xfad   : > { %v2266_v48 = vadd.f32 %v2251_v42, %v5387_v5 }
 0xfae   : > { %v2255_v51 = vpop.f32.mrb[42].mxu0 }
 0xfaf   : > { %v2256_v19 = vadd.f32 %v2255_v51, %v2166_v50  ;;  %v4384_v20 = vpop.f32.mrb[43].mxu0  ;;  %v2269_v21 = vsel %vm474_vm3, %v2266_v48, 0.0 }
 0xfb0   : > { %2270 = vadd.xlane.f32.xlu1 %v2269_v21  ;;  %v3926_v20 = vld [vmem:[%s5979_s8 + $0x50] sm:$0xff] }
 0xfb1   : > { %v2267_v52 = vadd.f32 %v2256_v19, %v5392_v7  ;;  %v3925_v19 = vld [vmem:[%s5979_s8 + $0x48] sm:$0xff] }
 0xfb2   : > { %v2260_v57 = vpop.f32.mrb[44].mxu0  ;;  %v4648_v21 = vpack.c.bf16 %v3926_v20, %v3925_v19 }
 0xfb3   : > { %v2261_v61 = vadd.f32 %v2260_v57, %v2171_v29  ;;  %v2272_v22 = vsel %vm474_vm3, %v2267_v52, 0.0  ;;  %v4387_v62 = vpop.f32.mrb[45].mxu0  ;;  %v3928_v29 = vld [vmem:[%s5979_s8 + $0x60] sm:$0xff] }
 0xfb4   : > { %2273 = vadd.xlane.f32.xlu0 %v2272_v22  ;;  %4649 = vmatpush3.bf16.msra.mxu0 %v4648_v21  ;;  %v3930_v22 = vld [vmem:[%s5979_s8 + $0x70] sm:$0xff] }
 0xfb5   : > { %v2268_v25 = vadd.f32 %v2261_v61, %v5397_v10  ;;  %4650 = vmatprep.subr.bf16.mxu0 %v4926_v46  ;;  %v3929_v61 = vld [vmem:[%s5979_s8 + $0x68] sm:$0xff] }
 0xfb6   : > { %v4654_v62 = vpack.c.bf16 %v3930_v22, %v3929_v61 }
 0xfb7   : > { %v2275_v5 = vsel %vm1172_vm10, %v2268_v25, 0.0 }
 0xfb8   : > { %2276 = vadd.xlane.f32.xlu0 %v2275_v5  ;;  %v3932_v5 = vld [vmem:[%s5979_s8 + $0x80] sm:$0xff] }
0x103d   : > { %v2271_v35 = vpop.xlane.xlu1 %2270 }
0x103e   : > { %v2278_v0 = vmul.f32 0.03125, %v2271_v35 }
0x1040   : > { %v2281_v1 = vsub.f32 %v2266_v48, %v2278_v0  ;;  %v3921_v0 = vld [vmem:[%s5978_s7 + $0x48] ss:$0 sm:$0xff] }
0x1041   : > { %v2274_v2 = vpop.xlane.xlu0 %2273 }
0x1042   : > { %v2279_v33 = vmul.f32 0.03125, %v2274_v2  ;;  %v2284_v49 = vmul.f32 %v2281_v1, %v2281_v1 }
0x1044   : > { %v2282_v6 = vsub.f32 %v2267_v52, %v2279_v33  ;;  %v2287_v7 = vsel %vm474_vm3, %v2284_v49, 0.0  ;;  %v3927_v52 = vld [vmem:[%s5979_s8 + $0x58] sm:$0xff] }
0x1045   : > { %2288 = vadd.xlane.f32.xlu1 %v2287_v7  ;;  %v2277_v9 = vpop.xlane.xlu0 %2276  ;;  %v4651_v57 = vpack.c.bf16 %v3928_v29, %v3927_v52 }
0x1046   : > { %v2280_v54 = vmul.f32 0.03125, %v2277_v9  ;;  %v2285_v12 = vmul.f32 %v2282_v6, %v2282_v6 }
0x1047   : > { %4652 = vmatpush3.bf16.msra.mxu0 %v4651_v57 }
0x1048   : > { %v2283_v13 = vsub.f32 %v2268_v25, %v2280_v54  ;;  %v2290_v14 = vsel %vm474_vm3, %v2285_v12, 0.0  ;;  %4653 = vmatprep.subr.bf16.mxu0 %v4926_v46  ;;  %v3931_v25 = vld [vmem:[%s5979_s8 + $0x78] sm:$0xff] }
0x1049   : > { %2291 = vadd.xlane.f32.xlu0 %v2290_v14  ;;  %v4657_v35 = vpack.c.bf16 %v3932_v5, %v3931_v25 }
0x104a   : > { %v2286_v10 = vmul.f32 %v2283_v13, %v2283_v13 }
0x104b   : > { %4655 = vmatpush3.bf16.msra.mxu0 %v4654_v62 }
0x104c   : > { %v2293_v15 = vsel %vm1172_vm10, %v2286_v10, 0.0  ;;  %4656 = vmatprep.subr.bf16.mxu0 %v4926_v46 }
0x104d   : > { %2294 = vadd.xlane.f32.xlu1 %v2293_v15 }
0x104f   : > { %4658 = vmatpush3.bf16.msra.mxu0 %v4657_v35 }
0x1050   : > { %4671 = vmatprep.subr.bf16.mxu0 %v4926_v46 }
0x10d2   : > { %v2289_v8 = vpop.xlane.xlu1 %2288 }
0x10d3   : > { %v2296_v55 = vmul.f32 0.03125, %v2289_v8 }
0x10d5   : > { %v2299_v56 = vadd.f32 1e-05, %v2296_v55 }
0x10d6   : > { %v2292_v24 = vpop.xlane.xlu0 %2291 }
0x10d7   : > { %4845 = vrsqrt.f32 %v2299_v56  ;;  %v2297_v45 = vmul.f32 0.03125, %v2292_v24 }
0x10d9   : > { %v2300_v11 = vadd.f32 1e-05, %v2297_v45 }
0x10da   : > { %v2295_v27 = vpop.xlane.xlu1 %2294 }
0x10db   : > { %4847 = vrsqrt.f32 %v2300_v11  ;;  %v2298_v28 = vmul.f32 0.03125, %v2295_v27 }
0x10dd   : > { %v2301_v43 = vadd.f32 1e-05, %v2298_v28 }
0x10df   : > { %4849 = vrsqrt.f32 %v2301_v43 }
0x10e1   : > { %v4846_v34 = vpop.eup %4845 }
0x10e2   : > { %v2305_v37 = vmul.f32 %v4846_v34, %v2281_v1 }
0x10e4   : > { %v2312_v38 = vmul.f32 %v2311_v32, %v2305_v37 }
0x10e5   : > { %v4848_v39 = vpop.eup %4847 }
0x10e6   : > { %v5565_v40 = vadd.f32 %v2318_v36, %v2312_v38  ;;  %v2306_v23 = vmul.f32 %v4848_v39, %v2282_v6 }
0x10e8   : > { %4397 = vmatmul.mubr.msk.f32.vlgmr.msra.gmra.mrb[40].mxu1 %vm474_vm3, %v5565_v40  ;;  %v2313_v41 = vmul.f32 %v2311_v32, %v2306_v23 }
0x10e9   : > { %v4850_v42 = vpop.eup %4849  ;;  %4399 = vmatprep.mubr.msk.f32.mxu1 %vm4929_vm4, %v4925_v26 }
0x10ea   : > { %v5571_v47 = vadd.f32 %v2318_v36, %v2313_v41  ;;  %v2307_v48 = vmul.f32 %v4850_v42, %v2283_v13 }
0x10ec   : > { %4400 = vmatmul.mubr.msk.f32.gmra.mrb[42].mxu1 %vm474_vm3, %v5571_v47  ;;  %v2314_v50 = vmul.f32 %v2311_v32, %v2307_v48 }
0x10ed   : > { %4402 = vmatprep.mubr.msk.f32.mxu1 %vm4929_vm4, %v4925_v26 }
0x10ee   : > { %v5577_v51 = vadd.f32 %v2318_v36, %v2314_v50 }
0x10f0   : > { %4403 = vmatmul.mubr.msk.f32.gmra.mrb[44].mxu1 %vm474_vm3, %v5577_v51 }
0x10f1   : > { %2753 = vmatprep.mubr.f32.mxu1 %v4925_v26 }
0x11bb   : > { %v2407_v1 = vpop.f32.mrb[40].mxu1 }
0x11bc   : > { %v5613_v2 = vadd.f32 %v3921_v0, %v2407_v1  ;;  %v4398_v33 = vpop.f32.mrb[41].mxu1 }
0x11be   : > { %v5616_v49 = vmul.f32 0.70710677, %v5613_v2 }
0x11bf   : > { %v2412_v6 = vpop.f32.mrb[42].mxu1 }
0x11c0   : > { %v2433_v7 = vand.u32 2147483647, %v5616_v49  ;;  %v5619_v9 = vadd.f32 %v3921_v0, %v2412_v6  ;;  %v4401_v54 = vpop.f32.mrb[43].mxu1  ;;  %vm2427_vm14 = vcmp.ge.f32.partialorder %v5616_v49, 0.0 }
0x11c2   : > { %v2436_v12 = vmul.f32 0.3275911, %v2433_v7  ;;  %v5622_v13 = vmul.f32 0.70710677, %v5619_v9  ;;  %v2475_v55 = vsub.f32 0.0, %v2433_v7 }
0x11c3   : > { %v2417_v14 = vpop.f32.mrb[44].mxu1 }
0x11c4   : > { %v2439_v10 = vadd.f32 1.0, %v2436_v12  ;;  %v2434_v15 = vand.u32 2147483647, %v5622_v13  ;;  %v4404_v16 = vpop.f32.mrb[45].mxu1  ;;  %v5625_v17 = vadd.f32 %v3921_v0, %v2417_v14  ;;  %v2478_v45 = vmul.f32 %v2475_v55, %v2433_v7 }
0x11c5   : > { %v2430_v16 = vsel %vm2427_vm14, 1.0, %v4932_v31  ;;  %vm2428_vm15 = vcmp.ge.f32.partialorder %v5622_v13, 0.0  ;;  %v2421_v55 = vmul.f32 0.5, %v5613_v2 }
0x11c6   : > { %4851 = vrcp.f32 %v2439_v10  ;;  %v2437_v4 = vmul.f32 0.3275911, %v2434_v15  ;;  %v5628_v18 = vmul.f32 0.70710677, %v5625_v17  ;;  %v2476_v11 = vsub.f32 0.0, %v2434_v15 }
0x11c7   : > { %v2481_v32 = vmul.f32 1.442695, %v2478_v45  ;;  %v2431_v49 = vsel %vm2428_vm15, 1.0, %v4932_v31 }
0x11c8   : > { %v2440_v63 = vadd.f32 1.0, %v2437_v4  ;;  %v2435_v44 = vand.u32 2147483647, %v5628_v18  ;;  %v2479_v34 = vmul.f32 %v2476_v11, %v2434_v15  ;;  %vm2429_vm1 = vcmp.ge.f32.partialorder %v5628_v18, 0.0  ;;  %v3934_v18 = vld [vmem:[%s5979_s8 + $0x88] ss:$0 sm:$0xff] }
0x11ca   : > { %4853 = vrcp.f32 %v2440_v63  ;;  %v2438_v8 = vmul.f32 0.3275911, %v2435_v44  ;;  %v2477_v38 = vsub.f32 0.0, %v2435_v44  ;;  %v2483_v41 = vmul.f32 1.442695, %v2479_v34 }
0x11cc   : > { %v2441_v56 = vadd.f32 1.0, %v2438_v8  ;;  %v2480_v19 = vmul.f32 %v2477_v38, %v2435_v44  ;;  %v2423_v38 = vmul.f32 0.5, %v5625_v17 }
0x11ce   : > { %4855 = vrcp.f32 %v2441_v56  ;;  %v2485_v22 = vmul.f32 1.442695, %v2480_v19 }
0x11cf   : > { %4857 = vpow2.f32 %v2481_v32  ;;  %v2422_v32 = vmul.f32 0.5, %v5619_v9 }
0x11d0   : > { %v4852_v24 = vpop.eup %4851  ;;  %4859 = vpow2.f32 %v2483_v41 }
0x11d1   : > { %v2448_v27 = vmul.f32 1.0614054, %v4852_v24  ;;  %4861 = vpow2.f32 %v2485_v22 }
0x11d3   : > { %v2451_v28 = vadd.f32 -1.4531521, %v2448_v27 }
0x11d4   : > { %v4854_v43 = vpop.eup %4853 }
0x11d5   : > { %v2454_v36 = vmul.f32 %v4852_v24, %v2451_v28  ;;  %v2449_v37 = vmul.f32 1.0614054, %v4854_v43 }
0x11d7   : > { %v2457_v39 = vadd.f32 1.4214138, %v2454_v36  ;;  %v2452_v23 = vadd.f32 -1.4531521, %v2449_v37  ;;  %v2432_v36 = vsel %vm2429_vm1, 1.0, %v4932_v31 }
0x11d8   : > { %v4856_v42 = vpop.eup %4855 }
0x11d9   : > { %v2460_v48 = vmul.f32 %v4852_v24, %v2457_v39  ;;  %v2455_v50 = vmul.f32 %v4854_v43, %v2452_v23  ;;  %v2450_v20 = vmul.f32 1.0614054, %v4856_v42  ;;  %v4858_v33 = vpop.eup %4857 }
0x11da   : > { %v4860_v15 = vpop.eup %4859 }
0x11db   : > { %v2463_v21 = vadd.f32 -0.28449672, %v2460_v48  ;;  %v2458_v52 = vadd.f32 1.4214138, %v2455_v50  ;;  %v2453_v29 = vadd.f32 -1.4531521, %v2450_v20  ;;  %v4862_v11 = vpop.eup %4861 }
0x11dd   : > { %v2466_v57 = vmul.f32 %v4852_v24, %v2463_v21  ;;  %v2461_v61 = vmul.f32 %v4854_v43, %v2458_v52  ;;  %v2456_v62 = vmul.f32 %v4856_v42, %v2453_v29 }
0x11df   : > { %v2469_v25 = vadd.f32 0.2548296, %v2466_v57  ;;  %v2464_v5 = vadd.f32 -0.28449672, %v2461_v61  ;;  %v2459_v35 = vadd.f32 1.4214138, %v2456_v62 }
0x11e1   : > { %v2472_v0 = vmul.f32 %v4852_v24, %v2469_v25  ;;  %v2467_v1 = vmul.f32 %v4854_v43, %v2464_v5  ;;  %v2462_v6 = vmul.f32 %v4856_v42, %v2459_v35 }
0x11e3   : > { %v2487_v7 = vmul.f32 %v4858_v33, %v2472_v0  ;;  %v2470_v54 = vadd.f32 0.2548296, %v2467_v1  ;;  %v2465_v12 = vadd.f32 -0.28449672, %v2462_v6 }
0x11e5   : > { %v2490_v14 = vsub.f32 1.0, %v2487_v7  ;;  %v2473_v10 = vmul.f32 %v4854_v43, %v2470_v54  ;;  %v2468_v4 = vmul.f32 %v4856_v42, %v2465_v12 }
0x11e7   : > { %v2493_v63 = vmul.f32 %v2490_v14, %v2430_v16  ;;  %v2488_v44 = vmul.f32 %v4860_v15, %v2473_v10  ;;  %v2471_v8 = vadd.f32 0.2548296, %v2468_v4  ;;  %v3939_v15 = vld [vmem:[%s5974_s3 + $0xa8] sm:$0xff]  ;;  %v3941_v16 = vld [vmem:[%s5974_s3 + $0xb8] sm:$0xff] }
0x11e8   : > { %v4659_v4 = vpack.c.bf16 %v3941_v16, %v3939_v15 }
0x11e9   : > { %v2496_v56 = vadd.f32 1.0, %v2493_v63  ;;  %v2491_v24 = vsub.f32 1.0, %v2488_v44  ;;  %v2474_v45 = vmul.f32 %v4856_v42, %v2471_v8  ;;  %v3938_v63 = vld [vmem:[%s5974_s3 + $0xa0] sm:$0xff]  ;;  %v3940_v44 = vld [vmem:[%s5974_s3 + $0xb0] sm:$0xff] }
0x11ea   : > { %v4661_v8 = vpack.c.bf16 %v3940_v44, %v3938_v63  ;;  %4660 = vmatprep.subr.bf16.mxu1 %v4659_v4 }
0x11eb   : > { %v2499_v27 = vmul.f32 %v2496_v56, %v2421_v55  ;;  %v2494_v28 = vmul.f32 %v2491_v24, %v2431_v49  ;;  %v2489_v43 = vmul.f32 %v4862_v11, %v2474_v45  ;;  %v3943_v55 = vld [vmem:[%s5974_s3 + $0xc8] sm:$0xff]  ;;  %v3945_v56 = vld [vmem:[%s5974_s3 + $0xd8] sm:$0xff]  ;;  %v3942_v49 = vld [vmem:[%s5974_s3 + $0xc0] sm:$0xff] }
0x11ec   : > { %4662 = vmatpush1.bf16.msra.mxu1 %v4661_v8  ;;  %v4663_v24 = vpack.c.bf16 %v3945_v56, %v3943_v55  ;;  %v3944_v45 = vld [vmem:[%s5974_s3 + $0xd0] sm:$0xff] }
0x11ed   : > { %v2497_v34 = vadd.f32 1.0, %v2494_v28  ;;  %4422 = vmatmul.mubr.msk.f32.vlgmr.msra.gmra.mrb[46].mxu0 %vm351_vm0, %v2499_v27  ;;  %v2492_v13 = vsub.f32 1.0, %v2489_v43  ;;  %v4665_v11 = vpack.c.bf16 %v3944_v45, %v3942_v49 }
0x11ee   : > { %4424 = vmatprep.mubr.msk.f32.mxu0 %vm4929_vm4, %v4925_v26  ;;  %4664 = vmatprep.subr.bf16.mxu1 %v4663_v24 }
0x11ef   : > { %v2500_v2 = vmul.f32 %v2497_v34, %v2422_v32  ;;  %v2495_v37 = vmul.f32 %v2492_v13, %v2432_v36 }
0x11f0   : > { %4666 = vmatpush1.bf16.msra.mxu1 %v4665_v11 }
0x11f1   : > { %4425 = vmatmul.mubr.msk.f32.gmra.mrb[48].mxu0 %vm351_vm0, %v2500_v2  ;;  %v2498_v39 = vadd.f32 1.0, %v2495_v37  ;;  %4667 = vmatprep.subr.bf16.mxu1 %v4926_v46 }
0x11f2   : > { %4427 = vmatprep.mubr.msk.f32.mxu0 %vm4929_vm4, %v4925_v26 }
0x11f3   : > { %v2501_v9 = vmul.f32 %v2498_v39, %v2423_v38  ;;  %v2650_v38 = vrot.slane %v5559_v30, %v5378_v58 }
0x11f5   : > { %4428 = vmatmul.mubr.msk.f32.gmra.mrb[50].mxu0 %vm351_vm0, %v2501_v9  ;;  %v2657_v9 = vrot.slane %v5559_v30, %v5381_v60 }
0x11f6   : > { %4451 = vmatprep.mubr.msk.f32.mxu0 %vm4929_vm4, %v4925_v26 }
0x12c0   : > { %v2591_v23 = vpop.f32.mrb[46].mxu0 }
0x12c1   : > { %v2592_v41 = vadd.f32 %v3934_v18, %v2591_v23  ;;  %v4423_v42 = vpop.f32.mrb[47].mxu0 }
0x12c3   : > { %v2605_v48 = vadd.f32 %v2592_v41, %v5565_v40 }
0x12c4   : > { %v2596_v17 = vpop.f32.mrb[48].mxu0 }
0x12c5   : > { %v2597_v50 = vadd.f32 %v3934_v18, %v2596_v17  ;;  %v4426_v19 = vpop.f32.mrb[49].mxu0  ;;  %v2608_v20 = vsel %vm474_vm3, %v2605_v48, 0.0 }
0x12c6   : > { %2609 = vadd.xlane.f32.xlu0 %v2608_v20 }
0x12c7   : > { %v2606_v21 = vadd.f32 %v2597_v50, %v5571_v47 }
0x12c8   : > { %v2601_v52 = vpop.f32.mrb[50].mxu0 }
0x12c9   : > { %v2611_v29 = vsel %vm474_vm3, %v2606_v21, 0.0  ;;  %v2602_v57 = vadd.f32 %v3934_v18, %v2601_v52  ;;  %v4429_v61 = vpop.f32.mrb[51].mxu0 }
0x12ca   : > { %2612 = vadd.xlane.f32.xlu1 %v2611_v29  ;;  %v3949_v61 = vld [vmem:[%s5974_s3 + $0xe8] ss:$0 sm:$0xff] }
0x12cb   : > { %v2607_v22 = vadd.f32 %v2602_v57, %v5577_v51  ;;  %v3948_v57 = vld [vmem:[%s5974_s3 + $0xe0] ss:$0 sm:$0xff] }
0x12cd   : > { %v2614_v62 = vsel %vm1172_vm10, %v2607_v22, 0.0 }
0x12ce   : > { %2615 = vadd.xlane.f32.xlu0 %v2614_v62 }
0x1353   : > { %v2610_v40 = vpop.xlane.xlu0 %2609 }
0x1354   : > { %v2617_v25 = vmul.f32 0.03125, %v2610_v40 }
0x1356   : > { %v2620_v5 = vsub.f32 %v2605_v48, %v2617_v25 }
0x1357   : > { %v2613_v35 = vpop.xlane.xlu1 %2612 }
0x1358   : > { %v2618_v0 = vmul.f32 0.03125, %v2613_v35  ;;  %v2623_v1 = vmul.f32 %v2620_v5, %v2620_v5 }
0x135a   : > { %v2621_v33 = vsub.f32 %v2606_v21, %v2618_v0  ;;  %v2626_v47 = vsel %vm474_vm3, %v2623_v1, 0.0 }
0x135b   : > { %2627 = vadd.xlane.f32.xlu1 %v2626_v47  ;;  %v2616_v6 = vpop.xlane.xlu0 %2615 }
0x135c   : > { %v2624_v7 = vmul.f32 %v2621_v33, %v2621_v33  ;;  %v2619_v54 = vmul.f32 0.03125, %v2616_v6 }
0x135e   : > { %v2629_v12 = vsel %vm474_vm3, %v2624_v7, 0.0  ;;  %v2622_v14 = vsub.f32 %v2607_v22, %v2619_v54 }
0x135f   : > { %2630 = vadd.xlane.f32.xlu0 %v2629_v12 }
0x1360   : > { %v2625_v51 = vmul.f32 %v2622_v14, %v2622_v14 }
0x1362   : > { %v2632_v10 = vsel %vm1172_vm10, %v2625_v51, 0.0 }
0x1363   : > { %2633 = vadd.xlane.f32.xlu1 %v2632_v10 }
0x13e8   : > { %v2628_v27 = vpop.xlane.xlu1 %2627 }
0x13e9   : > { %v2635_v28 = vmul.f32 0.03125, %v2628_v27 }
0x13eb   : > { %v2638_v43 = vadd.f32 1e-05, %v2635_v28 }
0x13ec   : > { %v2631_v32 = vpop.xlane.xlu0 %2630 }
0x13ed   : > { %4863 = vrsqrt.f32 %v2638_v43  ;;  %v2636_v34 = vmul.f32 0.03125, %v2631_v32 }
0x13ef   : > { %v2639_v13 = vadd.f32 1e-05, %v2636_v34 }
0x13f0   : > { %v2634_v2 = vpop.xlane.xlu1 %2633 }
0x13f1   : > { %4865 = vrsqrt.f32 %v2639_v13  ;;  %v2637_v36 = vmul.f32 0.03125, %v2634_v2 }
0x13f3   : > { %v2640_v37 = vadd.f32 1e-05, %v2637_v36 }
0x13f5   : > { %4867 = vrsqrt.f32 %v2640_v37 }
0x13f7   : > { %v4864_v39 = vpop.eup %4863 }
0x13f8   : > { %v2644_v18 = vmul.f32 %v4864_v39, %v2620_v5 }
0x13fa   : > { %v2651_v23 = vmul.f32 %v2650_v38, %v2644_v18 }
0x13fb   : > { %v4866_v41 = vpop.eup %4865 }
0x13fc   : > { %v5690_v42 = vadd.f32 %v2657_v9, %v2651_v23  ;;  %v2645_v48 = vmul.f32 %v4866_v41, %v2621_v33 }
0x13fe   : > { %3950 = vmatmul.mubr.msk.f32.vlgmr.msra.gmra.mrb[46].mxu1 %vm474_vm3, %v5690_v42  ;;  %v2652_v17 = vmul.f32 %v2650_v38, %v2645_v48 }
0x13ff   : > { %2759 = vmatprep.mubr.f32.mxu1 %v4925_v26  ;;  %v4868_v50 = vpop.eup %4867 }
0x1400   : > { %v5695_v19 = vadd.f32 %v2657_v9, %v2652_v17  ;;  %v2646_v20 = vmul.f32 %v4868_v50, %v2622_v14 }
0x1402   : > { %3951 = vmatmul.mubr.msk.f32.gmra.mrb[48].mxu1 %vm474_vm3, %v5695_v19  ;;  %v2653_v30 = vmul.f32 %v2650_v38, %v2646_v20 }
0x1403   : > { %2765 = vmatprep.mubr.f32.mxu1 %v4925_v26 }
0x1404   : > { %v5700_v21 = vadd.f32 %v2657_v9, %v2653_v30 }
0x1406   : > { %3952 = vmatmul.mubr.msk.f32.gmra.mrb[50].mxu1 %vm474_vm3, %v5700_v21 }
0x1407   : > { %4436 = vmatprep.mubr.msk.f32.mxu1 %vm4929_vm4, %v4925_v26 }
0x14d1   : > { %v2755_v52 = vpop.f32.mrb[46].mxu1 }
0x14d2   : > { %v2757_v29 = vpop.f32.mrb[47].mxu1  ;;  %v2756_v62 = vadd.f32 %v3948_v57, %v2755_v52 }
0x14d3   : > { %v5712_v5 = vadd.f32 %v3949_v61, %v2757_v29 }
0x14d5   : > { %v2761_v22 = vpop.f32.mrb[48].mxu1 }
0x14d6   : > { %v2762_v40 = vadd.f32 %v3948_v57, %v2761_v22  ;;  %v2763_v25 = vpop.f32.mrb[49].mxu1 }
0x14d7   : > { %v5714_v35 = vadd.f32 %v3949_v61, %v2763_v25 }
0x14d8   : > { %v4758_v0 = vpack.i.bf16 %v2762_v40, %v2756_v62 }
0x14d9   : > { %v4768_v1 = vpack.i.bf16 %v5714_v35, %v5712_v5  ;;  %v4672_v33 = vpack.c.bf16 %v5714_v35, %v5712_v5  ;;  %v2767_v47 = vpop.f32.mrb[50].mxu1 }
0x14da   : > { %4759 = vrot.lane.b32.xlu0 %v4758_v0, %s4928_s22  ;;  %v2768_v6 = vadd.f32 %v3948_v57, %v2767_v47  ;;  %v2769_v7 = vpop.f32.mrb[51].mxu1 }
0x14db   : > { %4673 = vmatpush3.bf16.msra.mxu0 %v4672_v33  ;;  %v5722_v54 = vadd.f32 %v3949_v61, %v2769_v7 }
0x14dc   : > { %4449 = vmatprep.subr.mxu0 %v4925_v26  ;;  %2787 = vrot.lane.b32.xlu1 %v2768_v6, %s4928_s22 }
0x14de   : > { %3019 = vrot.lane.b32.xlu0 %v2768_v6, %s4927_s21 }
0x14df   : > { %4450 = vmatpush3.msk.msra.mxu0 %vm448_vm2, %v5722_v54 }
0x14e0   : > { %4678 = vmatprep.subr.bf16.mxu0 %v4926_v46  ;;  %4764 = vrot.lane.b32.xlu1 %v4758_v0, %s4927_s21 }
0x14e2   : > { %3011 = vrot.lane.b32.xlu0 %v2762_v40, %s4930_s23 }
0x14e4   : > { %3009 = vrot.lane.b32.xlu1 %v2756_v62, %s4930_s23 }
0x14e8   : > { %3013 = vrot.lane.b32.xlu1 %v2768_v6, %s4930_s23 }
0x154c   : > { %v4760_v12 = vpop.permute.xlu0 %4759 }
0x154d   : > { %v4762_v14 = vunpack.i.h.bf16 %v4760_v12  ;;  %v4761_v51 = vunpack.i.l.bf16 %v4760_v12 }
0x154e   : > { %v2788_v15 = vpop.permute.xlu1 %2787 }
0x154f   : > { %v4668_v10 = vpack.c.bf16 %v4762_v14, %v4761_v51 }
0x1550   : > { %v3020_v8 = vpop.permute.xlu0 %3019 }
0x1551   : > { %4670 = vmatpush3.bf16.xpose.msk.msra.mxu1 %vm5112_vm5, %v4668_v10 }
0x1552   : > { %4434 = vmatprep.subr.mxu1 %v4925_v26  ;;  %v4765_v16 = vpop.permute.xlu1 %4764 }
0x1553   : > { %v4767_v4 = vunpack.i.h.bf16 %v4765_v16  ;;  %v4766_v63 = vunpack.i.l.bf16 %v4765_v16 }
0x1554   : > { %v3012_v55 = vpop.permute.xlu0 %3011 }
0x1555   : > { %v4675_v44 = vpack.c.bf16 %v4767_v4, %v4766_v63 }
0x1556   : > { %v3010_v3 = vpop.permute.xlu1 %3009 }
0x1559   : > { %4435 = vmatpush3.xpose.msk.msra.mxu1 %vm474_vm3, %v2788_v15 }
0x155a   : > { %4674 = vmatprep.subr.bf16.mxu1 %v4926_v46  ;;  %v3014_v56 = vpop.permute.xlu1 %3013 }
0x155c   : > { %4437 = vmatmul.mubr.msk.f32.vlgmr.msra.gmra.mrb[52].mxu1 %vm474_vm3, %v2756_v62 }
0x155d   : > { %4677 = vmatpush3.bf16.xpose.msk.msra.mxu1 %vm5112_vm5, %v4675_v44  ;;  %4439 = vmatprep.mubr.msk.f32.mxu1 %vm4929_vm4, %v4925_v26 }
0x155e   : > { %4464 = vmatprep.subr.mxu1 %v4925_v26 }
0x1560   : > { %4440 = vmatmul.mubr.msk.f32.gmra.mrb[54].mxu1 %vm474_vm3, %v2762_v40 }
0x1561   : > { %4442 = vmatprep.mubr.msk.f32.mxu1 %vm4929_vm4, %v4925_v26 }
0x1564   : > { %4443 = vmatmul.mubr.msk.f32.gmra.mrb[56].mxu1 %vm474_vm3, %v2768_v6 }
0x1565   : > { %4465 = vmatpush3.xpose.msk.msra.mxu1 %vm474_vm3, %v3020_v8  ;;  %4466 = vmatprep.mubr.msk.f32.mxu1 %vm4929_vm4, %v4925_v26 }
0x1566   : > { %4681 = vmatprep.subr.bf16.mxu1 %v4926_v46 }
0x1568   : > { %4467 = vmatmul.mubr.msk.f32.vlgmr.msra.gmra.mrb[58].mxu1 %vm474_vm3, %v3010_v3 }
0x1569   : > { %4469 = vmatprep.mubr.msk.f32.mxu1 %vm4929_vm4, %v4925_v26 }
0x156c   : > { %4470 = vmatmul.mubr.msk.f32.gmra.mrb[60].mxu1 %vm474_vm3, %v3012_v55 }
0x156d   : > { %4472 = vmatprep.mubr.msk.f32.mxu1 %vm4929_vm4, %v4925_v26 }
0x1570   : > { %4473 = vmatmul.mubr.msk.f32.gmra.mrb[62].mxu1 %vm474_vm3, %v3014_v56 }
0x1571   : > { %4500 = vmatprep.mubr.msk.f32.mxu1 %vm4929_vm4, %v4925_v26 }
0x162f   : > { %v2867_v24 = vpop.f32.mrb[52].mxu1 }
0x1630   : > { %v2881_v49 = vmul.f32 0.25, %v2867_v24  ;;  %v4438_v45 = vpop.f32.mrb[53].mxu1 }
0x1632   : > { %v2884_v11 = vsel %vm675_vm6, %v2881_v49, -inf }
0x1633   : > { %2885 = vmax.xlane.f32.xlu0 %v2884_v11  ;;  %v2872_v27 = vpop.f32.mrb[54].mxu1 }
0x1634   : > { %v2882_v28 = vmul.f32 0.25, %v2872_v27  ;;  %v4441_v43 = vpop.f32.mrb[55].mxu1  ;;  %v3956_v27 = vld [vmem:[%s5976_s5 + $0x30] sm:$0xff] }
0x1635   : > { %v3958_v43 = vld [vmem:[%s5976_s5 + $0x40] sm:$0x1] }
0x1636   : > { %v2887_v32 = vsel %vm675_vm6, %v2882_v28, -inf }
0x1637   : > { %2888 = vmax.xlane.f32.xlu1 %v2887_v32  ;;  %v2877_v34 = vpop.f32.mrb[56].mxu1 }
0x1638   : > { %v2883_v13 = vmul.f32 0.25, %v2877_v34  ;;  %v4444_v2 = vpop.f32.mrb[57].mxu1 }
0x163a   : > { %v2890_v36 = vsel %vm682_vm7, %v2883_v13, -inf }
0x163b   : > { %2891 = vmax.xlane.f32.xlu0 %v2890_v36  ;;  %v3099_v37 = vpop.f32.mrb[58].mxu1 }
0x163c   : > { %v3113_v38 = vmul.f32 0.25, %v3099_v37  ;;  %v4468_v39 = vpop.f32.mrb[59].mxu1 }
0x163e   : > { %v3116_v9 = vsel %vm675_vm6, %v3113_v38, -inf }
0x163f   : > { %3117 = vmax.xlane.f32.xlu0 %v3116_v9  ;;  %v3104_v18 = vpop.f32.mrb[60].mxu1 }
0x1640   : > { %v3114_v23 = vmul.f32 0.25, %v3104_v18  ;;  %v4471_v41 = vpop.f32.mrb[61].mxu1 }
0x1642   : > { %v3119_v48 = vsel %vm675_vm6, %v3114_v23, -inf }
0x1643   : > { %3120 = vmax.xlane.f32.xlu1 %v3119_v48  ;;  %v3109_v17 = vpop.f32.mrb[62].mxu1 }
0x1644   : > { %v3115_v50 = vmul.f32 0.25, %v3109_v17  ;;  %v4474_v20 = vpop.f32.mrb[63].mxu1 }
0x1646   : > { %v3122_v30 = vsel %vm682_vm7, %v3115_v50, -inf }
0x1647   : > { %3123 = vmax.xlane.f32.xlu0 %v3122_v30 }
0x16c0   : > { %v2886_v52 = vpop.xlane.xlu0 %2885 }
0x16c1   : > { %v2893_v29 = vsub.f32 %v2881_v49, %v2886_v52 }
0x16c3   : > { %v2896_v57 = vmul.f32 1.442695, %v2893_v29 }
0x16c4   : > { %v2889_v61 = vpop.xlane.xlu1 %2888 }
0x16c5   : > { %4869 = vpow2.f32 %v2896_v57  ;;  %v2894_v22 = vsub.f32 %v2882_v28, %v2889_v61  ;;  %v3957_v28 = vld [vmem:[%s5976_s5 + $0x38] sm:$0xff] }
0x16c7   : > { %v2898_v62 = vmul.f32 1.442695, %v2894_v22 }
0x16c8   : > { %v2892_v40 = vpop.xlane.xlu0 %2891 }
0x16c9   : > { %4871 = vpow2.f32 %v2898_v62  ;;  %v2895_v25 = vsub.f32 %v2883_v13, %v2892_v40 }
0x16cb   : > { %v2900_v0 = vmul.f32 1.442695, %v2895_v25 }
0x16cc   : > { %v3118_v33 = vpop.xlane.xlu0 %3117 }
0x16cd   : > { %4873 = vpow2.f32 %v2900_v0  ;;  %v3125_v47 = vsub.f32 %v3113_v38, %v3118_v33 }
0x16cf   : > { %v4870_v6 = vpop.eup %4869  ;;  %v3128_v7 = vmul.f32 1.442695, %v3125_v47 }
0x16d0   : > { %v3121_v12 = vpop.xlane.xlu1 %3120  ;;  %v2902_v14 = vsel %vm675_vm6, %v4870_v6, 0.0 }
0x16d1   : > { %4875 = vpow2.f32 %v3128_v7  ;;  %v3126_v51 = vsub.f32 %v3114_v23, %v3121_v12  ;;  %2903 = vadd.xlane.f32.xlu1 %v2902_v14 }
0x16d3   : > { %v4872_v10 = vpop.eup %4871  ;;  %v3130_v15 = vmul.f32 1.442695, %v3126_v51 }
0x16d4   : > { %v3124_v16 = vpop.xlane.xlu0 %3123  ;;  %v2905_v4 = vsel %vm675_vm6, %v4872_v10, 0.0 }
0x16d5   : > { %4877 = vpow2.f32 %v3130_v15  ;;  %v3127_v63 = vsub.f32 %v3115_v50, %v3124_v16  ;;  %2906 = vadd.xlane.f32.xlu0 %v2905_v4 }
0x16d7   : > { %v4874_v44 = vpop.eup %4873  ;;  %v3132_v8 = vmul.f32 1.442695, %v3127_v63 }
0x16d8   : > { %v2908_v3 = vsel %vm682_vm7, %v4874_v44, 0.0 }
0x16d9   : > { %4879 = vpow2.f32 %v3132_v8  ;;  %2909 = vadd.xlane.f32.xlu1 %v2908_v3  ;;  %v3953_v8 = vld [vmem:[%s5975_s4 + $0x30] sm:$0xff]  ;;  %v3954_v3 = vld [vmem:[%s5975_s4 + $0x38] sm:$0xff] }
0x16db   : > { %v4876_v55 = vpop.eup %4875 }
0x16dc   : > { %v3134_v56 = vsel %vm675_vm6, %v4876_v55, 0.0 }
0x16dd   : > { %3135 = vadd.xlane.f32.xlu0 %v3134_v56 }
0x16df   : > { %v4878_v24 = vpop.eup %4877 }
0x16e0   : > { %v3137_v49 = vsel %vm675_vm6, %v4878_v24, 0.0 }
0x16e1   : > { %3138 = vadd.xlane.f32.xlu1 %v3137_v49 }
0x16e3   : > { %v4880_v45 = vpop.eup %4879 }
0x16e4   : > { %v3140_v11 = vsel %vm682_vm7, %v4880_v45, 0.0 }
0x16e5   : > { %3141 = vadd.xlane.f32.xlu0 %v3140_v11 }
0x16f2   : > { %4769 = vrot.lane.b32.xlu1 %v4768_v1, %s4930_s23 }
0x16f6   : > { %3263 = vperm.xlu1 %4741, %v3956_v27  }
0x16fa   : > { %3268 = vperm.xlu1 %4741, %v3957_v28  }
0x16fb   : > { %3155 = vrot.lane.b32.xlu0 %v5722_v54, %s4930_s23 }
0x16ff   : > { %3273 = vperm.xlu0 %4742, %v3958_v43  }
0x175e   : > { %v2904_v5 = vpop.xlane.xlu1 %2903 }
0x175f   : > { %4881 = vrcp.f32 %v2904_v5 }
0x1762   : > { %v2907_v35 = vpop.xlane.xlu0 %2906 }
0x1763   : > { %4883 = vrcp.f32 %v2907_v35 }
0x1766   : > { %v2910_v1 = vpop.xlane.xlu1 %2909 }
0x1767   : > { %4885 = vrcp.f32 %v2910_v1 }
0x1769   : > { %v4882_v32 = vpop.eup %4881 }
0x176a   : > { %v2914_v34 = vmul.f32 %v4882_v32, %v4870_v6  ;;  %v3136_v13 = vpop.xlane.xlu0 %3135 }
0x176b   : > { %4887 = vrcp.f32 %v3136_v13 }
0x176c   : > { %4452 = vmatmul.mubr.msk.f32.vlgmr.msra.gmra.mrb[52].mxu0 %vm675_vm6, %v2914_v34 }
0x176d   : > { %v4884_v2 = vpop.eup %4883  ;;  %4454 = vmatprep.mubr.msk.f32.mxu0 %vm4929_vm4, %v4925_v26 }
0x176e   : > { %v3139_v54 = vpop.xlane.xlu1 %3138  ;;  %v2915_v36 = vmul.f32 %v4884_v2, %v4872_v10 }
0x176f   : > { %4889 = vrcp.f32 %v3139_v54 }
0x1770   : > { %4455 = vmatmul.mubr.msk.f32.gmra.mrb[54].mxu0 %vm675_vm6, %v2915_v36 }
0x1771   : > { %v4886_v37 = vpop.eup %4885  ;;  %4457 = vmatprep.mubr.msk.f32.mxu0 %vm4929_vm4, %v4925_v26 }
0x1772   : > { %v4770_v38 = vpop.permute.xlu1 %4769  ;;  %v3142_v39 = vpop.xlane.xlu0 %3141  ;;  %v2916_v9 = vmul.f32 %v4886_v37, %v4874_v44 }
0x1773   : > { %v4772_v18 = vunpack.i.h.bf16 %v4770_v38  ;;  %v4771_v23 = vunpack.i.l.bf16 %v4770_v38  ;;  %4891 = vrcp.f32 %v3142_v39 }
0x1774   : > { %4458 = vmatmul.mubr.msk.f32.gmra.mrb[56].mxu0 %vm675_vm6, %v2916_v9 }
0x1775   : > { %v4679_v41 = vpack.c.bf16 %v4772_v18, %v4771_v23  ;;  %4481 = vmatprep.mubr.msk.f32.mxu0 %vm4929_vm4, %v4925_v26  ;;  %v4888_v48 = vpop.eup %4887 }
0x1776   : > { %v3146_v17 = vmul.f32 %v4888_v48, %v4876_v55  ;;  %v3156_v50 = vpop.permute.xlu0 %3155  ;;  %v3955_v55 = vld [vmem:[%s5975_s4 + $0x40] sm:$0x1]  ;;  %v3264_v56 = vpop.permute.xlu1 %3263 }
0x1777   : > { %4680 = vmatpush3.bf16.msra.mxu0 %v4679_v41 }
0x1778   : > { %4479 = vmatprep.subr.mxu0 %v4925_v26 }
0x1779   : > { %v4890_v20 = vpop.eup %4889 }
0x177a   : > { %v3147_v30 = vmul.f32 %v4890_v20, %v4878_v24  ;;  %v3269_v27 = vpop.permute.xlu1 %3268 }
0x177b   : > { %4480 = vmatpush3.msk.msra.mxu0 %vm448_vm2, %v3156_v50 }
0x177c   : > { %4482 = vmatmul.mubr.msk.f32.vlgmr.msra.gmra.mrb[58].mxu0 %vm675_vm6, %v3146_v17  ;;  %4687 = vmatprep.subr.bf16.mxu0 %v4926_v46 }
0x177d   : > { %4484 = vmatprep.mubr.msk.f32.mxu0 %vm4929_vm4, %v4925_v26  ;;  %v4892_v52 = vpop.eup %4891 }
0x177e   : > { %v3148_v29 = vmul.f32 %v4892_v52, %v4880_v45  ;;  %v3274_v32 = vpop.permute.xlu0 %3273 }
0x1780   : > { %4485 = vmatmul.mubr.msk.f32.gmra.mrb[60].mxu0 %vm675_vm6, %v3147_v30 }
0x1781   : > { %4487 = vmatprep.mubr.msk.f32.mxu0 %vm4929_vm4, %v4925_v26 }
0x1784   : > { %4488 = vmatmul.mubr.msk.f32.gmra.mrb[62].mxu0 %vm675_vm6, %v3148_v29  ;;  %v3984_v29 = vld [vmem:[%s5978_s7 + $0x50] sm:$0xff] }
0x1785   : > { %4517 = vmatprep.mubr.msk.f32.mxu0 %vm4929_vm4, %v4925_v26 }
0x183f   : > { %v2995_v57 = vpop.f32.mrb[52].mxu0 }
0x1840   : > { %v4453_v61 = vpop.f32.mrb[53].mxu0 }
0x1843   : > { %v3000_v22 = vpop.f32.mrb[54].mxu0 }
0x1844   : > { %v4682_v62 = vpack.c.bf16 %v3000_v22, %v2995_v57  ;;  %v4456_v40 = vpop.f32.mrb[55].mxu0  ;;  %v3985_v57 = vld [vmem:[%s5978_s7 + $0x58] sm:$0xff]  ;;  %v3986_v22 = vld [vmem:[%s5978_s7 + $0x60] sm:$0xff] }
0x1845   : > { %v4688_v61 = vpack.c.bf16 %v3985_v57, %v3984_v29 }
0x1846   : > { %4683 = vmatpush3.bf16.msra.mxu1 %v4682_v62  ;;  %v3987_v62 = vld [vmem:[%s5978_s7 + $0x68] sm:$0xff] }
0x1847   : > { %v3005_v25 = vpop.f32.mrb[56].mxu0  ;;  %4684 = vmatprep.subr.bf16.mxu1 %v4926_v46  ;;  %4689 = vmatpush3.bf16.msra.mxu0 %v4688_v61  ;;  %v4691_v40 = vpack.c.bf16 %v3987_v62, %v3986_v22 }
0x1848   : > { %v4459_v0 = vpop.f32.mrb[57].mxu0  ;;  %4690 = vmatprep.subr.bf16.mxu0 %v4926_v46 }
0x184b   : > { %4692 = vmatpush3.bf16.msra.mxu0 %v4691_v40 }
0x184f   : > { %v3236_v33 = vpop.f32.mrb[58].mxu0 }
0x1850   : > { %v3253_v47 = vrot.slane %v3236_v33, 7  ;;  %v4483_v6 = vpop.f32.mrb[59].mxu0 }
0x1852   : > { %v3260_v7 = vsel %vm448_vm2, %v3005_v25, %v3253_v47 }
0x1853   : > { %v3241_v12 = vpop.f32.mrb[60].mxu0 }
0x1854   : > { %v3254_v14 = vrot.slane %v3241_v12, 7  ;;  %v4486_v51 = vpop.f32.mrb[61].mxu0 }
0x1855   : > { %v5859_v51 = vld [vmem:[%s5977_s6 + $0x8] sm:$0xf] }
0x1856   : > { %v3255_v10 = vsel %vm448_vm2, %v3253_v47, %v3254_v14 }
0x1857   : > { %v4685_v15 = vpack.c.bf16 %v3255_v10, %v3260_v7  ;;  %v3246_v16 = vpop.f32.mrb[62].mxu0 }
0x1858   : > { %v3256_v4 = vrot.slane %v3246_v16, 7  ;;  %v4489_v63 = vpop.f32.mrb[63].mxu0 }
0x1859   : > { %4686 = vmatpush3.bf16.msra.mxu1 %v4685_v15  ;;  %v3414_v15 = vrot.slane %v5859_v51, %v5242_v53 }
0x185a   : > { %v3257_v44 = vsel %vm448_vm2, %v3254_v14, %v3256_v4  ;;  %4498 = vmatprep.subr.mxu1 %v4925_v26  ;;  %v3421_v4 = vrot.slane %v5859_v51, %v5250_v59 }
0x185d   : > { %4499 = vmatpush3.msk.msra.mxu1 %vm1079_vm8, %v3257_v44 }
0x185e   : > { %4501 = vmatmul.mubr.msk.f32.vlgmr.msra.gmra.mrb[64].mxu1 %vm1069_vm9, %v3953_v8  ;;  %4693 = vmatprep.subr.bf16.mxu1 %v4926_v46 }
0x185f   : > { %4503 = vmatprep.mubr.msk.f32.mxu1 %vm4929_vm4, %v4925_v26 }
0x1862   : > { %4504 = vmatmul.mubr.msk.f32.gmra.mrb[66].mxu1 %vm1069_vm9, %v3954_v3 }
0x1863   : > { %4506 = vmatprep.mubr.msk.f32.mxu1 %vm4929_vm4, %v4925_v26 }
0x1866   : > { %4507 = vmatmul.mubr.msk.f32.gmra.mrb[68].mxu1 %vm1069_vm9, %v3955_v55 }
0x1867   : > { %4542 = vmatprep.mubr.msk.f32.mxu1 %vm4929_vm4, %v4925_v26 }
0x1931   : > { %v3353_v24 = vpop.f32.mrb[64].mxu1 }
0x1932   : > { %v3354_v49 = vadd.f32 %v3353_v24, %v3264_v56  ;;  %v4502_v45 = vpop.f32.mrb[65].mxu1 }
0x1934   : > { %v3369_v11 = vadd.f32 %v3354_v49, %v5690_v42 }
0x1935   : > { %v3358_v28 = vpop.f32.mrb[66].mxu1 }
0x1936   : > { %v3359_v43 = vadd.f32 %v3358_v28, %v3269_v27  ;;  %v3372_v5 = vsel %vm474_vm3, %v3369_v11, 0.0  ;;  %v4505_v35 = vpop.f32.mrb[67].mxu1  ;;  %v3994_v27 = vld [vmem:[%s5979_s8 + $0x98] sm:$0xff] }
0x1937   : > { %3373 = vadd.xlane.f32.xlu1 %v3372_v5  ;;  %v3996_v5 = vld [vmem:[%s5979_s8 + $0xa8] sm:$0xff] }
0x1938   : > { %v3370_v1 = vadd.f32 %v3359_v43, %v5695_v19  ;;  %v3995_v43 = vld [vmem:[%s5979_s8 + $0xa0] sm:$0xff] }
0x1939   : > { %v3363_v34 = vpop.f32.mrb[68].mxu1  ;;  %v4697_v35 = vpack.c.bf16 %v3996_v5, %v3995_v43 }
0x193a   : > { %v3364_v13 = vadd.f32 %v3363_v34, %v3274_v32  ;;  %v3375_v2 = vsel %vm474_vm3, %v3370_v1, 0.0  ;;  %v4508_v54 = vpop.f32.mrb[69].mxu1  ;;  %v3998_v32 = vld [vmem:[%s5979_s8 + $0xb8] sm:$0xff] }
0x193b   : > { %3376 = vadd.xlane.f32.xlu0 %v3375_v2  ;;  %v4000_v2 = vld [vmem:[%s5979_s8 + $0xc8] sm:$0xff] }
0x193c   : > { %v3371_v36 = vadd.f32 %v3364_v13, %v5700_v21  ;;  %v3999_v13 = vld [vmem:[%s5979_s8 + $0xc0] sm:$0xff] }
0x193d   : > { %v4703_v54 = vpack.c.bf16 %v4000_v2, %v3999_v13 }
0x193e   : > { %v3378_v42 = vsel %vm1172_vm10, %v3371_v36, 0.0 }
0x193f   : > { %3379 = vadd.xlane.f32.xlu0 %v3378_v42 }
0x19c4   : > { %v3374_v37 = vpop.xlane.xlu1 %3373 }
0x19c5   : > { %v3381_v38 = vmul.f32 0.03125, %v3374_v37 }
0x19c7   : > { %v3384_v39 = vsub.f32 %v3369_v11, %v3381_v38  ;;  %v3993_v11 = vld [vmem:[%s5979_s8 + $0x90] sm:$0xff] }
0x19c8   : > { %v3377_v9 = vpop.xlane.xlu0 %3376  ;;  %v4694_v28 = vpack.c.bf16 %v3994_v27, %v3993_v11 }
0x19c9   : > { %v3382_v18 = vmul.f32 0.03125, %v3377_v9  ;;  %v3387_v23 = vmul.f32 %v3384_v39, %v3384_v39 }
0x19ca   : > { %4695 = vmatpush3.bf16.msra.mxu1 %v4694_v28 }
0x19cb   : > { %v3385_v41 = vsub.f32 %v3370_v1, %v3382_v18  ;;  %v3390_v19 = vsel %vm474_vm3, %v3387_v23, 0.0  ;;  %4696 = vmatprep.subr.bf16.mxu1 %v4926_v46  ;;  %v3997_v1 = vld [vmem:[%s5979_s8 + $0xb0] sm:$0xff] }
0x19cc   : > { %3391 = vadd.xlane.f32.xlu1 %v3390_v19  ;;  %v3380_v48 = vpop.xlane.xlu0 %3379  ;;  %v4700_v34 = vpack.c.bf16 %v3998_v32, %v3997_v1 }
0x19cd   : > { %v3383_v17 = vmul.f32 0.03125, %v3380_v48  ;;  %v3388_v50 = vmul.f32 %v3385_v41, %v3385_v41 }
0x19ce   : > { %4698 = vmatpush3.bf16.msra.mxu1 %v4697_v35 }
0x19cf   : > { %v3386_v20 = vsub.f32 %v3371_v36, %v3383_v17  ;;  %v3393_v30 = vsel %vm474_vm3, %v3388_v50, 0.0  ;;  %4699 = vmatprep.subr.bf16.mxu1 %v4926_v46  ;;  %v3989_v36 = vld [vmem:[%s5978_s7 + $0x70] ss:$0 sm:$0xff] }
0x19d0   : > { %3394 = vadd.xlane.f32.xlu0 %v3393_v30 }
0x19d1   : > { %v3389_v21 = vmul.f32 %v3386_v20, %v3386_v20 }
0x19d2   : > { %4701 = vmatpush3.bf16.msra.mxu1 %v4700_v34 }
0x19d3   : > { %v3396_v52 = vsel %vm1172_vm10, %v3389_v21, 0.0  ;;  %4702 = vmatprep.subr.bf16.mxu1 %v4926_v46 }
0x19d4   : > { %3397 = vadd.xlane.f32.xlu1 %v3396_v52 }
0x19d6   : > { %4704 = vmatpush3.bf16.msra.mxu1 %v4703_v54 }
0x1a59   : > { %v3392_v25 = vpop.xlane.xlu1 %3391 }
0x1a5a   : > { %v3399_v0 = vmul.f32 0.03125, %v3392_v25 }
0x1a5c   : > { %v3402_v33 = vadd.f32 1e-05, %v3399_v0 }
0x1a5d   : > { %v3395_v47 = vpop.xlane.xlu0 %3394 }
0x1a5e   : > { %4893 = vrsqrt.f32 %v3402_v33  ;;  %v3400_v6 = vmul.f32 0.03125, %v3395_v47 }
0x1a60   : > { %v3403_v7 = vadd.f32 1e-05, %v3400_v6 }
0x1a61   : > { %v3398_v12 = vpop.xlane.xlu1 %3397 }
0x1a62   : > { %4895 = vrsqrt.f32 %v3403_v7  ;;  %v3401_v14 = vmul.f32 0.03125, %v3398_v12 }
0x1a64   : > { %v3404_v10 = vadd.f32 1e-05, %v3401_v14 }
0x1a66   : > { %4897 = vrsqrt.f32 %v3404_v10 }
0x1a68   : > { %v4894_v16 = vpop.eup %4893 }
0x1a69   : > { %v3408_v63 = vmul.f32 %v4894_v16, %v3384_v39 }
0x1a6b   : > { %v3415_v44 = vmul.f32 %v3414_v15, %v3408_v63 }
0x1a6c   : > { %v4896_v8 = vpop.eup %4895 }
0x1a6d   : > { %v5865_v3 = vadd.f32 %v3421_v4, %v3415_v44  ;;  %v3409_v55 = vmul.f32 %v4896_v8, %v3385_v41 }
0x1a6f   : > { %4518 = vmatmul.mubr.msk.f32.vlgmr.msra.gmra.mrb[64].mxu0 %vm474_vm3, %v5865_v3  ;;  %v3416_v56 = vmul.f32 %v3414_v15, %v3409_v55 }
0x1a70   : > { %v4898_v24 = vpop.eup %4897  ;;  %4520 = vmatprep.mubr.msk.f32.mxu0 %vm4929_vm4, %v4925_v26 }
0x1a71   : > { %v5871_v49 = vadd.f32 %v3421_v4, %v3416_v56  ;;  %v3410_v53 = vmul.f32 %v4898_v24, %v3386_v20 }
0x1a73   : > { %4521 = vmatmul.mubr.msk.f32.gmra.mrb[66].mxu0 %vm474_vm3, %v5871_v49  ;;  %v3417_v59 = vmul.f32 %v3414_v15, %v3410_v53 }
0x1a74   : > { %4523 = vmatprep.mubr.msk.f32.mxu0 %vm4929_vm4, %v4925_v26 }
0x1a75   : > { %v5877_v45 = vadd.f32 %v3421_v4, %v3417_v59 }
0x1a77   : > { %4524 = vmatmul.mubr.msk.f32.gmra.mrb[68].mxu0 %vm474_vm3, %v5877_v45 }
0x1b42   : > { %v3510_v42 = vpop.f32.mrb[64].mxu0 }
0x1b43   : > { %v5911_v37 = vadd.f32 %v3989_v36, %v3510_v42  ;;  %v4519_v38 = vpop.f32.mrb[65].mxu0 }
0x1b45   : > { %v5914_v46 = vmul.f32 0.70710677, %v5911_v37 }
0x1b46   : > { %v3515_v39 = vpop.f32.mrb[66].mxu0 }
0x1b47   : > { %v3536_v9 = vand.u32 2147483647, %v5914_v46  ;;  %v5917_v18 = vadd.f32 %v3989_v36, %v3515_v39  ;;  %v4522_v23 = vpop.f32.mrb[67].mxu0  ;;  %vm3530_vm2 = vcmp.ge.f32.partialorder %v5914_v46, 0.0 }
0x1b49   : > { %v3539_v41 = vmul.f32 0.3275911, %v3536_v9  ;;  %v5920_v19 = vmul.f32 0.70710677, %v5917_v18  ;;  %v3578_v22 = vsub.f32 0.0, %v3536_v9 }
0x1b4a   : > { %v3520_v48 = vpop.f32.mrb[68].mxu0 }
0x1b4b   : > { %v3542_v17 = vadd.f32 1.0, %v3539_v41  ;;  %v3537_v50 = vand.u32 2147483647, %v5920_v19  ;;  %v4525_v20 = vpop.f32.mrb[69].mxu0  ;;  %v5923_v30 = vadd.f32 %v3989_v36, %v3520_v48  ;;  %v3581_v25 = vmul.f32 %v3578_v22, %v3536_v9 }
0x1b4c   : > { %v3533_v41 = vsel %vm3530_vm2, 1.0, %v4932_v31  ;;  %vm3531_vm5 = vcmp.ge.f32.partialorder %v5920_v19, 0.0 }
0x1b4d   : > { %4899 = vrcp.f32 %v3542_v17  ;;  %v3540_v21 = vmul.f32 0.3275911, %v3537_v50  ;;  %v5926_v52 = vmul.f32 0.70710677, %v5923_v30  ;;  %v3579_v0 = vsub.f32 0.0, %v3537_v50 }
0x1b4e   : > { %v3584_v7 = vmul.f32 1.442695, %v3581_v25  ;;  %v3534_v46 = vsel %vm3531_vm5, 1.0, %v4932_v31 }
0x1b4f   : > { %v3543_v29 = vadd.f32 1.0, %v3540_v21  ;;  %v3538_v57 = vand.u32 2147483647, %v5926_v52  ;;  %v3582_v12 = vmul.f32 %v3579_v0, %v3537_v50  ;;  %v3524_v21 = vmul.f32 0.5, %v5911_v37 }
0x1b50   : > { %vm3532_vm6 = vcmp.ge.f32.partialorder %v5926_v52, 0.0  ;;  %v3525_v0 = vmul.f32 0.5, %v5917_v18  ;;  %v4002_v52 = vld [vmem:[%s5979_s8 + $0xd0] ss:$0 sm:$0xff] }
0x1b51   : > { %4901 = vrcp.f32 %v3543_v29  ;;  %v3541_v61 = vmul.f32 0.3275911, %v3538_v57  ;;  %v3580_v15 = vsub.f32 0.0, %v3538_v57  ;;  %v3586_v63 = vmul.f32 1.442695, %v3582_v12 }
0x1b53   : > { %v3544_v62 = vadd.f32 1.0, %v3541_v61  ;;  %v3583_v56 = vmul.f32 %v3580_v15, %v3538_v57 }
0x1b55   : > { %4903 = vrcp.f32 %v3544_v62  ;;  %v3588_v43 = vmul.f32 1.442695, %v3583_v56 }
0x1b56   : > { %4905 = vpow2.f32 %v3584_v7  ;;  %v3526_v7 = vmul.f32 0.5, %v5923_v30 }
0x1b57   : > { %v4900_v40 = vpop.eup %4899  ;;  %4907 = vpow2.f32 %v3586_v63 }
0x1b58   : > { %v3551_v33 = vmul.f32 1.0614054, %v4900_v40  ;;  %4909 = vpow2.f32 %v3588_v43 }
0x1b5a   : > { %v3554_v47 = vadd.f32 -1.4531521, %v3551_v33 }
0x1b5b   : > { %v4902_v6 = vpop.eup %4901 }
0x1b5c   : > { %v3557_v14 = vmul.f32 %v4900_v40, %v3554_v47  ;;  %v3552_v10 = vmul.f32 1.0614054, %v4902_v6  ;;  %v3535_v47 = vsel %vm3532_vm6, 1.0, %v4932_v31 }
0x1b5e   : > { %v3560_v16 = vadd.f32 1.4214138, %v3557_v14  ;;  %v3555_v4 = vadd.f32 -1.4531521, %v3552_v10 }
0x1b5f   : > { %v4904_v44 = vpop.eup %4903 }
0x1b60   : > { %v3563_v8 = vmul.f32 %v4900_v40, %v3560_v16  ;;  %v3558_v55 = vmul.f32 %v4902_v6, %v3555_v4  ;;  %v3553_v24 = vmul.f32 1.0614054, %v4904_v44  ;;  %v4906_v2 = vpop.eup %4905 }
0x1b61   : > { %v4908_v23 = vpop.eup %4907 }
0x1b62   : > { %v3566_v53 = vadd.f32 -0.28449672, %v3563_v8  ;;  %v3561_v59 = vadd.f32 1.4214138, %v3558_v55  ;;  %v3556_v11 = vadd.f32 -1.4531521, %v3553_v24  ;;  %v4910_v22 = vpop.eup %4909 }
0x1b64   : > { %v3569_v27 = vmul.f32 %v4900_v40, %v3566_v53  ;;  %v3564_v28 = vmul.f32 %v4902_v6, %v3561_v59  ;;  %v3559_v5 = vmul.f32 %v4904_v44, %v3556_v11 }
0x1b66   : > { %v3572_v35 = vadd.f32 0.2548296, %v3569_v27  ;;  %v3567_v1 = vadd.f32 -0.28449672, %v3564_v28  ;;  %v3562_v32 = vadd.f32 1.4214138, %v3559_v5 }
0x1b68   : > { %v3575_v34 = vmul.f32 %v4900_v40, %v3572_v35  ;;  %v3570_v13 = vmul.f32 %v4902_v6, %v3567_v1  ;;  %v3565_v54 = vmul.f32 %v4904_v44, %v3562_v32 }
0x1b6a   : > { %v3590_v36 = vmul.f32 %v4906_v2, %v3575_v34  ;;  %v3573_v42 = vadd.f32 0.2548296, %v3570_v13  ;;  %v3568_v38 = vadd.f32 -0.28449672, %v3565_v54 }
0x1b6c   : > { %v3593_v39 = vsub.f32 1.0, %v3590_v36  ;;  %v3576_v9 = vmul.f32 %v4902_v6, %v3573_v42  ;;  %v3571_v48 = vmul.f32 %v4904_v44, %v3568_v38 }
0x1b6e   : > { %v3596_v17 = vmul.f32 %v3593_v39, %v3533_v41  ;;  %v3591_v50 = vmul.f32 %v4908_v23, %v3576_v9  ;;  %v3574_v20 = vadd.f32 0.2548296, %v3571_v48 }
0x1b70   : > { %v3599_v29 = vadd.f32 1.0, %v3596_v17  ;;  %v3594_v57 = vsub.f32 1.0, %v3591_v50  ;;  %v3577_v61 = vmul.f32 %v4904_v44, %v3574_v20  ;;  %v3753_v17 = vrot.slane %v5859_v51, %v5378_v58 }
0x1b71   : > { %v3760_v20 = vrot.slane %v5859_v51, %v5381_v60 }
0x1b72   : > { %v3602_v62 = vmul.f32 %v3599_v29, %v3524_v21  ;;  %v3597_v40 = vmul.f32 %v3594_v57, %v3534_v46  ;;  %v3592_v25 = vmul.f32 %v4910_v22, %v3577_v61 }
0x1b74   : > { %v3600_v33 = vadd.f32 1.0, %v3597_v40  ;;  %4543 = vmatmul.mubr.msk.f32.vlgmr.msra.gmra.mrb[70].mxu1 %vm351_vm0, %v3602_v62  ;;  %v3595_v19 = vsub.f32 1.0, %v3592_v25 }
0x1b75   : > { %4545 = vmatprep.mubr.msk.f32.mxu1 %vm4929_vm4, %v4925_v26 }
0x1b76   : > { %v3603_v37 = vmul.f32 %v3600_v33, %v3525_v0  ;;  %v3598_v6 = vmul.f32 %v3595_v19, %v3535_v47 }
0x1b78   : > { %4546 = vmatmul.mubr.msk.f32.gmra.mrb[72].mxu1 %vm351_vm0, %v3603_v37  ;;  %v3601_v12 = vadd.f32 1.0, %v3598_v6 }
0x1b79   : > { %4548 = vmatprep.mubr.msk.f32.mxu1 %vm4929_vm4, %v4925_v26 }
0x1b7a   : > { %v3604_v18 = vmul.f32 %v3601_v12, %v3526_v7 }
0x1b7c   : > { %4549 = vmatmul.mubr.msk.f32.gmra.mrb[74].mxu1 %vm351_vm0, %v3604_v18 }
0x1c47   : > { %v3694_v14 = vpop.f32.mrb[70].mxu1 }
0x1c48   : > { %v3695_v10 = vadd.f32 %v4002_v52, %v3694_v14  ;;  %v4544_v15 = vpop.f32.mrb[71].mxu1 }
0x1c4a   : > { %v3708_v31 = vadd.f32 %v3695_v10, %v5865_v3 }
0x1c4b   : > { %v3699_v16 = vpop.f32.mrb[72].mxu1 }
0x1c4c   : > { %v3700_v4 = vadd.f32 %v4002_v52, %v3699_v16  ;;  %v4547_v63 = vpop.f32.mrb[73].mxu1  ;;  %v3711_v30 = vsel %vm474_vm3, %v3708_v31, 0.0 }
0x1c4d   : > { %3712 = vadd.xlane.f32.xlu0 %v3711_v30 }
0x1c4e   : > { %v3709_v26 = vadd.f32 %v3700_v4, %v5871_v49 }
0x1c4f   : > { %v3704_v44 = vpop.f32.mrb[74].mxu1 }
0x1c50   : > { %v3714_v8 = vsel %vm474_vm3, %v3709_v26, 0.0  ;;  %v3705_v55 = vadd.f32 %v4002_v52, %v3704_v44  ;;  %v4550_v56 = vpop.f32.mrb[75].mxu1 }
0x1c51   : > { %3715 = vadd.xlane.f32.xlu1 %v3714_v8 }
0x1c52   : > { %v3710_v24 = vadd.f32 %v3705_v55, %v5877_v45 }
0x1c54   : > { %v3717_v53 = vsel %vm1172_vm10, %v3710_v24, 0.0 }
0x1c55   : > { %3718 = vadd.xlane.f32.xlu0 %v3717_v53 }
0x1cda   : > { %v3713_v3 = vpop.xlane.xlu0 %3712 }
0x1cdb   : > { %v3720_v59 = vmul.f32 0.03125, %v3713_v3 }
0x1cdd   : > { %v3723_v11 = vsub.f32 %v3708_v31, %v3720_v59 }
0x1cde   : > { %v3716_v27 = vpop.xlane.xlu1 %3715 }
0x1cdf   : > { %v3721_v28 = vmul.f32 0.03125, %v3716_v27  ;;  %v3726_v43 = vmul.f32 %v3723_v11, %v3723_v11 }
0x1ce1   : > { %v3724_v5 = vsub.f32 %v3709_v26, %v3721_v28  ;;  %v3729_v49 = vsel %vm474_vm3, %v3726_v43, 0.0 }
0x1ce2   : > { %3730 = vadd.xlane.f32.xlu1 %v3729_v49  ;;  %v3719_v35 = vpop.xlane.xlu0 %3718 }
0x1ce3   : > { %v3727_v1 = vmul.f32 %v3724_v5, %v3724_v5  ;;  %v3722_v32 = vmul.f32 0.03125, %v3719_v35 }
0x1ce5   : > { %v3732_v34 = vsel %vm474_vm3, %v3727_v1, 0.0  ;;  %v3725_v13 = vsub.f32 %v3710_v24, %v3722_v32 }
0x1ce6   : > { %3733 = vadd.xlane.f32.xlu0 %v3732_v34 }
0x1ce7   : > { %v3728_v45 = vmul.f32 %v3725_v13, %v3725_v13 }
0x1ce9   : > { %v3735_v2 = vsel %vm1172_vm10, %v3728_v45, 0.0 }
0x1cea   : > { %3736 = vadd.xlane.f32.xlu1 %v3735_v2 }
0x1d6f   : > { %v3731_v54 = vpop.xlane.xlu1 %3730 }
0x1d70   : > { %v3738_v36 = vmul.f32 0.03125, %v3731_v54 }
0x1d72   : > { %v3741_v42 = vadd.f32 1e-05, %v3738_v36 }
0x1d73   : > { %v3734_v38 = vpop.xlane.xlu0 %3733 }
0x1d74   : > { %4911 = vrsqrt.f32 %v3741_v42  ;;  %v3739_v39 = vmul.f32 0.03125, %v3734_v38 }
0x1d76   : > { %v3742_v9 = vadd.f32 1e-05, %v3739_v39 }
0x1d77   : > { %v3737_v23 = vpop.xlane.xlu1 %3736 }
0x1d78   : > { %4913 = vrsqrt.f32 %v3742_v9  ;;  %v3740_v41 = vmul.f32 0.03125, %v3737_v23 }
0x1d7a   : > { %v3743_v48 = vadd.f32 1e-05, %v3740_v41 }
0x1d7c   : > { %4915 = vrsqrt.f32 %v3743_v48 }
0x1d7e   : > { %v4912_v50 = vpop.eup %4911 }
0x1d7f   : > { %v3747_v21 = vmul.f32 %v4912_v50, %v3723_v11 }
0x1d81   : > { %v3754_v29 = vmul.f32 %v3753_v17, %v3747_v21 }
0x1d82   : > { %v4914_v57 = vpop.eup %4913 }
0x1d83   : > { %v3761_v46 = vadd.f32 %v3760_v20, %v3754_v29  ;;  %v3748_v61 = vmul.f32 %v4914_v57, %v3724_v5 }
0x1d85   : > { %3764 = vst.msk [vmem:[%s332_s24] sm:$0xff] %vm474_vm3, %v3761_v46  ;;  %v3755_v22 = vmul.f32 %v3753_v17, %v3748_v61 }
0x1d86   : > { %v4916_v62 = vpop.eup %4915 }
0x1d87   : > { %v3762_v58 = vadd.f32 %v3760_v20, %v3755_v22  ;;  %v3749_v40 = vmul.f32 %v4916_v62, %v3725_v13 }
0x1d89   : > { %3765 = vst.msk [vmem:[%s332_s24 + $0x8] sm:$0xff] %vm474_vm3, %v3762_v58  ;;  %v3756_v25 = vmul.f32 %v3753_v17, %v3749_v40 }
0x1d8b   : > { %v3763_v0 = vadd.f32 %v3760_v20, %v3756_v25 }
0x1d8d   : > { %3766 = vst.msk [vmem:[%s332_s24 + $0x10] sm:$0x1] %vm1172_vm10, %v3763_v0 }
0x1d8e PF: > { %s19_s30 = sadd.s32 1, %s4923_s30  }
0x1d8f   : > { %p16_p4 = scmp.ge.s32.totalorder %s19_s30, 4  }
0x1d91   :  { %18 = sbr.rel (!%p16_p4) target bundleno = 1 (0x1), region = 98 }

</bundles_post_ra>
